<compile_context>
chip_gen: v7x
topology: tpu7x:2x2x1
jax: 0.10.0
libtpu: 0.0.40
codegen_flags: <defaults>
</compile_context>

<pallas_src>
import functools

import jax
import jax.numpy as jnp
import numpy as np
from jax.experimental import pallas as pl
from jax.experimental.pallas import tpu as pltpu

NEG_INF = -1e30
LANE = 128


def pointnet_kernel(pts_ref, w1_ref, b1_ref, w2_ref, b2_ref, w3_ref, b3_ref,
                    w4_ref, b4_ref, w5_ref, b5_ref, w6_ref, b6_ref, out_ref,
                    *, cpg, n_pts):
    f32 = jnp.float32
    bf16 = jnp.bfloat16

    # ---- per-point MLP on cpg*N point rows ---------------------------------
    pts = pts_ref[...]                                   # (cpg*N, 3) f32
    w1 = w1_ref[...]                                     # (3, 64)   f32
    # fc1 has K=3: three VPU broadcast-FMAs beat a degenerate MXU matmul.
    h = (pts[:, 0:1] * w1[0:1, :]
         + pts[:, 1:2] * w1[1:2, :]
         + pts[:, 2:3] * w1[2:3, :]
         + b1_ref[...])
    h = jnp.maximum(h, 0.0)                              # (cpg*N, 64)

    h = jnp.dot(h.astype(bf16), w2_ref[...], preferred_element_type=f32)
    h = jnp.maximum(h + b2_ref[...], 0.0)                # (cpg*N, 128)

    h = jnp.dot(h.astype(bf16), w3_ref[...], preferred_element_type=f32)
    h = jnp.maximum(h + b3_ref[...], 0.0)                # (cpg*N, 1024)

    # ---- global max-pool over the N points of each cloud (torch.max dim 2) --
    g = jnp.max(h.reshape(cpg, n_pts, h.shape[-1]), axis=1)   # (cpg, 1024)

    # ---- head MLP -----------------------------------------------------------
    h = jnp.dot(g.astype(bf16), w4_ref[...], preferred_element_type=f32)
    h = jnp.maximum(h + b4_ref[...], 0.0)                # (cpg, 512)

    h = jnp.dot(h.astype(bf16), w5_ref[...], preferred_element_type=f32)
    h = jnp.maximum(h + b5_ref[...], 0.0)                # (cpg, 256)

    logits = jnp.dot(h.astype(bf16), w6_ref[...], preferred_element_type=f32)
    logits = logits + b6_ref[...]                        # (cpg, 128); padded lanes = -1e30

    # softmax over the lane-padded class dim; padded lanes get exactly 0 prob.
    m = jnp.max(logits, axis=-1, keepdims=True)
    e = jnp.exp(logits - m)
    out_ref[...] = e / jnp.sum(e, axis=-1, keepdims=True)


def init_params(key):
    """Deterministic PyTorch-Linear-style init. Weights stored as (in, out)."""
    dims = [(3, 64), (64, 128), (128, 1024), (1024, 512), (512, 256), (256, 2)]
    params = []
    for fan_in, fan_out in dims:
        key, kw, kb = jax.random.split(key, 3)
        bound = 1.0 / np.sqrt(fan_in)
        W = jax.random.uniform(kw, (fan_in, fan_out), jnp.float32, -bound, bound)
        b = jax.random.uniform(kb, (1, fan_out), jnp.float32, -bound, bound)
        params.append((W, b))
    return params


def pointnet_forward(x, params, clouds_per_step=None):
    B, G, N, C = x.shape
    BG = B * G
    (W1, b1), (W2, b2), (W3, b3), (W4, b4), (W5, b5), (W6, b6) = params
    n_classes = W6.shape[1]

    # Clouds per grid step: aim for >=256 point-rows in the per-point matmuls
    # and a sublane-aligned (multiple of 8) head/output tile.
    if clouds_per_step is None:
        clouds_per_step = max(8, -(-256 // N))
    cpg = ((clouds_per_step + 7) // 8) * 8
    bg_pad = -(-BG // cpg) * cpg

    # Flatten to (BG_pad*N, 3).  Padding is done with WHOLE zero clouds only,
    # so padded point rows can never contaminate a real cloud's max-pool; their
    # output rows are sliced off below.
    pts = x.reshape(BG, N, C).astype(jnp.float32)
    if bg_pad != BG:
        pts = jnp.concatenate(
            [pts, jnp.zeros((bg_pad - BG, N, C), jnp.float32)], axis=0)
    pts = pts.reshape(bg_pad * N, C)

    # Weights: fc1 stays f32 (VPU path, K=3); fc2..fc6 in bf16 for the MXU.
    bf16 = jnp.bfloat16
    W2b, W3b, W4b, W5b = (w.astype(bf16) for w in (W2, W3, W4, W5))
    # Lane-pad fc6 so the softmax output is a dense 128-lane tile: zero weight
    # columns + -1e30 bias on padded lanes -> exactly 0 probability there.
    W6p = jnp.zeros((W6.shape[0], LANE), bf16).at[:, :n_classes].set(W6.astype(bf16))
    b6p = jnp.full((1, LANE), NEG_INF, jnp.float32).at[:, :n_classes].set(b6)

    def whole(arr):
        nd = arr.ndim
        return pl.BlockSpec(arr.shape, lambda i, nd=nd: (0,) * nd)

    in_specs = [
        pl.BlockSpec((cpg * N, C), lambda i: (i, 0)),   # cpg clouds per step
        whole(W1), whole(b1),
        whole(W2b), whole(b2),
        whole(W3b), whole(b3),
        whole(W4b), whole(b4),
        whole(W5b), whole(b5),
        whole(W6p), whole(b6p),
    ]

    weight_args = (W1, b1, W2b, b2, W3b, b3, W4b, b4, W5b, b5, W6p, b6p)
    flops = 2 * bg_pad * (N * (3 * 64 + 64 * 128 + 128 * 1024)
                          + 1024 * 512 + 512 * 256 + 256 * n_classes)
    bytes_accessed = int(
        pts.size * pts.dtype.itemsize
        + sum(int(a.size) * a.dtype.itemsize for a in weight_args)
        + bg_pad * LANE * 4)

    kernel = functools.partial(pointnet_kernel, cpg=cpg, n_pts=N)

    out = pl.pallas_call(
        kernel,
        out_shape=jax.ShapeDtypeStruct((bg_pad, LANE), jnp.float32),
        grid=(bg_pad // cpg,),
        in_specs=in_specs,
        out_specs=pl.BlockSpec((cpg, LANE), lambda i: (i, 0)),
        compiler_params=pltpu.CompilerParams(
            # no cross-step state -> safe to shard across TCs (helps v7x)
            dimension_semantics=("parallel",),
            vmem_limit_bytes=32 * 1024 * 1024,
        ),
        cost_estimate=pl.CostEstimate(
            flops=flops,
            transcendentals=bg_pad * LANE,
            bytes_accessed=bytes_accessed),
    )(pts, *weight_args)

    return out[:BG, :n_classes]


def reference_forward(x, params):
    """Pure-f32 JAX mirror of the PyTorch forward (semantic reference)."""
    (W1, b1), (W2, b2), (W3, b3), (W4, b4), (W5, b5), (W6, b6) = params
    h = jax.nn.relu(x @ W1 + b1[0])
    h = jax.nn.relu(h @ W2 + b2[0])
    h = jax.nn.relu(h @ W3 + b3[0])
    g = jnp.max(h, axis=2, keepdims=True)        # torch.max(x, 2, keepdim=True)[0]
    g = g.reshape(-1, 1024)                      # x.view(-1, 1024)
    h = jax.nn.relu(g @ W4 + b4[0])
    h = jax.nn.relu(h @ W5 + b5[0])
    logits = h @ W6 + b6[0]
    return jax.nn.softmax(logits, axis=1)


def reference_forward_bf16(x, params):
    """Mirror of the kernel's mixed bf16/f32 scheme (tight numeric check)."""
    bf16, f32 = jnp.bfloat16, jnp.float32
    (W1, b1), (W2, b2), (W3, b3), (W4, b4), (W5, b5), (W6, b6) = params
    B, G, N, C = x.shape

    def dot(a, w):
        return jnp.dot(a.astype(bf16), w.astype(bf16), preferred_element_type=f32)

    h = jax.nn.relu(x.reshape(-1, C) @ W1 + b1[0])       # f32 (K=3)
    h = jax.nn.relu(dot(h, W2) + b2[0])
    h = jax.nn.relu(dot(h, W3) + b3[0])
    g = jnp.max(h.reshape(B * G, N, -1), axis=1)
    h = jax.nn.relu(dot(g, W4) + b4[0])
    h = jax.nn.relu(dot(h, W5) + b5[0])
    logits = dot(h, W6) + b6[0]
    return jax.nn.softmax(logits, axis=1)


if __name__ == "__main__":
    key = jax.random.PRNGKey(0)
    kp, kx = jax.random.split(key)
    params = init_params(kp)

    B, G, N = 2, 1, 16
    x = jax.random.normal(kx, (B, G, N, 3), jnp.float32)

    out = pointnet_forward(x, params)
    out = jax.block_until_ready(out)
    assert out.shape == (B * G, 2), out.shape

    out_np = np.asarray(out)
    # Rows must sum to 1 (padded class lanes contribute exactly 0 probability).
    np.testing.assert_allclose(out_np.sum(axis=1), 1.0, rtol=0, atol=1e-5)
    # Tight check against a reference mirroring the kernel's bf16/f32 scheme.
    np.testing.assert_allclose(
        out_np, np.asarray(reference_forward_bf16(x, params)), rtol=0, atol=2e-3)
    # Loose sanity check against the pure-f32 PyTorch-equivalent forward
    # (kernel uses bf16 matmuls, so a few-percent tolerance is expected).
    np.testing.assert_allclose(
        out_np, np.asarray(reference_forward(x, params)), rtol=0, atol=8e-2)

    print("KERNEL_OK")
</pallas_src>

<mosaic_0001>
module attributes {stable_mosaic.version = 11 : i64} {
  func.func @pointnet_kernel(%arg0: i32, %arg1: memref<256x3xf32, #tpu.memory_space<vmem>>, %arg2: memref<3x64xf32, #tpu.memory_space<vmem>>, %arg3: memref<1x64xf32, #tpu.memory_space<vmem>>, %arg4: memref<64x128xbf16, #tpu.memory_space<vmem>>, %arg5: memref<1x128xf32, #tpu.memory_space<vmem>>, %arg6: memref<128x1024xbf16, #tpu.memory_space<vmem>>, %arg7: memref<1x1024xf32, #tpu.memory_space<vmem>>, %arg8: memref<1024x512xbf16, #tpu.memory_space<vmem>>, %arg9: memref<1x512xf32, #tpu.memory_space<vmem>>, %arg10: memref<512x256xbf16, #tpu.memory_space<vmem>>, %arg11: memref<1x256xf32, #tpu.memory_space<vmem>>, %arg12: memref<256x128xbf16, #tpu.memory_space<vmem>>, %arg13: memref<1x128xf32, #tpu.memory_space<vmem>>, %arg14: memref<16x128xf32, #tpu.memory_space<vmem>>) attributes {dimension_semantics = [#tpu.dimension_semantics<parallel>], iteration_bounds = array<i64: 1>, scalar_prefetch = 0 : i64, scratch_operands = 0 : i64, tpu.core_type = #tpu.core_type<tc>, window_params = [{transform_indices = @transform_0, window_bounds = array<i64: 256, 3>}, {pipeline_mode = #tpu.pipeline_mode<synchronous>, transform_indices = @transform_1, window_bounds = array<i64: 3, 64>}, {pipeline_mode = #tpu.pipeline_mode<synchronous>, transform_indices = @transform_2, window_bounds = array<i64: 1, 64>}, {pipeline_mode = #tpu.pipeline_mode<synchronous>, transform_indices = @transform_3, window_bounds = array<i64: 64, 128>}, {pipeline_mode = #tpu.pipeline_mode<synchronous>, transform_indices = @transform_4, window_bounds = array<i64: 1, 128>}, {pipeline_mode = #tpu.pipeline_mode<synchronous>, transform_indices = @transform_5, window_bounds = array<i64: 128, 1024>}, {pipeline_mode = #tpu.pipeline_mode<synchronous>, transform_indices = @transform_6, window_bounds = array<i64: 1, 1024>}, {pipeline_mode = #tpu.pipeline_mode<synchronous>, transform_indices = @transform_7, window_bounds = array<i64: 1024, 512>}, {pipeline_mode = #tpu.pipeline_mode<synchronous>, transform_indices = @transform_8, window_bounds = array<i64: 1, 512>}, {pipeline_mode = #tpu.pipeline_mode<synchronous>, transform_indices = @transform_9, window_bounds = array<i64: 512, 256>}, {pipeline_mode = #tpu.pipeline_mode<synchronous>, transform_indices = @transform_10, window_bounds = array<i64: 1, 256>}, {pipeline_mode = #tpu.pipeline_mode<synchronous>, transform_indices = @transform_11, window_bounds = array<i64: 256, 128>}, {pipeline_mode = #tpu.pipeline_mode<synchronous>, transform_indices = @transform_12, window_bounds = array<i64: 1, 128>}, {transform_indices = @transform_13, window_bounds = array<i64: 16, 128>}]} {
    %c0 = arith.constant 0 : index
    %c0_0 = arith.constant 0 : index
    %0 = vector.load %arg1[%c0, %c0_0] : memref<256x3xf32, #tpu.memory_space<vmem>>, vector<256x3xf32>
    %c0_1 = arith.constant 0 : index
    %c0_2 = arith.constant 0 : index
    %1 = vector.load %arg2[%c0_1, %c0_2] : memref<3x64xf32, #tpu.memory_space<vmem>>, vector<3x64xf32>
    %2 = vector.extract_strided_slice %0 {offsets = [0, 0], sizes = [256, 1], strides = [1, 1]} : vector<256x3xf32> to vector<256x1xf32>
    %3 = vector.extract_strided_slice %1 {offsets = [0, 0], sizes = [1, 64], strides = [1, 1]} : vector<3x64xf32> to vector<1x64xf32>
    %4 = vector.broadcast %2 : vector<256x1xf32> to vector<256x64xf32>
    %5 = vector.broadcast %3 : vector<1x64xf32> to vector<256x64xf32>
    %6 = arith.mulf %4, %5 : vector<256x64xf32>
    %7 = vector.extract_strided_slice %0 {offsets = [0, 1], sizes = [256, 1], strides = [1, 1]} : vector<256x3xf32> to vector<256x1xf32>
    %8 = vector.extract_strided_slice %1 {offsets = [1, 0], sizes = [1, 64], strides = [1, 1]} : vector<3x64xf32> to vector<1x64xf32>
    %9 = vector.broadcast %7 : vector<256x1xf32> to vector<256x64xf32>
    %10 = vector.broadcast %8 : vector<1x64xf32> to vector<256x64xf32>
    %11 = arith.mulf %9, %10 : vector<256x64xf32>
    %12 = arith.addf %6, %11 : vector<256x64xf32>
    %13 = vector.extract_strided_slice %0 {offsets = [0, 2], sizes = [256, 1], strides = [1, 1]} : vector<256x3xf32> to vector<256x1xf32>
    %14 = vector.extract_strided_slice %1 {offsets = [2, 0], sizes = [1, 64], strides = [1, 1]} : vector<3x64xf32> to vector<1x64xf32>
    %15 = vector.broadcast %13 : vector<256x1xf32> to vector<256x64xf32>
    %16 = vector.broadcast %14 : vector<1x64xf32> to vector<256x64xf32>
    %17 = arith.mulf %15, %16 : vector<256x64xf32>
    %18 = arith.addf %12, %17 : vector<256x64xf32>
    %c0_3 = arith.constant 0 : index
    %c0_4 = arith.constant 0 : index
    %19 = vector.load %arg3[%c0_3, %c0_4] : memref<1x64xf32, #tpu.memory_space<vmem>>, vector<1x64xf32>
    %20 = vector.broadcast %19 : vector<1x64xf32> to vector<256x64xf32>
    %21 = arith.addf %18, %20 : vector<256x64xf32>
    %cst = arith.constant 0.000000e+00 : f32
    %22 = vector.broadcast %cst : f32 to vector<256x64xf32>
    %23 = arith.maximumf %21, %22 : vector<256x64xf32>
    %24 = arith.truncf %23 : vector<256x64xf32> to vector<256x64xbf16>
    %c0_5 = arith.constant 0 : index
    %c0_6 = arith.constant 0 : index
    %25 = vector.load %arg4[%c0_5, %c0_6] : memref<64x128xbf16, #tpu.memory_space<vmem>>, vector<64x128xbf16>
    %cst_7 = arith.constant dense<0.000000e+00> : vector<256x128xf32>
    %26 = tpu.matmul %24, %25, %cst_7 {dimension_numbers = #tpu.dot_dimension_numbers<[1], [0], [0], [1], [0, 0, 1, 1], [], []>} : vector<256x64xbf16>, vector<64x128xbf16>, vector<256x128xf32> -> vector<256x128xf32>
    %c0_8 = arith.constant 0 : index
    %c0_9 = arith.constant 0 : index
    %27 = vector.load %arg5[%c0_8, %c0_9] : memref<1x128xf32, #tpu.memory_space<vmem>>, vector<1x128xf32>
    %28 = vector.broadcast %27 : vector<1x128xf32> to vector<256x128xf32>
    %29 = arith.addf %26, %28 : vector<256x128xf32>
    %cst_10 = arith.constant 0.000000e+00 : f32
    %30 = vector.broadcast %cst_10 : f32 to vector<256x128xf32>
    %31 = arith.maximumf %29, %30 : vector<256x128xf32>
    %32 = arith.truncf %31 : vector<256x128xf32> to vector<256x128xbf16>
    %c0_11 = arith.constant 0 : index
    %c0_12 = arith.constant 0 : index
    %33 = vector.load %arg6[%c0_11, %c0_12] : memref<128x1024xbf16, #tpu.memory_space<vmem>>, vector<128x1024xbf16>
    %cst_13 = arith.constant dense<0.000000e+00> : vector<256x1024xf32>
    %34 = tpu.matmul %32, %33, %cst_13 {dimension_numbers = #tpu.dot_dimension_numbers<[1], [0], [0], [1], [0, 0, 1, 1], [], []>} : vector<256x128xbf16>, vector<128x1024xbf16>, vector<256x1024xf32> -> vector<256x1024xf32>
    %c0_14 = arith.constant 0 : index
    %c0_15 = arith.constant 0 : index
    %35 = vector.load %arg7[%c0_14, %c0_15] : memref<1x1024xf32, #tpu.memory_space<vmem>>, vector<1x1024xf32>
    %36 = vector.broadcast %35 : vector<1x1024xf32> to vector<256x1024xf32>
    %37 = arith.addf %34, %36 : vector<256x1024xf32>
    %cst_16 = arith.constant 0.000000e+00 : f32
    %38 = vector.broadcast %cst_16 : f32 to vector<256x1024xf32>
    %39 = arith.maximumf %37, %38 : vector<256x1024xf32>
    %40 = vector.shape_cast %39 : vector<256x1024xf32> to vector<16x16x1024xf32>
    %cst_17 = arith.constant dense<0xFF800000> : vector<16x1024xf32>
    %41 = vector.multi_reduction <maximumf>, %40, %cst_17 [1] : vector<16x16x1024xf32> to vector<16x1024xf32>
    %42 = arith.truncf %41 : vector<16x1024xf32> to vector<16x1024xbf16>
    %c0_18 = arith.constant 0 : index
    %c0_19 = arith.constant 0 : index
    %43 = vector.load %arg8[%c0_18, %c0_19] : memref<1024x512xbf16, #tpu.memory_space<vmem>>, vector<1024x512xbf16>
    %cst_20 = arith.constant dense<0.000000e+00> : vector<16x512xf32>
    %44 = tpu.matmul %42, %43, %cst_20 {dimension_numbers = #tpu.dot_dimension_numbers<[1], [0], [0], [1], [0, 0, 1, 1], [], []>} : vector<16x1024xbf16>, vector<1024x512xbf16>, vector<16x512xf32> -> vector<16x512xf32>
    %c0_21 = arith.constant 0 : index
    %c0_22 = arith.constant 0 : index
    %45 = vector.load %arg9[%c0_21, %c0_22] : memref<1x512xf32, #tpu.memory_space<vmem>>, vector<1x512xf32>
    %46 = vector.broadcast %45 : vector<1x512xf32> to vector<16x512xf32>
    %47 = arith.addf %44, %46 : vector<16x512xf32>
    %cst_23 = arith.constant 0.000000e+00 : f32
    %48 = vector.broadcast %cst_23 : f32 to vector<16x512xf32>
    %49 = arith.maximumf %47, %48 : vector<16x512xf32>
    %50 = arith.truncf %49 : vector<16x512xf32> to vector<16x512xbf16>
    %c0_24 = arith.constant 0 : index
    %c0_25 = arith.constant 0 : index
    %51 = vector.load %arg10[%c0_24, %c0_25] : memref<512x256xbf16, #tpu.memory_space<vmem>>, vector<512x256xbf16>
    %cst_26 = arith.constant dense<0.000000e+00> : vector<16x256xf32>
    %52 = tpu.matmul %50, %51, %cst_26 {dimension_numbers = #tpu.dot_dimension_numbers<[1], [0], [0], [1], [0, 0, 1, 1], [], []>} : vector<16x512xbf16>, vector<512x256xbf16>, vector<16x256xf32> -> vector<16x256xf32>
    %c0_27 = arith.constant 0 : index
    %c0_28 = arith.constant 0 : index
    %53 = vector.load %arg11[%c0_27, %c0_28] : memref<1x256xf32, #tpu.memory_space<vmem>>, vector<1x256xf32>
    %54 = vector.broadcast %53 : vector<1x256xf32> to vector<16x256xf32>
    %55 = arith.addf %52, %54 : vector<16x256xf32>
    %cst_29 = arith.constant 0.000000e+00 : f32
    %56 = vector.broadcast %cst_29 : f32 to vector<16x256xf32>
    %57 = arith.maximumf %55, %56 : vector<16x256xf32>
    %58 = arith.truncf %57 : vector<16x256xf32> to vector<16x256xbf16>
    %c0_30 = arith.constant 0 : index
    %c0_31 = arith.constant 0 : index
    %59 = vector.load %arg12[%c0_30, %c0_31] : memref<256x128xbf16, #tpu.memory_space<vmem>>, vector<256x128xbf16>
    %cst_32 = arith.constant dense<0.000000e+00> : vector<16x128xf32>
    %60 = tpu.matmul %58, %59, %cst_32 {dimension_numbers = #tpu.dot_dimension_numbers<[1], [0], [0], [1], [0, 0, 1, 1], [], []>} : vector<16x256xbf16>, vector<256x128xbf16>, vector<16x128xf32> -> vector<16x128xf32>
    %c0_33 = arith.constant 0 : index
    %c0_34 = arith.constant 0 : index
    %61 = vector.load %arg13[%c0_33, %c0_34] : memref<1x128xf32, #tpu.memory_space<vmem>>, vector<1x128xf32>
    %62 = vector.broadcast %61 : vector<1x128xf32> to vector<16x128xf32>
    %63 = arith.addf %60, %62 : vector<16x128xf32>
    %cst_35 = arith.constant dense<0xFF800000> : vector<16xf32>
    %64 = vector.multi_reduction <maximumf>, %63, %cst_35 [1] : vector<16x128xf32> to vector<16xf32>
    %65 = vector.shape_cast %64 : vector<16xf32> to vector<16x1xf32>
    %66 = vector.broadcast %65 : vector<16x1xf32> to vector<16x128xf32>
    %67 = arith.subf %63, %66 : vector<16x128xf32>
    %68 = math.exp %67 : vector<16x128xf32>
    %cst_36 = arith.constant dense<0.000000e+00> : vector<16xf32>
    %69 = vector.multi_reduction <add>, %68, %cst_36 [1] : vector<16x128xf32> to vector<16xf32>
    %70 = vector.shape_cast %69 : vector<16xf32> to vector<16x1xf32>
    %71 = vector.broadcast %70 : vector<16x1xf32> to vector<16x128xf32>
    %72 = arith.divf %68, %71 : vector<16x128xf32>
    %c0_37 = arith.constant 0 : index
    %c0_38 = arith.constant 0 : index
    %73 = vector.load %arg14[%c0_37, %c0_38] : memref<16x128xf32, #tpu.memory_space<vmem>>, vector<16x128xf32>
    tpu.vector_store %arg14[%c0_37, %c0_38], %72 {strides = array<i32>} : memref<16x128xf32, #tpu.memory_space<vmem>>, vector<16x128xf32>,
    return
  }
  func.func @transform_0(%arg0: i32) -> (i32, i32) {
    %c0_i32 = arith.constant 0 : i32
    %c0_i32_0 = arith.constant 0 : i32
    return %arg0, %c0_i32 : i32, i32
  }
  func.func @transform_1(%arg0: i32) -> (i32, i32) {
    %c0_i32 = arith.constant 0 : i32
    %c0_i32_0 = arith.constant 0 : i32
    %c0_i32_1 = arith.constant 0 : i32
    return %c0_i32, %c0_i32_0 : i32, i32
  }
  func.func @transform_2(%arg0: i32) -> (i32, i32) {
    %c0_i32 = arith.constant 0 : i32
    %c0_i32_0 = arith.constant 0 : i32
    %c0_i32_1 = arith.constant 0 : i32
    return %c0_i32, %c0_i32_0 : i32, i32
  }
  func.func @transform_3(%arg0: i32) -> (i32, i32) {
    %c0_i32 = arith.constant 0 : i32
    %c0_i32_0 = arith.constant 0 : i32
    %c0_i32_1 = arith.constant 0 : i32
    return %c0_i32, %c0_i32_0 : i32, i32
  }
  func.func @transform_4(%arg0: i32) -> (i32, i32) {
    %c0_i32 = arith.constant 0 : i32
    %c0_i32_0 = arith.constant 0 : i32
    %c0_i32_1 = arith.constant 0 : i32
    return %c0_i32, %c0_i32_0 : i32, i32
  }
  func.func @transform_5(%arg0: i32) -> (i32, i32) {
    %c0_i32 = arith.constant 0 : i32
    %c0_i32_0 = arith.constant 0 : i32
    %c0_i32_1 = arith.constant 0 : i32
    return %c0_i32, %c0_i32_0 : i32, i32
  }
  func.func @transform_6(%arg0: i32) -> (i32, i32) {
    %c0_i32 = arith.constant 0 : i32
    %c0_i32_0 = arith.constant 0 : i32
    %c0_i32_1 = arith.constant 0 : i32
    return %c0_i32, %c0_i32_0 : i32, i32
  }
  func.func @transform_7(%arg0: i32) -> (i32, i32) {
    %c0_i32 = arith.constant 0 : i32
    %c0_i32_0 = arith.constant 0 : i32
    %c0_i32_1 = arith.constant 0 : i32
    return %c0_i32, %c0_i32_0 : i32, i32
  }
  func.func @transform_8(%arg0: i32) -> (i32, i32) {
    %c0_i32 = arith.constant 0 : i32
    %c0_i32_0 = arith.constant 0 : i32
    %c0_i32_1 = arith.constant 0 : i32
    return %c0_i32, %c0_i32_0 : i32, i32
  }
  func.func @transform_9(%arg0: i32) -> (i32, i32) {
    %c0_i32 = arith.constant 0 : i32
    %c0_i32_0 = arith.constant 0 : i32
    %c0_i32_1 = arith.constant 0 : i32
    return %c0_i32, %c0_i32_0 : i32, i32
  }
  func.func @transform_10(%arg0: i32) -> (i32, i32) {
    %c0_i32 = arith.constant 0 : i32
    %c0_i32_0 = arith.constant 0 : i32
    %c0_i32_1 = arith.constant 0 : i32
    return %c0_i32, %c0_i32_0 : i32, i32
  }
  func.func @transform_11(%arg0: i32) -> (i32, i32) {
    %c0_i32 = arith.constant 0 : i32
    %c0_i32_0 = arith.constant 0 : i32
    %c0_i32_1 = arith.constant 0 : i32
    return %c0_i32, %c0_i32_0 : i32, i32
  }
  func.func @transform_12(%arg0: i32) -> (i32, i32) {
    %c0_i32 = arith.constant 0 : i32
    %c0_i32_0 = arith.constant 0 : i32
    %c0_i32_1 = arith.constant 0 : i32
    return %c0_i32, %c0_i32_0 : i32, i32
  }
  func.func @transform_13(%arg0: i32) -> (i32, i32) {
    %c0_i32 = arith.constant 0 : i32
    %c0_i32_0 = arith.constant 0 : i32
    return %arg0, %c0_i32 : i32, i32
  }
}

</mosaic_0001>

<bundles_post_ra>
// kernel: tpu_custom_call.1
= control target key start
LH: loop header
LB: loop body
LE: loop exit
PB: predicated region body
PF: predicated region fallthrough
CT: control target
= control target key end

     0   :  { %18 = vsyncpa [#allocation3], 0  ;;  %s9671_s0 = inlined_call_operand.vmem [shape: f32[256,3], index: 0, kind: input, shape index: {}]   ;;  %s9672_s1 = inlined_call_operand.vmem [shape: f32[3,64], index: 1, kind: input, shape index: {}]   ;;  %s9673_s2 = inlined_call_operand.vmem [shape: f32[1,64], index: 2, kind: input, shape index: {}]   ;;  %s9674_s3 = inlined_call_operand.vmem [shape: bf16[64,128], index: 3, kind: input, shape index: {}]   ;;  %s9675_s4 = inlined_call_operand.vmem [shape: f32[1,128], index: 4, kind: input, shape index: {}]   ;;  %s9676_s5 = inlined_call_operand.hbm [shape: bf16[128,1024], index: 5, kind: input, shape index: {}]   ;;  %s9677_s6 = inlined_call_operand.vmem [shape: f32[1,1024], index: 6, kind: input, shape index: {}]   ;;  %s9678_s7 = inlined_call_operand.hbm [shape: bf16[1024,512], index: 7, kind: input, shape index: {}]   ;;  %s9679_s8 = inlined_call_operand.vmem [shape: f32[1,512], index: 8, kind: input, shape index: {}]   ;;  %s9680_s9 = inlined_call_operand.hbm [shape: bf16[512,256], index: 9, kind: input, shape index: {}]   ;;  %s9681_s10 = inlined_call_operand.vmem [shape: f32[1,256], index: 10, kind: input, shape index: {}]   ;;  %s9682_s11 = inlined_call_operand.vmem [shape: bf16[256,128], index: 11, kind: input, shape index: {}]   ;;  %s9683_s12 = inlined_call_operand.vmem [shape: f32[1,128], index: 12, kind: input, shape index: {}]   ;;  %s9684_s13 = inlined_call_operand.hbm [shape: f32[16,128], index: 13, kind: output, shape index: {}]  }
   0x1   :  { %19 = vsyncpa [#allocation6], 0 }
   0x2   :  { %20 = vsyncpa [#allocation4], 0  ;;  %s7785_s25 = smov [#allocation5]   ;;  %s7691_s29 = scalar_lea.hbm %s9678_s7, 32768 }
   0x3   :  { %s50_s26 = sshll.u32 %s7785_s25, 4  ;;  %p7692_p0 = scmp.ne.s32.totalorder %s9678_s7, %s7691_s29  ;;  %s51_s26 = int_to_ptr.vmem [resolvable:$true] %s50_s26 }
   0x4   :  { %p7695_p1 = scmp.lt.u32.totalorder %s7691_s29, %s9678_s7 }
   0x6   :  { %p7697_p2 = pnand %p7695_p1, %p7692_p0 }
   0x8   :  { %7700 = shalt.err (!%p7697_p2)
}
   0x9   :  { %s7701_s17 = scalar_lea.vmem %s51_s26, 32768  ;;  %p7706_p4 = scmp.lt.s32.totalorder %s51_s26, %s51_s26 }
   0xa   :  { %p7702_p3 = scmp.ne.s32.totalorder %s51_s26, %s7701_s17  ;;  %p7707_p5 = scmp.lt.s32.totalorder %s7701_s17, %s7701_s17 }
   0xc   :  { %p7708_p6 = por %p7707_p5, %p7706_p4 }
   0xe   :  { %p7709_p7 = pnand %p7708_p6, %p7702_p3 }
  0x10   :  { %7712 = shalt.err (!%p7709_p7)
}
  0x11   :  { %s7786_s18 = smov 256   ;;  %s7787_s19 = smov 16  }
  0x12   :  { %56 = dma.hbm_to_vmem [thread:$0]  %s9678_s7, 32768, %s51_s26, [#allocation6], %s7786_s18, %s7786_s18, %s7787_s19  }
  0x13   :  { %s7788_s22 = smov [#allocation2]   ;;  %s7713_s27 = scalar_lea.hbm %s9676_s5, 8192 }
  0x14   :  { %s36_s23 = sshll.u32 %s7788_s22, 4  ;;  %p7714_p8 = scmp.ne.s32.totalorder %s9676_s5, %s7713_s27  ;;  %s37_s23 = int_to_ptr.vmem [resolvable:$true] %s36_s23 }
  0x15   :  { %p7717_p9 = scmp.lt.u32.totalorder %s7713_s27, %s9676_s5 }
  0x17   :  { %p7719_p10 = pnand %p7717_p9, %p7714_p8 }
  0x19   :  { %7722 = shalt.err (!%p7719_p10)
}
  0x1a   :  { %s7723_s15 = scalar_lea.vmem %s37_s23, 8192  ;;  %p7728_p12 = scmp.lt.s32.totalorder %s37_s23, %s37_s23 }
  0x1b   :  { %p7724_p11 = scmp.ne.s32.totalorder %s37_s23, %s7723_s15  ;;  %p7729_p13 = scmp.lt.s32.totalorder %s7723_s15, %s7723_s15 }
  0x1d   :  { %p7730_p0 = por %p7729_p13, %p7728_p12 }
  0x1f   :  { %p7731_p1 = pnand %p7730_p0, %p7724_p11 }
  0x21   :  { %7734 = shalt.err (!%p7731_p1)
}
  0x22   :  { %s7789_s7 = smov 512   ;;  %s7790_s26 = smov 32  }
  0x23   :  { %42 = dma.hbm_to_vmem [thread:$0]  %s9676_s5, 8192, %s37_s23, [#allocation3], %s7789_s7, %s7789_s7, %s7790_s26  }
  0x24   :  { %s7791_s18 = smov [#allocation7]   ;;  %s7735_s22 = scalar_lea.hbm %s9680_s9, 8192 }
  0x25   :  { %s64_s19 = sshll.u32 %s7791_s18, 4  ;;  %p7736_p2 = scmp.ne.s32.totalorder %s9680_s9, %s7735_s22  ;;  %s65_s19 = int_to_ptr.vmem [resolvable:$true] %s64_s19 }
  0x26   :  { %p7739_p3 = scmp.lt.u32.totalorder %s7735_s22, %s9680_s9 }
  0x28   :  { %p7741_p4 = pnand %p7739_p3, %p7736_p2 }
  0x2a   :  { %7744 = shalt.err (!%p7741_p4)
}
  0x2b   :  { %s7745_s29 = scalar_lea.vmem %s65_s19, 8192  ;;  %p7750_p6 = scmp.lt.s32.totalorder %s65_s19, %s65_s19 }
  0x2c   :  { %p7746_p5 = scmp.ne.s32.totalorder %s65_s19, %s7745_s29  ;;  %p7751_p7 = scmp.lt.s32.totalorder %s7745_s29, %s7745_s29 }
  0x2e   :  { %p7752_p8 = por %p7751_p7, %p7750_p6 }
  0x30   :  { %p7753_p9 = pnand %p7752_p8, %p7746_p5 }
  0x32   :  { %7756 = shalt.err (!%p7753_p9)
}
  0x33   :  { %s7792_s5 = smov 128   ;;  %s7793_s23 = smov 8  }
  0x34   :  { %70 = dma.hbm_to_vmem [thread:$0]  %s9680_s9, 8192, %s65_s19, [#allocation6], %s7792_s5, %s7792_s5, %s7793_s23  }
  0x35   :  { %7779 = dma.done.wait [#allocation3], 8192  }
  0x36   :  { %7780 = vsyncadd [#allocation3], 4294959104 }
  0x37   :  { %7781 = dma.done.wait [#allocation6], 40960  }
  0x38   :  { %7782 = vsyncadd [#allocation6], 4294926336  ;;  %v7794_v0 = vmov 1   ;;  %v9688_v1 = vmov 0   ;;  %v89_v2 = vld [vmem:[%s9671_s0 + $0x10] sm:$0xff]  ;;  %v87_v3 = vld [vmem:[%s9671_s0] sm:$0xff]  ;;  %v280_v37 = vlaneseq }
  0x39   :  { %7137 = vset.pattern.permute.xlu0 %v7794_v0  ;;  %7135 = vset.pattern.permute.xlu1 %v7794_v0  ;;  %v88_v4 = vld [vmem:[%s9671_s0 + $0x8] sm:$0xff]  ;;  %v7796_v5 = vmov 2   ;;  %v91_v6 = vld [vmem:[%s9671_s0 + $0x20] sm:$0xff]  ;;  %v90_v7 = vld [vmem:[%s9671_s0 + $0x18] sm:$0xff]  ;;  %vm834_vm0 = vcmask 523264   ;;  %vm4104_vm1 = vcmask 1041409  }
  0x3a   :  { %1550 = vmatprep.mubr.bf16.mxu1 %v9688_v1  ;;  %325 = vperm.xlu0 %7137, %v89_v2   ;;  %v94_v8 = vld [vmem:[%s9671_s0 + $0x38] sm:$0xff]  ;;  %v96_v9 = vld [vmem:[%s9671_s0 + $0x48] sm:$0xff]  ;;  %v7182_v10 = vld [vmem:[%s9674_s3] sm:$0xff]   ;;  %v8064_v41 = vshrl.u32 %v280_v37, 7  ;;  %vm4106_vm2 = vcmask 1042434   ;;  %vm4108_vm3 = vcmask 1043459  }
  0x3b   :  { %317 = vperm.xlu1 %7135, %v87_v3   ;;  %7042 = vmatprep.subr.bf16.mxu0 %v7182_v10  ;;  %v92_v11 = vld [vmem:[%s9671_s0 + $0x28] sm:$0xff]  ;;  %v7184_v13 = vld [vmem:[%s9674_s3 + $0x10] sm:$0xff]   ;;  %v7185_v14 = vld [vmem:[%s9674_s3 + $0x18] sm:$0xff]   ;;  %vm4110_vm4 = vcmask 1044484   ;;  %vm4112_vm5 = vcmask 1045509   ;;  %vm4114_vm6 = vcmask 1046534  }
  0x3c   :  { %7043 = vmatpush3.bf16.msra.mxu0 %v7182_v10  ;;  %v7183_v12 = vld [vmem:[%s9674_s3 + $0x8] sm:$0xff]   ;;  %v97_v15 = vld [vmem:[%s9671_s0 + $0x50] sm:$0xff]  ;;  %v99_v17 = vld [vmem:[%s9671_s0 + $0x60] sm:$0xff]  ;;  %9698 = vst [vmem:[#allocation12_spill] sm:$0xff] %v8064_v41  ;;  %v8076_v45 = vsub.s32 1, %v8064_v41  ;;  %v8083_v47 = vsub.s32 2, %v8064_v41 }
  0x3d   :  { %7044 = vmatprep.subr.bf16.mxu0 %v7183_v12  ;;  %v93_v16 = vld [vmem:[%s9671_s0 + $0x30] sm:$0xff]  ;;  %v7966_v18 = vld [vmem:[%s9671_s0 + $0x88] sm:$0xff]  ;;  %v95_v20 = vld [vmem:[%s9671_s0 + $0x40] sm:$0xff]  ;;  %v8086_v48 = vsub.s32 0, %v8064_v41  ;;  %vm4116_vm7 = vcmask 1047559  }
  0x3e   :  { %7140 = vset.pattern.permute.xlu0 %v7796_v5  ;;  %v7971_v19 = vld [vmem:[%s9671_s0 + $0x90] sm:$0xff]  ;;  %v100_v21 = vld [vmem:[%s9671_s0 + $0x68] sm:$0xff]  ;;  %v98_v23 = vld [vmem:[%s9671_s0 + $0x58] sm:$0xff]  ;;  %9699 = vst [vmem:[#allocation13_spill] sm:$0xff] %v8076_v45 }
  0x3f   :  { %321 = vperm.xlu1 %7135, %v88_v4   ;;  %517 = vperm.xlu0 %7140, %v88_v4   ;;  %v101_v22 = vld [vmem:[%s9671_s0 + $0x70] sm:$0xff]  ;;  %v7996_v24 = vld [vmem:[%s9671_s0 + $0xa8] sm:$0xff]  ;;  %v102_v26 = vld [vmem:[%s9671_s0 + $0x78] sm:$0xff]  ;;  %9700 = vst [vmem:[#allocation14_spill] sm:$0xff] %v8083_v47 }
  0x40   :  { %7045 = vmatpush3.bf16.msra.mxu0 %v7183_v12  ;;  %v8002_v25 = vld [vmem:[%s9671_s0 + $0xb0] sm:$0xff]  ;;  %v8015_v27 = vld [vmem:[%s9671_s0 + $0xa0] sm:$0xff]  ;;  %v8022_v28 = vld [vmem:[%s9671_s0 + $0xb8] sm:$0xff]  ;;  %9701 = vst [vmem:[#allocation15_spill] sm:$0xff] %v8086_v48 }
  0x41   :  { %7046 = vmatprep.subr.bf16.mxu0 %v7184_v13  ;;  %v8029_v29 = vld [vmem:[%s9671_s0 + $0xc8] sm:$0xff]  ;;  %v8040_v30 = vld [vmem:[%s9671_s0 + $0xd0] sm:$0xff]  ;;  %v8046_v31 = vld [vmem:[%s9671_s0 + $0xe0] sm:$0xff] }
  0x42   :  { %v103_v36 = vld [vmem:[%s9671_s0 + $0x80] sm:$0xff]  ;;  %v8060_v38 = vld [vmem:[%s9671_s0 + $0xe8] sm:$0xff]  ;;  %v8071_v42 = vld [vmem:[%s9671_s0 + $0xf0] sm:$0xff] }
  0x43   :  { %7136 = vset.pattern.permute.xlu1 %v9688_v1  ;;  %529 = vperm.xlu0 %7140, %v91_v6   ;;  %v119_v46 = vld [vmem:[%s9672_s1] sm:$0x7]  ;;  %v106_v52 = vld [vmem:[%s9671_s0 + $0x98] sm:$0xff] }
  0x44   :  { %137 = vperm.xlu1 %7136, %v90_v7   ;;  %7047 = vmatpush3.bf16.msra.mxu0 %v7184_v13  ;;  %v8092_v50 = vrot.slane %v119_v46, %v8076_v45  ;;  %v8100_v53 = vrot.slane %v119_v46, %v8083_v47  ;;  %v8103_v54 = vrot.slane %v119_v46, %v8086_v48  ;;  %v8111_v59 = vld [vmem:[%s9671_s0 + $0xf8] sm:$0xff] }
  0x45   :  { %7048 = vmatprep.subr.bf16.mxu0 %v7185_v14 }
  0x47   :  { %541 = vperm.xlu0 %7140, %v94_v8  }
  0x48   :  { %7138 = vset.pattern.permute.xlu1 %v7794_v0  ;;  %7049 = vmatpush3.bf16.msra.mxu0 %v7185_v14 }
  0x49   :  { %329 = vperm.xlu1 %7138, %v90_v7  }
  0x4b   :  { %549 = vperm.xlu0 %7140, %v96_v9  }
  0x4d   :  { %7139 = vset.pattern.permute.xlu1 %v7796_v5 }
  0x4e   :  { %513 = vperm.xlu1 %7139, %v87_v3  }
  0x4f   :  { %7151 = vset.pattern.permute.xlu0 %v9688_v1 }
  0x50   :  { %122 = vperm.xlu0 %7151, %v87_v3  }
  0x52   :  { %521 = vperm.xlu1 %7139, %v89_v2  }
  0x54   :  { %127 = vperm.xlu0 %7151, %v88_v4  }
  0x56   :  { %525 = vperm.xlu1 %7139, %v90_v7  }
  0x58   :  { %132 = vperm.xlu0 %7151, %v89_v2  }
  0x5a   :  { %7141 = vset.pattern.permute.xlu1 %v9688_v1 }
  0x5b   :  { %147 = vperm.xlu1 %7141, %v92_v11  }
  0x5c   :  { %142 = vperm.xlu0 %7151, %v91_v6  }
  0x5f   :  { %7142 = vset.pattern.permute.xlu1 %v7794_v0 }
  0x60   :  { %333 = vperm.xlu1 %7142, %v91_v6   ;;  %167 = vperm.xlu0 %7151, %v96_v9  }
  0x64   :  { %7143 = vset.pattern.permute.xlu1 %v9688_v1  ;;  %172 = vperm.xlu0 %7151, %v97_v15  }
  0x65   :  { %152 = vperm.xlu1 %7143, %v93_v16  }
  0x68   :  { %182 = vperm.xlu0 %7151, %v99_v17  }
  0x69   :  { %157 = vperm.xlu1 %7143, %v94_v8  }
  0x6c   :  { %207 = vperm.xlu0 %7151, %v7966_v18  }
  0x6d   :  { %7144 = vset.pattern.permute.xlu1 %v7794_v0 }
  0x6e   :  { %345 = vperm.xlu1 %7144, %v94_v8  }
  0x70   :  { %212 = vperm.xlu0 %7151, %v7971_v19  }
  0x72   :  { %7145 = vset.pattern.permute.xlu1 %v7796_v5 }
  0x73   :  { %533 = vperm.xlu1 %7145, %v92_v11  }
  0x74   :  { %7159 = vset.pattern.permute.xlu0 %v7794_v0 }
  0x75   :  { %337 = vperm.xlu0 %7159, %v92_v11  }
  0x77   :  { %537 = vperm.xlu1 %7145, %v93_v16  }
  0x79   :  { %341 = vperm.xlu0 %7159, %v93_v16  }
  0x7b   :  { %7146 = vset.pattern.permute.xlu1 %v9688_v1 }
  0x7c   :  { %162 = vperm.xlu1 %7146, %v95_v20  }
  0x7d   :  { %357 = vperm.xlu0 %7159, %v97_v15  }
  0x80   :  { %7147 = vset.pattern.permute.xlu1 %v7794_v0 }
  0x81   :  { %349 = vperm.xlu1 %7147, %v95_v20   ;;  %369 = vperm.xlu0 %7159, %v100_v21  }
  0x85   :  { %353 = vperm.xlu1 %7147, %v96_v9   ;;  %373 = vperm.xlu0 %7159, %v101_v22   ;;  %v8124_v9 = vld [vmem:[%s9673_s2] ss:$0 sm:$0xff] }
  0x89   :  { %7148 = vset.pattern.permute.xlu1 %v9688_v1  ;;  %389 = vperm.xlu0 %7159, %v7971_v19  }
  0x8a   :  { %177 = vperm.xlu1 %7148, %v98_v23  }
  0x8d   :  { %401 = vperm.xlu0 %7159, %v7996_v24  }
  0x8e   :  { %7149 = vset.pattern.permute.xlu1 %v7794_v0 }
  0x8f   :  { %361 = vperm.xlu1 %7149, %v98_v23  }
  0x91   :  { %405 = vperm.xlu0 %7159, %v8002_v25  }
  0x93   :  { %7150 = vset.pattern.permute.xlu1 %v7796_v5 }
  0x94   :  { %545 = vperm.xlu1 %7150, %v95_v20  }
  0x95   :  { %7166 = vset.pattern.permute.xlu0 %v7796_v5 }
  0x96   :  { %561 = vperm.xlu0 %7166, %v99_v17  }
  0x98   :  { %553 = vperm.xlu1 %7150, %v97_v15  }
  0x9a   :  { %573 = vperm.xlu0 %7166, %v102_v26  }
  0x9c   :  { %557 = vperm.xlu1 %7150, %v98_v23  }
  0x9e   :  { %581 = vperm.xlu0 %7166, %v7966_v18  }
  0xa0   :  { %7152 = vset.pattern.permute.xlu1 %v9688_v1 }
  0xa1   :  { %187 = vperm.xlu1 %7152, %v100_v21  }
  0xa2   :  { %593 = vperm.xlu0 %7166, %v8015_v27  }
  0xa5   :  { %7153 = vset.pattern.permute.xlu1 %v7794_v0 }
  0xa6   :  { %365 = vperm.xlu1 %7153, %v99_v17   ;;  %605 = vperm.xlu0 %7166, %v8022_v28  }
  0xaa   :  { %7154 = vset.pattern.permute.xlu1 %v9688_v1  ;;  %613 = vperm.xlu0 %7166, %v8029_v29  }
  0xab   :  { %192 = vperm.xlu1 %7154, %v101_v22  }
  0xae   :  { %7174 = vset.pattern.permute.xlu0 %v9688_v1 }
  0xaf   :  { %197 = vperm.xlu1 %7154, %v102_v26   ;;  %222 = vperm.xlu0 %7174, %v8015_v27  }
  0xb3   :  { %7155 = vset.pattern.permute.xlu1 %v7794_v0  ;;  %247 = vperm.xlu0 %7174, %v8029_v29  }
  0xb4   :  { %377 = vperm.xlu1 %7155, %v102_v26  }
  0xb7   :  { %252 = vperm.xlu0 %7174, %v8040_v30  }
  0xb8   :  { %7156 = vset.pattern.permute.xlu1 %v7796_v5 }
  0xb9   :  { %565 = vperm.xlu1 %7156, %v100_v21   ;;  %v326_v33 = vpop.permute.xlu0 %325 }
  0xba   :  { %v318_v32 = vpop.permute.xlu1 %317  ;;  %v450_v11 = vmul.f32 %v8092_v50, %v326_v33 }
  0xbb   :  { %262 = vperm.xlu0 %7174, %v8046_v31   ;;  %v448_v56 = vmul.f32 %v8092_v50, %v318_v32 }
  0xbd   :  { %569 = vperm.xlu1 %7156, %v101_v22  }
  0xbe   :  { %v322_v34 = vpop.permute.xlu1 %321  ;;  %v518_v35 = vpop.permute.xlu0 %517 }
  0xbf   :  { %7175 = vset.pattern.permute.xlu0 %v7794_v0  ;;  %v449_v63 = vmul.f32 %v8092_v50, %v322_v34  ;;  %v645_v3 = vmul.f32 %v8100_v53, %v518_v35 }
  0xc0   :  { %421 = vperm.xlu0 %7175, %v8040_v30  }
  0xc1   :  { %7157 = vset.pattern.permute.xlu1 %v9688_v1 }
  0xc2   :  { %202 = vperm.xlu1 %7157, %v103_v36   ;;  %v8062_v40 = vpop.permute.xlu0 %529 }
  0xc3   :  { %v138_v39 = vpop.permute.xlu1 %137 }
  0xc4   :  { %433 = vperm.xlu0 %7175, %v8060_v38   ;;  %v287_v4 = vmul.f32 %v8103_v54, %v138_v39 }
  0xc6   :  { %7158 = vset.pattern.permute.xlu1 %v7794_v0  ;;  %v8073_v43 = vpop.permute.xlu0 %541 }
  0xc7   :  { %381 = vperm.xlu1 %7158, %v103_v36  }
  0xc8   :  { %v330_v44 = vpop.permute.xlu1 %329  ;;  %437 = vperm.xlu0 %7175, %v8071_v42  }
  0xc9   :  { %v451_v60 = vmul.f32 %v8092_v50, %v330_v44 }
  0xca   :  { %v8089_v49 = vpop.permute.xlu0 %549 }
  0xcb   :  { %385 = vperm.xlu1 %7158, %v7966_v18   ;;  %v483_v12 = vadd.f32 %v451_v60, %v287_v4 }
  0xcc   :  { %7180 = vset.pattern.permute.xlu0 %v7796_v5 }
  0xcd   :  { %v514_v51 = vpop.permute.xlu1 %513  ;;  %625 = vperm.xlu0 %7180, %v8046_v31  }
  0xce   :  { %v644_v61 = vmul.f32 %v8100_v53, %v514_v51 }
  0xcf   :  { %7160 = vset.pattern.permute.xlu1 %v9688_v1  ;;  %v123_v55 = vpop.permute.xlu0 %122 }
  0xd0   :  { %217 = vperm.xlu1 %7160, %v106_v52   ;;  %v284_v57 = vmul.f32 %v8103_v54, %v123_v55 }
  0xd1   :  { %v522_v58 = vpop.permute.xlu1 %521  ;;  %637 = vperm.xlu0 %7180, %v8111_v59  }
  0xd2   :  { %v480_v62 = vadd.f32 %v448_v56, %v284_v57  ;;  %v646_v21 = vmul.f32 %v8100_v53, %v522_v58 }
  0xd3   :  { %v128_v2 = vpop.permute.xlu0 %127 }
  0xd4   :  { %7161 = vset.pattern.permute.xlu1 %v7794_v0  ;;  %v676_v6 = vadd.f32 %v644_v61, %v480_v62  ;;  %v285_v7 = vmul.f32 %v8103_v54, %v128_v2  ;;  %v648_v2 = vmul.f32 %v8100_v53, %v8062_v40 }
  0xd5   :  { %393 = vperm.xlu1 %7161, %v106_v52   ;;  %v526_v8 = vpop.permute.xlu1 %525 }
  0xd6   :  { %v647_v10 = vmul.f32 %v8100_v53, %v526_v8  ;;  %v481_v13 = vadd.f32 %v449_v63, %v285_v7  ;;  %v715_v18 = vadd.f32 %v8124_v9, %v676_v6  ;;  %v651_v7 = vmul.f32 %v8100_v53, %v8073_v43 }
  0xd7   :  { %v133_v14 = vpop.permute.xlu0 %132 }
  0xd8   :  { %v677_v15 = vadd.f32 %v645_v3, %v481_v13  ;;  %v679_v16 = vadd.f32 %v647_v10, %v483_v12  ;;  %v286_v17 = vmul.f32 %v8103_v54, %v133_v14  ;;  %v747_v34 = vmax.f32 %v715_v18, 0.0 }
  0xd9   :  { %7162 = vset.pattern.permute.xlu1 %v7796_v5 }
  0xda   :  { %577 = vperm.xlu1 %7162, %v103_v36   ;;  %v148_v20 = vpop.permute.xlu1 %147  ;;  %v482_v22 = vadd.f32 %v450_v11, %v286_v17  ;;  %v716_v23 = vadd.f32 %v8124_v9, %v677_v15  ;;  %v718_v32 = vadd.f32 %v8124_v9, %v679_v16 }
  0xdb   :  { %v143_v26 = vpop.permute.xlu0 %142  ;;  %v289_v10 = vmul.f32 %v8103_v54, %v148_v20 }
  0xdc   :  { %v678_v33 = vadd.f32 %v646_v21, %v482_v22  ;;  %v748_v35 = vmax.f32 %v716_v23, 0.0  ;;  %v750_v46 = vmax.f32 %v718_v32, 0.0  ;;  %v288_v61 = vmul.f32 %v8103_v54, %v143_v26 }
  0xde   :  { %585 = vperm.xlu1 %7162, %v7971_v19   ;;  %v717_v37 = vadd.f32 %v8124_v9, %v678_v33  ;;  %v779_v44 = vpack.c.bf16 %v748_v35, %v747_v34 }
  0xdf   :  { %v334_v39 = vpop.permute.xlu1 %333  ;;  %v8136_v36 = vpop.permute.xlu0 %167 }
  0xe0   :  { %v749_v51 = vmax.f32 %v717_v37, 0.0  ;;  %7050 = vmatprep.mubr.msk.bf16.mxu0 %vm834_vm0, %v779_v44  ;;  %v452_v62 = vmul.f32 %v8092_v50, %v334_v39 }
  0xe2   :  { %589 = vperm.xlu1 %7162, %v106_v52   ;;  %v780_v55 = vpack.c.bf16 %v750_v46, %v749_v51  ;;  %v484_v3 = vadd.f32 %v452_v62, %v288_v61  ;;  %v653_v62 = vmul.f32 %v8100_v53, %v8089_v49  ;;  %v114_v49 = vld [vmem:[%s9671_s0 + $0xd8] sm:$0xff] }
  0xe3   :  { %v8139_v57 = vpop.permute.xlu0 %172 }
  0xe4   :  { %v153_v56 = vpop.permute.xlu1 %152  ;;  %7051 = vmatmul.mubr.msk.bf16.vlgmr.msra.gmra.mrb[0].mxu0 %vm834_vm0, %v780_v55  ;;  %v680_v11 = vadd.f32 %v648_v2, %v484_v3 }
  0xe5   :  { %v290_v16 = vmul.f32 %v8103_v54, %v153_v56 }
  0xe6   :  { %7163 = vset.pattern.permute.xlu1 %v9688_v1  ;;  %v719_v43 = vadd.f32 %v8124_v9, %v680_v11 }
  0xe7   :  { %227 = vperm.xlu1 %7163, %v7996_v24   ;;  %v8144_v58 = vpop.permute.xlu0 %182 }
  0xe8   :  { %v158_v19 = vpop.permute.xlu1 %157  ;;  %v751_v33 = vmax.f32 %v719_v43, 0.0 }
  0xe9   :  { %v291_v6 = vmul.f32 %v8103_v54, %v158_v19  ;;  %v111_v19 = vld [vmem:[%s9671_s0 + $0xc0] sm:$0xff] }
  0xeb   :  { %7164 = vset.pattern.permute.xlu1 %v7794_v0  ;;  %v8148_v60 = vpop.permute.xlu0 %207 }
  0xec   :  { %397 = vperm.xlu1 %7164, %v8015_v27  }
  0xed   :  { %v346_v52 = vpop.permute.xlu1 %345 }
  0xee   :  { %v455_v4 = vmul.f32 %v8092_v50, %v346_v52  ;;  %v293_v52 = vmul.f32 %v8103_v54, %v8136_v36 }
  0xef   :  { %v8153_v63 = vpop.permute.xlu0 %212 }
  0xf0   :  { %7165 = vset.pattern.permute.xlu1 %v9688_v1  ;;  %v487_v12 = vadd.f32 %v455_v4, %v291_v6 }
  0xf1   :  { %232 = vperm.xlu1 %7165, %v8002_v25  }
  0xf2   :  { %v534_v27 = vpop.permute.xlu1 %533  ;;  %v683_v18 = vadd.f32 %v651_v7, %v487_v12 }
  0xf3   :  { %v649_v40 = vmul.f32 %v8100_v53, %v534_v27  ;;  %v294_v27 = vmul.f32 %v8103_v54, %v8139_v57 }
  0xf4   :  { %v338_v8 = vpop.permute.xlu0 %337  ;;  %v722_v34 = vadd.f32 %v8124_v9, %v683_v18 }
  0xf5   :  { %237 = vperm.xlu1 %7165, %v8022_v28   ;;  %v453_v13 = vmul.f32 %v8092_v50, %v338_v8 }
  0xf6   :  { %v538_v14 = vpop.permute.xlu1 %537 }
  0xf7   :  { %v485_v15 = vadd.f32 %v453_v13, %v289_v10  ;;  %v650_v26 = vmul.f32 %v8100_v53, %v538_v14 }
  0xf8   :  { %v342_v17 = vpop.permute.xlu0 %341 }
  0xf9   :  { %7167 = vset.pattern.permute.xlu1 %v7794_v0  ;;  %v681_v21 = vadd.f32 %v649_v40, %v485_v15  ;;  %v454_v22 = vmul.f32 %v8092_v50, %v342_v17 }
  0xfa   :  { %409 = vperm.xlu1 %7167, %v8022_v28   ;;  %v754_v28 = vmax.f32 %v722_v34, 0.0 }
  0xfb   :  { %v163_v20 = vpop.permute.xlu1 %162  ;;  %v720_v23 = vadd.f32 %v8124_v9, %v681_v21  ;;  %v486_v32 = vadd.f32 %v454_v22, %v290_v16 }
  0xfc   :  { %v292_v36 = vmul.f32 %v8103_v54, %v163_v20 }
  0xfd   :  { %v752_v35 = vmax.f32 %v720_v23, 0.0  ;;  %v682_v37 = vadd.f32 %v650_v26, %v486_v32 }
  0xfe   :  { %7168 = vset.pattern.permute.xlu1 %v7796_v5 }
  0xff   :  { %597 = vperm.xlu1 %7168, %v7996_v24   ;;  %v721_v39 = vadd.f32 %v8124_v9, %v682_v37  ;;  %v781_v46 = vpack.c.bf16 %v752_v35, %v751_v33  ;;  %v1092_v37 = vld [vmem:[#allocation2] sm:$0xff] }
 0x100   :  { %v350_v44 = vpop.permute.xlu1 %349 }
 0x101   :  { %v753_v51 = vmax.f32 %v721_v39, 0.0  ;;  %7054 = vmatprep.mubr.msk.bf16.mxu0 %vm834_vm0, %v781_v46  ;;  %v456_v4 = vmul.f32 %v8092_v50, %v350_v44  ;;  %v1096_v39 = vld [vmem:[#allocation2 + $0x20] sm:$0xff] }
 0x103   :  { %601 = vperm.xlu1 %7168, %v8002_v25   ;;  %v782_v56 = vpack.c.bf16 %v754_v28, %v753_v51  ;;  %v358_v25 = vpop.permute.xlu0 %357  ;;  %v488_v11 = vadd.f32 %v456_v4, %v292_v36  ;;  %v6600_v28 = vcombine.high %v1092_v37, %v1096_v39  ;;  %v6599_v51 = vcombine.low %v1092_v37, %v1096_v39  ;;  %v1112_v4 = vld [vmem:[#allocation2 + $0xa0] sm:$0xff] }
 0x104   :  { %v354_v55 = vpop.permute.xlu1 %353  ;;  %v458_v7 = vmul.f32 %v8092_v50, %v358_v25 }
 0x105   :  { %7055 = vmatmul.mubr.msk.bf16.gmra.mrb[4].mxu0 %vm834_vm0, %v782_v56  ;;  %v457_v61 = vmul.f32 %v8092_v50, %v354_v55  ;;  %1518 = vmatprep.subr.bf16.mxu1 %v6600_v28  ;;  %v1140_v28 = vld [vmem:[#allocation2 + $0x180] sm:$0xff] }
 0x106   :  { %v490_v57 = vadd.f32 %v458_v7, %v294_v27  ;;  %1519 = vmatpush1.bf16.msra.mxu1 %v6599_v51  ;;  %v1144_v51 = vld [vmem:[#allocation2 + $0x1a0] sm:$0xff] }
 0x107   :  { %7169 = vset.pattern.permute.xlu1 %v9688_v1  ;;  %v489_v2 = vadd.f32 %v457_v61, %v293_v52  ;;  %v8196_v8 = vpop.permute.xlu0 %369  ;;  %v1104_v52 = vld [vmem:[#allocation2 + $0x60] sm:$0xff] }
 0x108   :  { %242 = vperm.xlu1 %7169, %v111_v19  }
 0x109   :  { %v178_v24 = vpop.permute.xlu1 %177  ;;  %v685_v6 = vadd.f32 %v653_v62, %v489_v2 }
 0x10a   :  { %v295_v18 = vmul.f32 %v8103_v54, %v178_v24  ;;  %v1100_v24 = vld [vmem:[#allocation2 + $0x40] sm:$0xff] }
 0x10b   :  { %v8206_v16 = vpop.permute.xlu0 %373  ;;  %v6608_v62 = vcombine.high %v1100_v24, %v1104_v52 }
 0x10c   :  { %7170 = vset.pattern.permute.xlu1 %v7794_v0 }
 0x10d   :  { %413 = vperm.xlu1 %7170, %v111_v19   ;;  %1520 = vmatprep.subr.bf16.mxu1 %v6608_v62 }
 0x10e   :  { %v362_v3 = vpop.permute.xlu1 %361 }
 0x10f   :  { %v459_v40 = vmul.f32 %v8092_v50, %v362_v3  ;;  %v8213_v34 = vpop.permute.xlu0 %389  ;;  %v6607_v3 = vcombine.low %v1100_v24, %v1104_v52  ;;  %v1093_v24 = vld [vmem:[#allocation2 + $0x8] sm:$0xff] }
 0x110   :  { %v1097_v52 = vld [vmem:[#allocation2 + $0x28] sm:$0xff] }
 0x111   :  { %417 = vperm.xlu1 %7170, %v8029_v29   ;;  %v724_v29 = vadd.f32 %v8124_v9, %v685_v6  ;;  %v491_v23 = vadd.f32 %v459_v40, %v295_v18  ;;  %1521 = vmatpush1.bf16.msra.mxu1 %v6607_v3  ;;  %v6602_v3 = vcombine.high %v1093_v24, %v1097_v52 }
 0x113   :  { %v546_v10 = vpop.permute.xlu1 %545  ;;  %v756_v43 = vmax.f32 %v724_v29, 0.0  ;;  %v8218_v25 = vpop.permute.xlu0 %401  ;;  %1711 = vmatprep.subr.bf16.mxu0 %v6602_v3 }
 0x114   :  { %v652_v12 = vmul.f32 %v8100_v53, %v546_v10  ;;  %v1116_v10 = vld [vmem:[#allocation2 + $0xc0] sm:$0xff] }
 0x115   :  { %7171 = vset.pattern.permute.xlu1 %v9688_v1 }
 0x116   :  { %v684_v13 = vadd.f32 %v652_v12, %v488_v11  ;;  %257 = vperm.xlu1 %7171, %v114_v49   ;;  %v1120_v11 = vld [vmem:[#allocation2 + $0xe0] sm:$0xff] }
 0x117   :  { %v554_v14 = vpop.permute.xlu1 %553  ;;  %v8222_v6 = vpop.permute.xlu0 %405  ;;  %v6623_v12 = vcombine.low %v1116_v10, %v1120_v11 }
 0x118   :  { %v723_v15 = vadd.f32 %v8124_v9, %v684_v13  ;;  %v654_v17 = vmul.f32 %v8100_v53, %v554_v14  ;;  %v1124_v13 = vld [vmem:[#allocation2 + $0x100] sm:$0xff] }
 0x119   :  { %v1128_v14 = vld [vmem:[#allocation2 + $0x120] sm:$0xff] }
 0x11a   :  { %v755_v21 = vmax.f32 %v723_v15, 0.0  ;;  %v686_v22 = vadd.f32 %v654_v17, %v490_v57  ;;  %7172 = vset.pattern.permute.xlu1 %v7794_v0  ;;  %v6632_v15 = vcombine.high %v1124_v13, %v1128_v14  ;;  %v6631_v17 = vcombine.low %v1124_v13, %v1128_v14 }
 0x11b   :  { %425 = vperm.xlu1 %7172, %v114_v49   ;;  %v558_v20 = vpop.permute.xlu1 %557  ;;  %v562_v40 = vpop.permute.xlu0 %561 }
 0x11c   :  { %v783_v26 = vpack.c.bf16 %v756_v43, %v755_v21  ;;  %v655_v32 = vmul.f32 %v8100_v53, %v558_v20  ;;  %v725_v33 = vadd.f32 %v8124_v9, %v686_v22  ;;  %v656_v18 = vmul.f32 %v8100_v53, %v562_v40  ;;  %v1132_v22 = vld [vmem:[#allocation2 + $0x140] sm:$0xff] }
 0x11e   :  { %v687_v35 = vadd.f32 %v655_v32, %v491_v23  ;;  %7058 = vmatprep.mubr.msk.bf16.mxu0 %vm834_vm0, %v783_v26  ;;  %v757_v55 = vmax.f32 %v725_v33, 0.0  ;;  %v461_v32 = vmul.f32 %v8092_v50, %v8196_v8  ;;  %v462_v8 = vmul.f32 %v8092_v50, %v8206_v16  ;;  %v1148_v16 = vld [vmem:[#allocation2 + $0x1c0] sm:$0xff] }
 0x11f   :  { %7173 = vset.pattern.permute.xlu1 %v7796_v5  ;;  %v574_v23 = vpop.permute.xlu0 %573 }
 0x120   :  { %v726_v44 = vadd.f32 %v8124_v9, %v687_v35  ;;  %609 = vperm.xlu1 %7173, %v111_v19   ;;  %v188_v46 = vpop.permute.xlu1 %187  ;;  %v1108_v19 = vld [vmem:[#allocation2 + $0x80] sm:$0xff] }
 0x121   :  { %v6616_v27 = vcombine.high %v1108_v19, %v1112_v4  ;;  %v6615_v36 = vcombine.low %v1108_v19, %v1112_v4  ;;  %v297_v33 = vmul.f32 %v8103_v54, %v188_v46  ;;  %v6601_v19 = vcombine.low %v1093_v24, %v1097_v52 }
 0x122   :  { %v758_v56 = vmax.f32 %v726_v44, 0.0  ;;  %v659_v44 = vmul.f32 %v8100_v53, %v574_v23 }
 0x123   :  { %1522 = vmatprep.subr.bf16.mxu1 %v6616_v27  ;;  %1712 = vmatpush1.bf16.msra.mxu0 %v6601_v19  ;;  %v582_v3 = vpop.permute.xlu0 %581 }
 0x124   :  { %v784_v61 = vpack.c.bf16 %v758_v56, %v757_v55  ;;  %617 = vperm.xlu1 %7173, %v8040_v30   ;;  %1523 = vmatpush1.bf16.msra.mxu1 %v6615_v36  ;;  %v6624_v30 = vcombine.high %v1116_v10, %v1120_v11  ;;  %v6648_v56 = vcombine.high %v1140_v28, %v1144_v51 }
 0x125   :  { %v366_v2 = vpop.permute.xlu1 %365 }
 0x126   :  { %7059 = vmatmul.mubr.msk.bf16.gmra.mrb[8].mxu0 %vm834_vm0, %v784_v61  ;;  %1524 = vmatprep.subr.bf16.mxu1 %v6624_v30  ;;  %v460_v57 = vmul.f32 %v8092_v50, %v366_v2  ;;  %v493_v61 = vadd.f32 %v461_v32, %v297_v33  ;;  %v6647_v2 = vcombine.low %v1140_v28, %v1144_v51  ;;  %v1125_v28 = vld [vmem:[#allocation2 + $0x108] sm:$0xff] }
 0x127   :  { %v1129_v51 = vld [vmem:[#allocation2 + $0x128] sm:$0xff] }
 0x128   :  { %621 = vperm.xlu1 %7173, %v114_v49   ;;  %v296_v49 = vmul.f32 %v8103_v54, %v8144_v58  ;;  %1525 = vmatpush1.bf16.msra.mxu1 %v6623_v12  ;;  %v1136_v58 = vld [vmem:[#allocation2 + $0x160] sm:$0xff]  ;;  %v1101_v12 = vld [vmem:[#allocation2 + $0x48] sm:$0xff] }
 0x129   :  { %1526 = vmatprep.subr.bf16.mxu1 %v6632_v15  ;;  %v6640_v26 = vcombine.high %v1132_v22, %v1136_v58 }
 0x12a   :  { %v193_v7 = vpop.permute.xlu1 %192  ;;  %v492_v43 = vadd.f32 %v460_v57, %v296_v49 }
 0x12b   :  { %v298_v46 = vmul.f32 %v8103_v54, %v193_v7  ;;  %v1152_v7 = vld [vmem:[#allocation2 + $0x1e0] sm:$0xff] }
 0x12c   :  { %7176 = vset.pattern.permute.xlu1 %v9688_v1  ;;  %1527 = vmatpush1.bf16.msra.mxu1 %v6631_v17  ;;  %v688_v37 = vadd.f32 %v656_v18, %v492_v43  ;;  %v6656_v30 = vcombine.high %v1148_v16, %v1152_v7  ;;  %v6655_v13 = vcombine.low %v1148_v16, %v1152_v7 }
 0x12d   :  { %267 = vperm.xlu1 %7176, %v8060_v38   ;;  %1528 = vmatprep.subr.bf16.mxu1 %v6640_v26  ;;  %v494_v10 = vadd.f32 %v462_v8, %v298_v46  ;;  %v6634_v8 = vcombine.high %v1125_v28, %v1129_v51  ;;  %v661_v7 = vmul.f32 %v8100_v53, %v582_v3 }
 0x12e   :  { %v198_v29 = vpop.permute.xlu1 %197  ;;  %v727_v4 = vadd.f32 %v8124_v9, %v688_v37 }
 0x12f   :  { %v299_v35 = vmul.f32 %v8103_v54, %v198_v29  ;;  %v1105_v29 = vld [vmem:[#allocation2 + $0x68] sm:$0xff] }
 0x130   :  { %v6610_v14 = vcombine.high %v1101_v12, %v1105_v29  ;;  %v6609_v40 = vcombine.low %v1101_v12, %v1105_v29  ;;  %v759_v15 = vmax.f32 %v727_v4, 0.0 }
 0x131   :  { %7177 = vset.pattern.permute.xlu1 %v7794_v0 }
 0x132   :  { %429 = vperm.xlu1 %7177, %v8046_v31   ;;  %v6639_v31 = vcombine.low %v1132_v22, %v1136_v58  ;;  %1713 = vmatprep.subr.bf16.mxu0 %v6610_v14  ;;  %v1113_v22 = vld [vmem:[#allocation2 + $0xa8] sm:$0xff] }
 0x133   :  { %v378_v21 = vpop.permute.xlu1 %377  ;;  %1714 = vmatpush1.bf16.msra.mxu0 %v6609_v40 }
 0x134   :  { %v463_v20 = vmul.f32 %v8092_v50, %v378_v21  ;;  %1529 = vmatpush1.bf16.msra.mxu1 %v6639_v31  ;;  %v1109_v21 = vld [vmem:[#allocation2 + $0x88] sm:$0xff] }
 0x135   :  { %1530 = vmatprep.subr.bf16.mxu1 %v6648_v56  ;;  %v6618_v26 = vcombine.high %v1109_v21, %v1113_v22  ;;  %v6617_v32 = vcombine.low %v1109_v21, %v1113_v22  ;;  %v1121_v31 = vld [vmem:[#allocation2 + $0xe8] sm:$0xff] }
 0x136   :  { %7178 = vset.pattern.permute.xlu1 %v9688_v1  ;;  %v495_v39 = vadd.f32 %v463_v20, %v299_v35  ;;  %v1137_v56 = vld [vmem:[#allocation2 + $0x168] sm:$0xff] }
 0x137   :  { %272 = vperm.xlu1 %7178, %v8071_v42   ;;  %1715 = vmatprep.subr.bf16.mxu0 %v6618_v26 }
 0x138   :  { %v566_v55 = vpop.permute.xlu1 %565  ;;  %v691_v27 = vadd.f32 %v659_v44, %v495_v39  ;;  %1531 = vmatpush1.bf16.msra.mxu1 %v6647_v2  ;;  %1716 = vmatpush1.bf16.msra.mxu0 %v6617_v32  ;;  %v1145_v2 = vld [vmem:[#allocation2 + $0x1a8] sm:$0xff] }
 0x139   :  { %v657_v62 = vmul.f32 %v8100_v53, %v566_v55  ;;  %1532 = vmatprep.subr.bf16.mxu1 %v6656_v30  ;;  %v1133_v55 = vld [vmem:[#allocation2 + $0x148] sm:$0xff] }
 0x13a   :  { %v730_v17 = vadd.f32 %v8124_v9, %v691_v27  ;;  %v6641_v24 = vcombine.low %v1133_v55, %v1137_v56  ;;  %v1149_v27 = vld [vmem:[#allocation2 + $0x1c8] sm:$0xff] }
 0x13b   :  { %v689_v36 = vadd.f32 %v657_v62, %v493_v61  ;;  %277 = vperm.xlu1 %7178, %v8111_v59   ;;  %v1141_v62 = vld [vmem:[#allocation2 + $0x188] sm:$0xff] }
 0x13c   :  { %v570_v11 = vpop.permute.xlu1 %569  ;;  %1533 = vmatpush1.bf16.msra.mxu1 %v6655_v13  ;;  %v762_v33 = vmax.f32 %v730_v17, 0.0  ;;  %v6650_v19 = vcombine.high %v1141_v62, %v1145_v2  ;;  %v6649_v4 = vcombine.low %v1141_v62, %v1145_v2  ;;  %v466_v13 = vmul.f32 %v8092_v50, %v8213_v34  ;;  %v594_v34 = vpop.permute.xlu0 %593 }
 0x13d   :  { %v728_v49 = vadd.f32 %v8124_v9, %v689_v36  ;;  %v658_v57 = vmul.f32 %v8100_v53, %v570_v11  ;;  %v1153_v36 = vld [vmem:[#allocation2 + $0x1e8] sm:$0xff] }
 0x13e   :  { %v6658_v11 = vcombine.high %v1149_v27, %v1153_v36  ;;  %v6657_v30 = vcombine.low %v1149_v27, %v1153_v36 }
 0x13f   :  { %v760_v43 = vmax.f32 %v728_v49, 0.0  ;;  %v690_v18 = vadd.f32 %v658_v57, %v494_v10  ;;  %7179 = vset.pattern.permute.xlu1 %v7794_v0  ;;  %v1117_v0 = vld [vmem:[#allocation2 + $0xc8] sm:$0xff] }
 0x140   :  { %441 = vperm.xlu1 %7179, %v8111_v59   ;;  %v6626_v37 = vcombine.high %v1117_v0, %v1121_v31  ;;  %v6625_v44 = vcombine.low %v1117_v0, %v1121_v31 }
 0x141   :  { %v785_v58 = vpack.c.bf16 %v760_v43, %v759_v15  ;;  %v729_v20 = vadd.f32 %v8124_v9, %v690_v18  ;;  %v203_v23 = vpop.permute.xlu1 %202 }
 0x142   :  { %1717 = vmatprep.subr.bf16.mxu0 %v6626_v37  ;;  %v300_v29 = vmul.f32 %v8103_v54, %v203_v23 }
 0x143   :  { %v761_v35 = vmax.f32 %v729_v20, 0.0  ;;  %7062 = vmatprep.mubr.msk.bf16.mxu0 %vm834_vm0, %v785_v58  ;;  %1718 = vmatpush1.bf16.msra.mxu0 %v6625_v44 }
 0x144   :  { %7181 = vset.pattern.permute.xlu1 %v7796_v5  ;;  %v6633_v5 = vcombine.low %v1125_v28, %v1129_v51  ;;  %1719 = vmatprep.subr.bf16.mxu0 %v6634_v8 }
 0x145   :  { %v786_v59 = vpack.c.bf16 %v762_v33, %v761_v35  ;;  %629 = vperm.xlu1 %7181, %v8060_v38   ;;  %v6642_v38 = vcombine.high %v1133_v55, %v1137_v56 }
 0x146   :  { %v382_v39 = vpop.permute.xlu1 %381 }
 0x147   :  { %7063 = vmatmul.mubr.msk.bf16.gmra.mrb[12].mxu0 %vm834_vm0, %v786_v59  ;;  %v464_v12 = vmul.f32 %v8092_v50, %v382_v39  ;;  %v606_v39 = vpop.permute.xlu0 %605 }
 0x148   :  { %1720 = vmatpush1.bf16.msra.mxu0 %v6633_v5  ;;  %v667_v27 = vmul.f32 %v8100_v53, %v606_v39 }
 0x149   :  { %633 = vperm.xlu1 %7181, %v8071_v42   ;;  %1721 = vmatprep.subr.bf16.mxu0 %v6642_v38  ;;  %v301_v42 = vmul.f32 %v8103_v54, %v8148_v60  ;;  %v302_v60 = vmul.f32 %v8103_v54, %v8153_v63  ;;  %v496_v14 = vadd.f32 %v464_v12, %v300_v29 }
 0x14a   :  { %v386_v46 = vpop.permute.xlu1 %385  ;;  %v470_v12 = vmul.f32 %v8092_v50, %v8222_v6 }
 0x14b   :  { %v465_v61 = vmul.f32 %v8092_v50, %v386_v46  ;;  %v498_v18 = vadd.f32 %v466_v13, %v302_v60  ;;  %v614_v5 = vpop.permute.xlu0 %613 }
 0x14c   :  { %1722 = vmatpush1.bf16.msra.mxu0 %v6641_v24  ;;  %v669_v39 = vmul.f32 %v8100_v53, %v614_v5 }
 0x14d   :  { %1723 = vmatprep.subr.bf16.mxu0 %v6650_v19  ;;  %v497_v16 = vadd.f32 %v465_v61, %v301_v42  ;;  %v664_v61 = vmul.f32 %v8100_v53, %v594_v34 }
 0x14f   :  { %v218_v52 = vpop.permute.xlu1 %217  ;;  %v693_v49 = vadd.f32 %v661_v7, %v497_v16  ;;  %v223_v56 = vpop.permute.xlu0 %222 }
 0x150   :  { %1724 = vmatpush1.bf16.msra.mxu0 %v6649_v4  ;;  %v303_v63 = vmul.f32 %v8103_v54, %v218_v52  ;;  %v304_v24 = vmul.f32 %v8103_v54, %v223_v56  ;;  %v469_v4 = vmul.f32 %v8092_v50, %v8218_v25 }
 0x151   :  { %1725 = vmatprep.subr.bf16.mxu0 %v6658_v11  ;;  %v732_v15 = vadd.f32 %v8124_v9, %v693_v49 }
 0x153   :  { %v764_v20 = vmax.f32 %v732_v15, 0.0 }
 0x154   :  { %v394_v10 = vpop.permute.xlu1 %393  ;;  %1726 = vmatpush1.bf16.msra.mxu0 %v6657_v30 }
 0x155   :  { %v467_v21 = vmul.f32 %v8092_v50, %v394_v10 }
 0x157   :  { %v499_v33 = vadd.f32 %v467_v21, %v303_v63  ;;  %v248_v63 = vpop.permute.xlu0 %247 }
 0x159   :  { %v578_v57 = vpop.permute.xlu1 %577 }
 0x15a   :  { %v660_v40 = vmul.f32 %v8100_v53, %v578_v57 }
 0x15c   :  { %v692_v17 = vadd.f32 %v660_v40, %v496_v14 }
 0x15d   :  { %v586_v43 = vpop.permute.xlu1 %585 }
 0x15e   :  { %v731_v22 = vadd.f32 %v8124_v9, %v692_v17  ;;  %v662_v58 = vmul.f32 %v8100_v53, %v586_v43 }
 0x160   :  { %v763_v23 = vmax.f32 %v731_v22, 0.0  ;;  %v694_v26 = vadd.f32 %v662_v58, %v498_v18 }
 0x161   :  { %v590_v32 = vpop.permute.xlu1 %589 }
 0x162   :  { %v787_v35 = vpack.c.bf16 %v764_v20, %v763_v23  ;;  %v663_v0 = vmul.f32 %v8100_v53, %v590_v32  ;;  %v733_v31 = vadd.f32 %v8124_v9, %v694_v26  ;;  %v253_v26 = vpop.permute.xlu0 %252 }
 0x164   :  { %v695_v59 = vadd.f32 %v663_v0, %v499_v33  ;;  %7066 = vmatprep.mubr.msk.bf16.mxu0 %vm834_vm0, %v787_v35  ;;  %v765_v28 = vmax.f32 %v733_v31, 0.0  ;;  %v309_v35 = vmul.f32 %v8103_v54, %v248_v63 }
 0x166   :  { %v734_v37 = vadd.f32 %v8124_v9, %v695_v59  ;;  %v228_v44 = vpop.permute.xlu1 %227  ;;  %v263_v33 = vpop.permute.xlu0 %262 }
 0x167   :  { %v305_v19 = vmul.f32 %v8103_v54, %v228_v44 }
 0x168   :  { %v766_v51 = vmax.f32 %v734_v37, 0.0 }
 0x169   :  { %v501_v10 = vadd.f32 %v469_v4, %v305_v19 }
 0x16a   :  { %v788_v8 = vpack.c.bf16 %v766_v51, %v765_v28  ;;  %v422_v37 = vpop.permute.xlu0 %421 }
 0x16b   :  { %v398_v46 = vpop.permute.xlu1 %397 }
 0x16c   :  { %7067 = vmatmul.mubr.msk.bf16.gmra.mrb[16].mxu0 %vm834_vm0, %v788_v8  ;;  %v468_v52 = vmul.f32 %v8092_v50, %v398_v46  ;;  %v310_v8 = vmul.f32 %v8103_v54, %v253_v26  ;;  %v474_v46 = vmul.f32 %v8092_v50, %v422_v37 }
 0x16e   :  { %v500_v62 = vadd.f32 %v468_v52, %v304_v24 }
 0x170   :  { %v233_v55 = vpop.permute.xlu1 %232  ;;  %v696_v36 = vadd.f32 %v664_v61, %v500_v62  ;;  %v506_v61 = vadd.f32 %v474_v46, %v310_v8 }
 0x171   :  { %v306_v11 = vmul.f32 %v8103_v54, %v233_v55 }
 0x172   :  { %v735_v29 = vadd.f32 %v8124_v9, %v696_v36 }
 0x173   :  { %v502_v13 = vadd.f32 %v470_v12, %v306_v11 }
 0x174   :  { %v238_v38 = vpop.permute.xlu1 %237  ;;  %v767_v40 = vmax.f32 %v735_v29, 0.0 }
 0x175   :  { %v307_v42 = vmul.f32 %v8103_v54, %v238_v38 }
 0x179   :  { %v410_v2 = vpop.permute.xlu1 %409 }
 0x17a   :  { %v471_v3 = vmul.f32 %v8092_v50, %v410_v2 }
 0x17c   :  { %v503_v16 = vadd.f32 %v471_v3, %v307_v42 }
 0x17e   :  { %v598_v7 = vpop.permute.xlu1 %597  ;;  %v699_v49 = vadd.f32 %v667_v27, %v503_v16 }
 0x17f   :  { %v665_v30 = vmul.f32 %v8100_v53, %v598_v7 }
 0x180   :  { %v738_v15 = vadd.f32 %v8124_v9, %v699_v49 }
 0x181   :  { %v697_v57 = vadd.f32 %v665_v30, %v501_v10 }
 0x182   :  { %v602_v60 = vpop.permute.xlu1 %601  ;;  %v770_v6 = vmax.f32 %v738_v15, 0.0  ;;  %v8319_v15 = vld [vmem:[%s9675_s4] ss:$0 sm:$0xff] }
 0x183   :  { %v736_v25 = vadd.f32 %v8124_v9, %v697_v57  ;;  %v666_v14 = vmul.f32 %v8100_v53, %v602_v60  ;;  %v434_v60 = vpop.permute.xlu0 %433 }
 0x184   :  { %v477_v46 = vmul.f32 %v8092_v50, %v434_v60 }
 0x185   :  { %v768_v17 = vmax.f32 %v736_v25, 0.0  ;;  %v698_v43 = vadd.f32 %v666_v14, %v502_v13 }
 0x187   :  { %v789_v18 = vpack.c.bf16 %v768_v17, %v767_v40  ;;  %v737_v21 = vadd.f32 %v8124_v9, %v698_v43  ;;  %v243_v22 = vpop.permute.xlu1 %242  ;;  %v438_v14 = vpop.permute.xlu0 %437 }
 0x188   :  { %v308_v28 = vmul.f32 %v8103_v54, %v243_v22 }
 0x189   :  { %v769_v58 = vmax.f32 %v737_v21, 0.0  ;;  %7070 = vmatprep.mubr.msk.bf16.mxu0 %vm834_vm0, %v789_v18 }
 0x18b   :  { %v790_v20 = vpack.c.bf16 %v770_v6, %v769_v58 }
 0x18c   :  { %v414_v23 = vpop.permute.xlu1 %413 }
 0x18d   :  { %7071 = vmatmul.mubr.msk.bf16.gmra.mrb[20].mxu0 %vm834_vm0, %v790_v20  ;;  %v472_v44 = vmul.f32 %v8092_v50, %v414_v23  ;;  %v626_v20 = vpop.permute.xlu0 %625 }
 0x18e   :  { %v672_v37 = vmul.f32 %v8100_v53, %v626_v20 }
 0x18f   :  { %v504_v56 = vadd.f32 %v472_v44, %v308_v28 }
 0x190   :  { %v418_v34 = vpop.permute.xlu1 %417 }
 0x191   :  { %v473_v0 = vmul.f32 %v8092_v50, %v418_v34  ;;  %v312_v34 = vmul.f32 %v8103_v54, %v263_v33  ;;  %v638_v28 = vpop.permute.xlu0 %637 }
 0x193   :  { %v505_v31 = vadd.f32 %v473_v0, %v309_v35 }
 0x195   :  { %v258_v32 = vpop.permute.xlu1 %257  ;;  %v701_v51 = vadd.f32 %v669_v39, %v505_v31 }
 0x196   :  { %v311_v42 = vmul.f32 %v8103_v54, %v258_v32 }
 0x197   :  { %v740_v24 = vadd.f32 %v8124_v9, %v701_v51 }
 0x199   :  { %v772_v19 = vmax.f32 %v740_v24, 0.0  ;;  %v1098_v24 = vld [vmem:[#allocation2 + $0x30] sm:$0xff] }
 0x19a   :  { %v426_v59 = vpop.permute.xlu1 %425 }
 0x19b   :  { %v475_v5 = vmul.f32 %v8092_v50, %v426_v59 }
 0x19d   :  { %v507_v16 = vadd.f32 %v475_v5, %v311_v42 }
 0x19f   :  { %v610_v55 = vpop.permute.xlu1 %609 }
 0x1a0   :  { %v668_v38 = vmul.f32 %v8100_v53, %v610_v55 }
 0x1a2   :  { %v700_v52 = vadd.f32 %v668_v38, %v504_v56  ;;  %v675_v56 = vmul.f32 %v8100_v53, %v638_v28  ;;  %v1094_v38 = vld [vmem:[#allocation2 + $0x10] sm:$0xff] }
 0x1a3   :  { %v618_v62 = vpop.permute.xlu1 %617  ;;  %v6604_v5 = vcombine.high %v1094_v38, %v1098_v24  ;;  %v1122_v28 = vld [vmem:[#allocation2 + $0xf0] sm:$0xff] }
 0x1a4   :  { %v739_v2 = vadd.f32 %v8124_v9, %v700_v52  ;;  %v670_v3 = vmul.f32 %v8100_v53, %v618_v62  ;;  %v6603_v62 = vcombine.low %v1094_v38, %v1098_v24 }
 0x1a5   :  { %1904 = vmatprep.subr.bf16.mxu1 %v6604_v5 }
 0x1a6   :  { %v771_v4 = vmax.f32 %v739_v2, 0.0  ;;  %v702_v27 = vadd.f32 %v670_v3, %v506_v61 }
 0x1a7   :  { %v622_v36 = vpop.permute.xlu1 %621 }
 0x1a8   :  { %v791_v7 = vpack.c.bf16 %v772_v19, %v771_v4  ;;  %v671_v10 = vmul.f32 %v8100_v53, %v622_v36  ;;  %v741_v11 = vadd.f32 %v8124_v9, %v702_v27  ;;  %v478_v19 = vmul.f32 %v8092_v50, %v438_v14 }
 0x1aa   :  { %v703_v30 = vadd.f32 %v671_v10, %v507_v16  ;;  %7074 = vmatprep.mubr.msk.bf16.mxu0 %vm834_vm0, %v791_v7  ;;  %v773_v49 = vmax.f32 %v741_v11, 0.0 }
 0x1ac   :  { %v742_v12 = vadd.f32 %v8124_v9, %v703_v30  ;;  %v268_v29 = vpop.permute.xlu1 %267 }
 0x1ad   :  { %v313_v55 = vmul.f32 %v8103_v54, %v268_v29  ;;  %v1106_v29 = vld [vmem:[#allocation2 + $0x70] sm:$0xff] }
 0x1ae   :  { %v774_v57 = vmax.f32 %v742_v12, 0.0  ;;  %v1102_v12 = vld [vmem:[#allocation2 + $0x50] sm:$0xff] }
 0x1af   :  { %v509_v3 = vadd.f32 %v477_v46, %v313_v55  ;;  %v1095_v55 = vld [vmem:[#allocation2 + $0x18] sm:$0xff] }
 0x1b0   :  { %v792_v13 = vpack.c.bf16 %v774_v57, %v773_v49 }
 0x1b1   :  { %v430_v25 = vpop.permute.xlu1 %429 }
 0x1b2   :  { %7075 = vmatmul.mubr.msk.bf16.gmra.mrb[24].mxu0 %vm834_vm0, %v792_v13  ;;  %v476_v58 = vmul.f32 %v8092_v50, %v430_v25 }
 0x1b4   :  { %v508_v59 = vadd.f32 %v476_v58, %v312_v34 }
 0x1b6   :  { %v273_v40 = vpop.permute.xlu1 %272  ;;  %v704_v52 = vadd.f32 %v672_v37, %v508_v59 }
 0x1b7   :  { %v7052_v17 = vpop.f32.mrb[0].mxu0  ;;  %v314_v42 = vmul.f32 %v8103_v54, %v273_v40 }
 0x1b8   :  { %v926_v43 = vadd.f32 %v7052_v17, %v8319_v15  ;;  %v917_v18 = vpop.f32.mrb[1].mxu0  ;;  %v743_v27 = vadd.f32 %v8124_v9, %v704_v52  ;;  %v1130_v52 = vld [vmem:[#allocation2 + $0x130] sm:$0xff] }
 0x1b9   :  { %v918_v21 = vadd.f32 %v8319_v15, %v917_v18  ;;  %v7053_v22 = vpop.f32.mrb[2].mxu0  ;;  %v510_v10 = vadd.f32 %v478_v19, %v314_v42  ;;  %v1114_v18 = vld [vmem:[#allocation2 + $0xb0] sm:$0xff] }
 0x1ba   :  { %v278_v6 = vpop.permute.xlu1 %277  ;;  %v929_v63 = vadd.f32 %v7053_v22, %v8319_v15  ;;  %v920_v23 = vpop.f32.mrb[3].mxu0  ;;  %v1046_v32 = vmax.f32 %v926_v43, 0.0  ;;  %v775_v49 = vmax.f32 %v743_v27, 0.0  ;;  %v1110_v43 = vld [vmem:[#allocation2 + $0x90] sm:$0xff] }
 0x1bb   :  { %v921_v26 = vadd.f32 %v8319_v15, %v920_v23  ;;  %v1044_v0 = vmax.f32 %v918_v21, 0.0  ;;  %v315_v33 = vmul.f32 %v8103_v54, %v278_v6  ;;  %v6612_v54 = vcombine.high %v1102_v12, %v1106_v29 }
 0x1bc   :  { %v1047_v35 = vmax.f32 %v929_v63, 0.0  ;;  %v6619_v21 = vcombine.low %v1110_v43, %v1114_v18  ;;  %v6620_v22 = vcombine.high %v1110_v43, %v1114_v18 }
 0x1bd   :  { %v1045_v31 = vmax.f32 %v921_v26, 0.0 }
 0x1be   :  { %v8328_v39 = vpack.c.bf16 %v1047_v35, %v1046_v32 }
 0x1bf   :  { %v442_v44 = vpop.permute.xlu1 %441  ;;  %v8330_v51 = vpack.c.bf16 %v1045_v31, %v1044_v0 }
 0x1c0   :  { %v479_v8 = vmul.f32 %v8092_v50, %v442_v44  ;;  %v6611_v50 = vcombine.low %v1102_v12, %v1106_v29  ;;  %v1118_v44 = vld [vmem:[#allocation2 + $0xd0] sm:$0xff]  ;;  %v1103_v29 = vld [vmem:[#allocation2 + $0x58] sm:$0xff] }
 0x1c1   :  { %1551 = vmatmul.mubr.bf16.vlgmr.msra.gmra.mrb[0].mxu1 %v8330_v51  ;;  %v6628_v46 = vcombine.high %v1118_v44, %v1122_v28 }
 0x1c2   :  { %v511_v61 = vadd.f32 %v479_v8, %v315_v33  ;;  %1560 = vmatprep.mubr.bf16.mxu1 %v9688_v1  ;;  %1905 = vmatpush1.bf16.msra.mxu1 %v6603_v62  ;;  %v6627_v8 = vcombine.low %v1118_v44, %v1122_v28  ;;  %v1099_v33 = vld [vmem:[#allocation2 + $0x38] sm:$0xff] }
 0x1c3   :  { %1906 = vmatprep.subr.bf16.mxu1 %v6612_v54  ;;  %v6605_v38 = vcombine.low %v1095_v55, %v1099_v33  ;;  %v6606_v24 = vcombine.high %v1095_v55, %v1099_v33 }
 0x1c4   :  { %v630_v2 = vpop.permute.xlu1 %629  ;;  %v707_v36 = vadd.f32 %v675_v56, %v511_v61  ;;  %v1126_v56 = vld [vmem:[#allocation2 + $0x110] sm:$0xff] }
 0x1c5   :  { %v673_v4 = vmul.f32 %v8100_v53, %v630_v2  ;;  %v6635_v61 = vcombine.low %v1126_v56, %v1130_v52  ;;  %v6636_v62 = vcombine.high %v1126_v56, %v1130_v52  ;;  %2097 = vmatprep.subr.bf16.mxu0 %v6606_v24  ;;  %v1135_v56 = vld [vmem:[#allocation2 + $0x158] sm:$0xff] }
 0x1c6   :  { %v746_v57 = vadd.f32 %v8124_v9, %v707_v36  ;;  %1907 = vmatpush1.bf16.msra.mxu1 %v6611_v50  ;;  %v1107_v50 = vld [vmem:[#allocation2 + $0x78] sm:$0xff] }
 0x1c7   :  { %v705_v16 = vadd.f32 %v673_v4, %v509_v3  ;;  %1908 = vmatprep.subr.bf16.mxu1 %v6620_v22  ;;  %v6613_v54 = vcombine.low %v1103_v29, %v1107_v50 }
 0x1c8   :  { %v634_v7 = vpop.permute.xlu1 %633  ;;  %v778_v40 = vmax.f32 %v746_v57, 0.0  ;;  %v1134_v57 = vld [vmem:[#allocation2 + $0x150] sm:$0xff] }
 0x1c9   :  { %v744_v11 = vadd.f32 %v8124_v9, %v705_v16  ;;  %v674_v30 = vmul.f32 %v8100_v53, %v634_v7  ;;  %1561 = vmatmul.mubr.bf16.gmra.mrb[4].mxu1 %v8328_v39 }
 0x1ca   :  { %1570 = vmatprep.mubr.bf16.mxu1 %v9688_v1  ;;  %1909 = vmatpush1.bf16.msra.mxu1 %v6619_v21 }
 0x1cb   :  { %v776_v60 = vmax.f32 %v744_v11, 0.0  ;;  %v706_v13 = vadd.f32 %v674_v30, %v510_v10  ;;  %1910 = vmatprep.subr.bf16.mxu1 %v6628_v46  ;;  %v1131_v46 = vld [vmem:[#allocation2 + $0x138] sm:$0xff] }
 0x1cd   :  { %v793_v25 = vpack.c.bf16 %v776_v60, %v775_v49  ;;  %v745_v14 = vadd.f32 %v8124_v9, %v706_v13  ;;  %v6614_v49 = vcombine.high %v1103_v29, %v1107_v50  ;;  %v1138_v60 = vld [vmem:[#allocation2 + $0x170] sm:$0xff] }
 0x1ce   :  { %1911 = vmatpush1.bf16.msra.mxu1 %v6627_v8  ;;  %v6643_v13 = vcombine.low %v1134_v57, %v1138_v60  ;;  %v1127_v8 = vld [vmem:[#allocation2 + $0x118] sm:$0xff] }
 0x1cf   :  { %v777_v53 = vmax.f32 %v745_v14, 0.0  ;;  %7078 = vmatprep.mubr.msk.bf16.mxu0 %vm834_vm0, %v793_v25  ;;  %1912 = vmatprep.subr.bf16.mxu1 %v6636_v62  ;;  %v6644_v25 = vcombine.high %v1134_v57, %v1138_v60  ;;  %v6638_v55 = vcombine.high %v1127_v8, %v1131_v46  ;;  %v6637_v33 = vcombine.low %v1127_v8, %v1131_v46  ;;  %v1146_v62 = vld [vmem:[#allocation2 + $0x1b0] sm:$0xff] }
 0x1d1   :  { %v794_v17 = vpack.c.bf16 %v778_v40, %v777_v53 }
 0x1d2   :  { %1913 = vmatpush1.bf16.msra.mxu1 %v6635_v61  ;;  %v1142_v61 = vld [vmem:[#allocation2 + $0x190] sm:$0xff] }
 0x1d3   :  { %7079 = vmatmul.mubr.msk.bf16.gmra.mrb[28].mxu0 %vm834_vm0, %v794_v17  ;;  %1914 = vmatprep.subr.bf16.mxu1 %v6644_v25 }
 0x1d4   :  { %1743 = vmatprep.mubr.bf16.mxu0 %v9688_v1 }
 0x1d6   :  { %1915 = vmatpush1.bf16.msra.mxu1 %v6643_v13 }
 0x1d8   :  { %v7056_v6 = vpop.f32.mrb[4].mxu0 }
 0x1d9   :  { %v942_v58 = vadd.f32 %v7056_v6, %v8319_v15  ;;  %v933_v9 = vpop.f32.mrb[5].mxu0 }
 0x1da   :  { %v934_v20 = vadd.f32 %v8319_v15, %v933_v9  ;;  %v7057_v63 = vpop.f32.mrb[6].mxu0 }
 0x1db   :  { %1744 = vmatmul.mubr.bf16.vlgmr.msra.gmra.mrb[32].mxu0 %v8330_v51  ;;  %v945_v23 = vadd.f32 %v7057_v63, %v8319_v15  ;;  %v936_v26 = vpop.f32.mrb[7].mxu0  ;;  %v1050_v32 = vmax.f32 %v942_v58, 0.0 }
 0x1dc   :  { %1753 = vmatprep.mubr.bf16.mxu0 %v9688_v1  ;;  %v937_v34 = vadd.f32 %v8319_v15, %v936_v26  ;;  %v1048_v0 = vmax.f32 %v934_v20, 0.0  ;;  %2098 = vmatpush1.bf16.msra.mxu0 %v6605_v38  ;;  %v1111_v26 = vld [vmem:[#allocation2 + $0x98] sm:$0xff] }
 0x1dd   :  { %v1051_v35 = vmax.f32 %v945_v23, 0.0  ;;  %2099 = vmatprep.subr.bf16.mxu0 %v6614_v49  ;;  %v1139_v38 = vld [vmem:[#allocation2 + $0x178] sm:$0xff] }
 0x1de   :  { %v1049_v31 = vmax.f32 %v937_v34, 0.0  ;;  %v1115_v34 = vld [vmem:[#allocation2 + $0xb8] sm:$0xff]  ;;  %v6646_v24 = vcombine.high %v1135_v56, %v1139_v38  ;;  %v6645_v52 = vcombine.low %v1135_v56, %v1139_v38 }
 0x1df   :  { %v8358_v59 = vpack.c.bf16 %v1051_v35, %v1050_v32  ;;  %v6622_v32 = vcombine.high %v1111_v26, %v1115_v34  ;;  %v6621_v35 = vcombine.low %v1111_v26, %v1115_v34 }
 0x1e0   :  { %v8360_v37 = vpack.c.bf16 %v1049_v31, %v1048_v0  ;;  %2100 = vmatpush1.bf16.msra.mxu0 %v6613_v54  ;;  %v1119_v0 = vld [vmem:[#allocation2 + $0xd8] sm:$0xff] }
 0x1e1   :  { %2101 = vmatprep.subr.bf16.mxu0 %v6622_v32  ;;  %v1123_v31 = vld [vmem:[#allocation2 + $0xf8] sm:$0xff] }
 0x1e2   :  { %1571 = vmatmul.mubr.bf16.gmra.mrb[8].mxu1 %v8360_v37  ;;  %v6630_v44 = vcombine.high %v1119_v0, %v1123_v31  ;;  %v6629_v28 = vcombine.low %v1119_v0, %v1123_v31 }
 0x1e3   :  { %1754 = vmatmul.mubr.bf16.gmra.mrb[36].mxu0 %v8328_v39  ;;  %1580 = vmatprep.mubr.bf16.mxu1 %v9688_v1 }
 0x1e4   :  { %1763 = vmatprep.mubr.bf16.mxu0 %v9688_v1  ;;  %2102 = vmatpush1.bf16.msra.mxu0 %v6621_v35 }
 0x1e5   :  { %2103 = vmatprep.subr.bf16.mxu0 %v6630_v44 }
 0x1e8   :  { %2104 = vmatpush1.bf16.msra.mxu0 %v6629_v28 }
 0x1e9   :  { %2105 = vmatprep.subr.bf16.mxu0 %v6638_v55 }
 0x1ea   :  { %1581 = vmatmul.mubr.bf16.gmra.mrb[12].mxu1 %v8358_v59 }
 0x1eb   :  { %1764 = vmatmul.mubr.bf16.gmra.mrb[40].mxu0 %v8360_v37  ;;  %1590 = vmatprep.mubr.bf16.mxu1 %v9688_v1 }
 0x1ec   :  { %1773 = vmatprep.mubr.bf16.mxu0 %v9688_v1  ;;  %2106 = vmatpush1.bf16.msra.mxu0 %v6637_v33 }
 0x1ed   :  { %2107 = vmatprep.subr.bf16.mxu0 %v6646_v24 }
 0x1f0   :  { %2108 = vmatpush1.bf16.msra.mxu0 %v6645_v52 }
 0x1f3   :  { %1774 = vmatmul.mubr.bf16.gmra.mrb[44].mxu0 %v8358_v59 }
 0x1f4   :  { %1783 = vmatprep.mubr.bf16.mxu0 %v9688_v1 }
 0x1f9   :  { %v7060_v5 = vpop.f32.mrb[8].mxu0 }
 0x1fa   :  { %v958_v2 = vadd.f32 %v7060_v5, %v8319_v15  ;;  %v949_v3 = vpop.f32.mrb[9].mxu0  ;;  %v6651_v5 = vcombine.low %v1142_v61, %v1146_v62 }
 0x1fb   :  { %v950_v19 = vadd.f32 %v8319_v15, %v949_v3  ;;  %v7061_v42 = vpop.f32.mrb[10].mxu0  ;;  %v1143_v3 = vld [vmem:[#allocation2 + $0x198] sm:$0xff] }
 0x1fc   :  { %v961_v4 = vadd.f32 %v7061_v42, %v8319_v15  ;;  %v952_v27 = vpop.f32.mrb[11].mxu0  ;;  %v1054_v16 = vmax.f32 %v958_v2, 0.0  ;;  %v6652_v2 = vcombine.high %v1142_v61, %v1146_v62  ;;  %v1150_v42 = vld [vmem:[#allocation2 + $0x1d0] sm:$0xff] }
 0x1fd   :  { %v953_v36 = vadd.f32 %v8319_v15, %v952_v27  ;;  %v1052_v10 = vmax.f32 %v950_v19, 0.0  ;;  %v1147_v19 = vld [vmem:[#allocation2 + $0x1b8] sm:$0xff] }
 0x1fe   :  { %v1055_v7 = vmax.f32 %v961_v4, 0.0  ;;  %v1154_v4 = vld [vmem:[#allocation2 + $0x1f0] sm:$0xff]  ;;  %v6654_v27 = vcombine.high %v1143_v3, %v1147_v19  ;;  %1916 = vmatprep.subr.bf16.mxu1 %v6652_v2 }
 0x1ff   :  { %v1053_v11 = vmax.f32 %v953_v36, 0.0  ;;  %v6660_v36 = vcombine.high %v1150_v42, %v1154_v4  ;;  %1917 = vmatpush1.bf16.msra.mxu1 %v6651_v5 }
 0x200   :  { %v8376_v30 = vpack.c.bf16 %v1055_v7, %v1054_v16  ;;  %v6653_v16 = vcombine.low %v1143_v3, %v1147_v19  ;;  %v6659_v7 = vcombine.low %v1150_v42, %v1154_v4  ;;  %2109 = vmatprep.subr.bf16.mxu0 %v6654_v27  ;;  %v8449_v27 = vld [vmem:[%s9677_s6] sm:$0xff] }
 0x201   :  { %v8378_v12 = vpack.c.bf16 %v1053_v11, %v1052_v10  ;;  %1918 = vmatprep.subr.bf16.mxu1 %v6660_v36  ;;  %v1151_v10 = vld [vmem:[#allocation2 + $0x1d8] sm:$0xff]  ;;  %v8455_v36 = vrot.slane %v8449_v27, %v8086_v48 }
 0x202   :  { %v1155_v11 = vld [vmem:[#allocation2 + $0x1f8] sm:$0xff]  ;;  %2110 = vmatpush1.bf16.msra.mxu0 %v6653_v16  ;;  %v8459_v16 = vrot.slane %v8449_v27, %v8076_v45 }
 0x203   :  { %1591 = vmatmul.mubr.bf16.gmra.mrb[16].mxu1 %v8378_v12  ;;  %1784 = vmatmul.mubr.bf16.gmra.mrb[48].mxu0 %v8378_v12  ;;  %v6662_v29 = vcombine.high %v1151_v10, %v1155_v11  ;;  %v6661_v50 = vcombine.low %v1151_v10, %v1155_v11 }
 0x204   :  { %1600 = vmatprep.mubr.bf16.mxu1 %v9688_v1  ;;  %1793 = vmatprep.mubr.bf16.mxu0 %v9688_v1 }
 0x205   :  { %1919 = vmatpush1.bf16.msra.mxu1 %v6659_v7  ;;  %2111 = vmatprep.subr.bf16.mxu0 %v6662_v29 }
 0x206   :  { %2112 = vmatpush1.bf16.msra.mxu0 %v6661_v50 }
 0x20b   :  { %1601 = vmatmul.mubr.bf16.gmra.mrb[20].mxu1 %v8376_v30  ;;  %1794 = vmatmul.mubr.bf16.gmra.mrb[52].mxu0 %v8376_v30 }
 0x20c   :  { %1610 = vmatprep.mubr.bf16.mxu1 %v9688_v1  ;;  %1803 = vmatprep.mubr.bf16.mxu0 %v9688_v1 }
 0x21a   :  { %v7064_v14 = vpop.f32.mrb[12].mxu0 }
 0x21b   :  { %v974_v40 = vadd.f32 %v7064_v14, %v8319_v15  ;;  %v965_v53 = vpop.f32.mrb[13].mxu0 }
 0x21c   :  { %v966_v17 = vadd.f32 %v8319_v15, %v965_v53  ;;  %v7065_v43 = vpop.f32.mrb[14].mxu0 }
 0x21d   :  { %v977_v18 = vadd.f32 %v7065_v43, %v8319_v15  ;;  %v968_v21 = vpop.f32.mrb[15].mxu0  ;;  %v1058_v6 = vmax.f32 %v974_v40, 0.0 }
 0x21e   :  { %v969_v22 = vadd.f32 %v8319_v15, %v968_v21  ;;  %v1056_v9 = vmax.f32 %v966_v17, 0.0 }
 0x21f   :  { %v1059_v58 = vmax.f32 %v977_v18, 0.0 }
 0x220   :  { %v1057_v20 = vmax.f32 %v969_v22, 0.0 }
 0x221   :  { %v8392_v63 = vpack.c.bf16 %v1059_v58, %v1058_v6 }
 0x222   :  { %v8394_v23 = vpack.c.bf16 %v1057_v20, %v1056_v9 }
 0x224   :  { %1611 = vmatmul.mubr.bf16.gmra.mrb[24].mxu1 %v8394_v23  ;;  %1804 = vmatmul.mubr.bf16.gmra.mrb[56].mxu0 %v8394_v23 }
 0x225   :  { %1620 = vmatprep.mubr.bf16.mxu1 %v9688_v1  ;;  %1813 = vmatprep.mubr.bf16.mxu0 %v9688_v1 }
 0x22c   :  { %1621 = vmatmul.mubr.bf16.gmra.mrb[28].mxu1 %v8392_v63  ;;  %1814 = vmatmul.mubr.bf16.gmra.mrb[60].mxu0 %v8392_v63 }
 0x22d   :  { %1630 = vmatprep.mubr.bf16.mxu1 %v9688_v1  ;;  %1823 = vmatprep.mubr.bf16.mxu0 %v9688_v1 }
 0x23f   :  { %v7068_v54 = vpop.f32.mrb[16].mxu0 }
 0x240   :  { %v990_v49 = vadd.f32 %v7068_v54, %v8319_v15  ;;  %v981_v57 = vpop.f32.mrb[17].mxu0 }
 0x241   :  { %v982_v60 = vadd.f32 %v8319_v15, %v981_v57  ;;  %v7069_v13 = vpop.f32.mrb[18].mxu0 }
 0x242   :  { %v993_v25 = vadd.f32 %v7069_v13, %v8319_v15  ;;  %v984_v14 = vpop.f32.mrb[19].mxu0  ;;  %v1062_v53 = vmax.f32 %v990_v49, 0.0 }
 0x243   :  { %v985_v40 = vadd.f32 %v8319_v15, %v984_v14  ;;  %v1060_v43 = vmax.f32 %v982_v60, 0.0 }
 0x244   :  { %v1063_v17 = vmax.f32 %v993_v25, 0.0 }
 0x245   :  { %v1061_v18 = vmax.f32 %v985_v40, 0.0 }
 0x246   :  { %v8408_v21 = vpack.c.bf16 %v1063_v17, %v1062_v53 }
 0x247   :  { %v8410_v22 = vpack.c.bf16 %v1061_v18, %v1060_v43 }
 0x249   :  { %1631 = vmatmul.mubr.bf16.gmra.mrb[32].mxu1 %v8410_v22  ;;  %1824 = vmatmul.mubr.bf16.gmra.mrb[64].mxu0 %v8410_v22 }
 0x24a   :  { %1640 = vmatprep.mubr.bf16.mxu1 %v9688_v1  ;;  %1833 = vmatprep.mubr.bf16.mxu0 %v9688_v1 }
 0x251   :  { %1641 = vmatmul.mubr.bf16.gmra.mrb[36].mxu1 %v8408_v21  ;;  %1834 = vmatmul.mubr.bf16.gmra.mrb[68].mxu0 %v8408_v21 }
 0x252   :  { %1650 = vmatprep.mubr.bf16.mxu1 %v9688_v1  ;;  %1843 = vmatprep.mubr.bf16.mxu0 %v9688_v1 }
 0x260   :  { %v7072_v6 = vpop.f32.mrb[20].mxu0 }
 0x261   :  { %v1006_v58 = vadd.f32 %v7072_v6, %v8319_v15  ;;  %v997_v9 = vpop.f32.mrb[21].mxu0 }
 0x262   :  { %v998_v20 = vadd.f32 %v8319_v15, %v997_v9  ;;  %v7073_v26 = vpop.f32.mrb[22].mxu0 }
 0x263   :  { %v1009_v34 = vadd.f32 %v7073_v26, %v8319_v15  ;;  %v1000_v32 = vpop.f32.mrb[23].mxu0  ;;  %v1066_v0 = vmax.f32 %v1006_v58, 0.0 }
 0x264   :  { %v1001_v35 = vadd.f32 %v8319_v15, %v1000_v32  ;;  %v1064_v44 = vmax.f32 %v998_v20, 0.0 }
 0x265   :  { %v1067_v31 = vmax.f32 %v1009_v34, 0.0 }
 0x266   :  { %v1065_v28 = vmax.f32 %v1001_v35, 0.0 }
 0x267   :  { %v8424_v8 = vpack.c.bf16 %v1067_v31, %v1066_v0 }
 0x268   :  { %v8426_v46 = vpack.c.bf16 %v1065_v28, %v1064_v44 }
 0x26a   :  { %1651 = vmatmul.mubr.bf16.gmra.mrb[40].mxu1 %v8426_v46  ;;  %1844 = vmatmul.mubr.bf16.gmra.mrb[72].mxu0 %v8426_v46 }
 0x26b   :  { %1660 = vmatprep.mubr.bf16.mxu1 %v9688_v1  ;;  %1853 = vmatprep.mubr.bf16.mxu0 %v9688_v1 }
 0x272   :  { %1661 = vmatmul.mubr.bf16.gmra.mrb[44].mxu1 %v8424_v8  ;;  %1854 = vmatmul.mubr.bf16.gmra.mrb[76].mxu0 %v8424_v8 }
 0x273   :  { %1670 = vmatprep.mubr.bf16.mxu1 %v9688_v1  ;;  %1863 = vmatprep.mubr.bf16.mxu0 %v9688_v1 }
 0x285   :  { %v7076_v55 = vpop.f32.mrb[24].mxu0 }
 0x286   :  { %v1022_v33 = vadd.f32 %v7076_v55, %v8319_v15  ;;  %v1013_v56 = vpop.f32.mrb[25].mxu0 }
 0x287   :  { %v1014_v38 = vadd.f32 %v8319_v15, %v1013_v56  ;;  %v7077_v24 = vpop.f32.mrb[26].mxu0 }
 0x288   :  { %v1025_v52 = vadd.f32 %v7077_v24, %v8319_v15  ;;  %v1016_v61 = vpop.f32.mrb[27].mxu0  ;;  %v1070_v5 = vmax.f32 %v1022_v33, 0.0 }
 0x289   :  { %v1017_v62 = vadd.f32 %v8319_v15, %v1016_v61  ;;  %v1068_v3 = vmax.f32 %v1014_v38, 0.0 }
 0x28a   :  { %v1071_v2 = vmax.f32 %v1025_v52, 0.0 }
 0x28b   :  { %v1069_v19 = vmax.f32 %v1017_v62, 0.0 }
 0x28c   :  { %v8440_v42 = vpack.c.bf16 %v1071_v2, %v1070_v5 }
 0x28d   :  { %v8442_v4 = vpack.c.bf16 %v1069_v19, %v1068_v3 }
 0x28f   :  { %1671 = vmatmul.mubr.bf16.gmra.mrb[48].mxu1 %v8442_v4  ;;  %1864 = vmatmul.mubr.bf16.gmra.mrb[80].mxu0 %v8442_v4 }
 0x290   :  { %1680 = vmatprep.mubr.bf16.mxu1 %v9688_v1  ;;  %1873 = vmatprep.mubr.bf16.mxu0 %v9688_v1 }
 0x294   :  { %v1552_v7 = vpop.f32.mrb[0].mxu1 }
 0x295   :  { %v1553_v10 = vadd.f32 %v1552_v7, %v8455_v36  ;;  %v1554_v11 = vpop.f32.mrb[1].mxu1  ;;  %v9685_v7 = vsub.s32 3, %v8064_v41 }
 0x296   :  { %v1555_v29 = vadd.f32 %v1554_v11, %v8459_v16  ;;  %v1556_v50 = vpop.f32.mrb[2].mxu1 }
 0x297   :  { %1681 = vmatmul.mubr.bf16.gmra.mrb[52].mxu1 %v8440_v42  ;;  %1874 = vmatmul.mubr.bf16.gmra.mrb[84].mxu0 %v8440_v42  ;;  %v1557_v54 = vadd.f32 %v1556_v50, %v8455_v36  ;;  %v1558_v49 = vpop.f32.mrb[3].mxu1  ;;  %v2290_v60 = vmax.f32 %v1553_v10, 0.0 }
 0x298   :  { %1690 = vmatprep.mubr.bf16.mxu1 %v9688_v1  ;;  %1883 = vmatprep.mubr.bf16.mxu0 %v9688_v1  ;;  %v1559_v57 = vadd.f32 %v1558_v49, %v8459_v16  ;;  %v2291_v25 = vmax.f32 %v1555_v29, 0.0 }
 0x299   :  { %v2298_v13 = vmax.f32 %v1557_v54, 0.0 }
 0x29a   :  { %v2299_v14 = vmax.f32 %v1559_v57, 0.0 }
 0x29b   :  { %v2546_v40 = vmax.f32 %v2290_v60, %v2298_v13 }
 0x29c   :  { %v2553_v53 = vmax.f32 %v2291_v25, %v2299_v14  ;;  %v1562_v17 = vpop.f32.mrb[4].mxu1  ;;  %v8480_v14 = vrot.slane %v8449_v27, %v8083_v47 }
 0x29d   :  { %v2547_v43 = vrot.slane %v2546_v40, 4  ;;  %v1563_v18 = vadd.f32 %v1562_v17, %v8455_v36  ;;  %v1564_v6 = vpop.f32.mrb[5].mxu1 }
 0x29e   :  { %v2554_v58 = vrot.slane %v2553_v53, 4  ;;  %v1565_v9 = vadd.f32 %v1564_v6, %v8459_v16  ;;  %v1566_v20 = vpop.f32.mrb[6].mxu1 }
 0x29f   :  { %v2548_v26 = vmax.f32 %v2546_v40, %v2547_v43  ;;  %v1567_v34 = vadd.f32 %v1566_v20, %v8455_v36  ;;  %v1568_v32 = vpop.f32.mrb[7].mxu1  ;;  %v2306_v44 = vmax.f32 %v1563_v18, 0.0  ;;  %v8485_v43 = vrot.slane %v8449_v27, %v9685_v7 }
 0x2a0   :  { %v2555_v35 = vmax.f32 %v2553_v53, %v2554_v58  ;;  %v1569_v0 = vadd.f32 %v1568_v32, %v8459_v16  ;;  %v2307_v33 = vmax.f32 %v1565_v9, 0.0 }
 0x2a1   :  { %v2549_v31 = vrot.slane %v2548_v26, 2  ;;  %v2314_v28 = vmax.f32 %v1567_v34, 0.0 }
 0x2a2   :  { %v2556_v55 = vrot.slane %v2555_v35, 2  ;;  %v2315_v56 = vmax.f32 %v1569_v0, 0.0 }
 0x2a3   :  { %v2550_v38 = vmax.f32 %v2548_v26, %v2549_v31  ;;  %v2602_v24 = vmax.f32 %v2306_v44, %v2314_v28 }
 0x2a4   :  { %v2557_v52 = vmax.f32 %v2555_v35, %v2556_v55  ;;  %v2609_v61 = vmax.f32 %v2307_v33, %v2315_v56 }
 0x2a5   :  { %v2603_v62 = vrot.slane %v2602_v24, 4  ;;  %v2551_v10 = vrot.slane %v2550_v38, 1 }
 0x2a6   :  { %v7080_v5 = vpop.f32.mrb[28].mxu0  ;;  %v2610_v2 = vrot.slane %v2609_v61, 4  ;;  %v2558_v54 = vrot.slane %v2557_v52, 1 }
 0x2a7   :  { %v1038_v3 = vadd.f32 %v7080_v5, %v8319_v15  ;;  %v1029_v19 = vpop.f32.mrb[29].mxu0  ;;  %v2604_v11 = vmax.f32 %v2602_v24, %v2603_v62  ;;  %v2552_v18 = vmax.f32 %v2550_v38, %v2551_v10 }
 0x2a8   :  { %v1030_v29 = vadd.f32 %v8319_v15, %v1029_v19  ;;  %v7081_v50 = vpop.f32.mrb[30].mxu0  ;;  %v2611_v49 = vmax.f32 %v2609_v61, %v2610_v2  ;;  %v2559_v20 = vmax.f32 %v2557_v52, %v2558_v54 }
 0x2a9   :  { %v1041_v57 = vadd.f32 %v7081_v50, %v8319_v15  ;;  %v1032_v60 = vpop.f32.mrb[31].mxu0  ;;  %v2605_v13 = vrot.slane %v2604_v11, 2  ;;  %v1074_v53 = vmax.f32 %v1038_v3, 0.0  ;;  %v3442_v28 = vpack.c.bf16 %v2552_v18, %v2552_v18 }
 0x2aa   :  { %v1033_v25 = vadd.f32 %v8319_v15, %v1032_v60  ;;  %v2612_v40 = vrot.slane %v2611_v49, 2  ;;  %v1072_v58 = vmax.f32 %v1030_v29, 0.0  ;;  %v3443_v56 = vpack.c.bf16 %v2559_v20, %v2559_v20 }
 0x2ab   :  { %v1075_v17 = vmax.f32 %v1041_v57, 0.0  ;;  %v2606_v6 = vmax.f32 %v2604_v11, %v2605_v13  ;;  %v3976_v19 = vunpack.c.l.b16 %v3442_v28 }
 0x2ac   :  { %v1073_v9 = vmax.f32 %v1033_v25, 0.0  ;;  %v2613_v26 = vmax.f32 %v2611_v49, %v2612_v40  ;;  %v3977_v50 = vunpack.c.l.b16 %v3443_v56 }
 0x2ad   :  { %v8487_v34 = vpack.c.bf16 %v1075_v17, %v1074_v53  ;;  %v2607_v15 = vrot.slane %v2606_v6, 1 }
 0x2ae   :  { %v8489_v32 = vpack.c.bf16 %v1073_v9, %v1072_v58  ;;  %v1745_v35 = vpop.f32.mrb[32].mxu0  ;;  %v2614_v0 = vrot.slane %v2613_v26, 1 }
 0x2af   :  { %v1746_v31 = vadd.f32 %v1745_v35, %v8480_v14  ;;  %v1747_v44 = vpop.f32.mrb[33].mxu0  ;;  %v2608_v55 = vmax.f32 %v2606_v6, %v2607_v15 }
 0x2b0   :  { %v1748_v27 = vadd.f32 %v1747_v44, %v8485_v43  ;;  %1691 = vmatmul.mubr.bf16.gmra.mrb[56].mxu1 %v8489_v32  ;;  %v1749_v33 = vpop.f32.mrb[34].mxu0  ;;  %1884 = vmatmul.mubr.bf16.gmra.mrb[88].mxu0 %v8489_v32  ;;  %v2615_v38 = vmax.f32 %v2613_v26, %v2614_v0 }
 0x2b1   :  { %v1750_v24 = vadd.f32 %v1749_v33, %v8480_v14  ;;  %v1751_v52 = vpop.f32.mrb[35].mxu0  ;;  %1700 = vmatprep.mubr.bf16.mxu1 %v9688_v1  ;;  %1893 = vmatprep.mubr.bf16.mxu0 %v9688_v1  ;;  %v3450_v61 = vpack.c.bf16 %v2608_v55, %v2608_v55  ;;  %v2292_v2 = vmax.f32 %v1746_v31, 0.0 }
 0x2b2   :  { %v1752_v62 = vadd.f32 %v1751_v52, %v8485_v43  ;;  %v3451_v5 = vpack.c.bf16 %v2615_v38, %v2615_v38  ;;  %v2293_v11 = vmax.f32 %v1748_v27, 0.0 }
 0x2b3   :  { %v2300_v3 = vmax.f32 %v1750_v24, 0.0  ;;  %v3984_v10 = vunpack.c.l.b16 %v3450_v61 }
 0x2b4   :  { %v2301_v29 = vmax.f32 %v1752_v62, 0.0  ;;  %v3985_v54 = vunpack.c.l.b16 %v3451_v5 }
 0x2b5   :  { %v2560_v49 = vmax.f32 %v2292_v2, %v2300_v3  ;;  %v8500_v57 = vsel %vm4104_vm1, %v3984_v10, %v3976_v19  ;;  %v1572_v13 = vpop.f32.mrb[8].mxu1 }
 0x2b6   :  { %v2567_v60 = vmax.f32 %v2293_v11, %v2301_v29  ;;  %v1755_v25 = vpop.f32.mrb[36].mxu0  ;;  %v8503_v40 = vsel %vm4104_vm1, %v3985_v54, %v3977_v50  ;;  %v1573_v17 = vadd.f32 %v1572_v13, %v8455_v36  ;;  %v1574_v6 = vpop.f32.mrb[9].mxu1 }
 0x2b7   :  { %v2561_v53 = vrot.slane %v2560_v49, 4  ;;  %v1756_v18 = vadd.f32 %v1755_v25, %v8480_v14  ;;  %v1757_v58 = vpop.f32.mrb[37].mxu0  ;;  %v1575_v20 = vadd.f32 %v1574_v6, %v8459_v16  ;;  %v1576_v15 = vpop.f32.mrb[10].mxu1 }
 0x2b8   :  { %v2568_v9 = vrot.slane %v2567_v60, 4  ;;  %v1758_v26 = vadd.f32 %v1757_v58, %v8485_v43  ;;  %1701 = vmatmul.mubr.bf16.gmra.mrb[60].mxu1 %v8487_v34  ;;  %v1759_v35 = vpop.f32.mrb[38].mxu0  ;;  %1894 = vmatmul.mubr.bf16.gmra.mrb[92].mxu0 %v8487_v34  ;;  %v1577_v31 = vadd.f32 %v1576_v15, %v8455_v36  ;;  %v1578_v44 = vpop.f32.mrb[11].mxu1  ;;  %v2322_v27 = vmax.f32 %v1573_v17, 0.0 }
 0x2b9   :  { %v2562_v0 = vmax.f32 %v2560_v49, %v2561_v53  ;;  %v1761_v28 = vpop.f32.mrb[39].mxu0  ;;  %1936 = vmatprep.mubr.bf16.mxu1 %v9688_v1  ;;  %2129 = vmatprep.mubr.bf16.mxu0 %v9688_v1  ;;  %v2308_v33 = vmax.f32 %v1756_v18, 0.0  ;;  %v1760_v56 = vadd.f32 %v1759_v35, %v8480_v14  ;;  %v1579_v52 = vadd.f32 %v1578_v44, %v8459_v16 }
 0x2ba   :  { %v2569_v55 = vmax.f32 %v2567_v60, %v2568_v9  ;;  %v2330_v24 = vmax.f32 %v1577_v31, 0.0  ;;  %v1762_v61 = vadd.f32 %v1761_v28, %v8485_v43  ;;  %v2323_v5 = vmax.f32 %v1575_v20, 0.0 }
 0x2bb   :  { %v2563_v38 = vrot.slane %v2562_v0, 2  ;;  %v2309_v2 = vmax.f32 %v1758_v26, 0.0  ;;  %v2316_v3 = vmax.f32 %v1760_v56, 0.0  ;;  %v2331_v11 = vmax.f32 %v1579_v52, 0.0  ;;  %v7188_v56 = vld [vmem:[#allocation5 + $0x4] ss:$16 sps:$4 sm:$0xff]  }
 0x2bc   :  { %v2570_v62 = vrot.slane %v2569_v55, 2  ;;  %v2658_v10 = vmax.f32 %v2322_v27, %v2330_v24  ;;  %v2317_v29 = vmax.f32 %v1762_v61, 0.0  ;;  %5519 = vmatprep.subr.bf16.mxu1 %v7188_v56 }
 0x2bd   :  { %v2564_v19 = vmax.f32 %v2562_v0, %v2563_v38  ;;  %v2616_v54 = vmax.f32 %v2308_v33, %v2316_v3  ;;  %v1582_v49 = vpop.f32.mrb[12].mxu1  ;;  %v2665_v53 = vmax.f32 %v2323_v5, %v2331_v11  ;;  %v7186_v0 = vld [vmem:[#allocation5] ss:$16 sps:$4 sm:$0xff]  }
 0x2be   :  { %v2571_v50 = vmax.f32 %v2569_v55, %v2570_v62  ;;  %v1765_v60 = vpop.f32.mrb[40].mxu0  ;;  %v2659_v25 = vrot.slane %v2658_v10, 4  ;;  %v2623_v17 = vmax.f32 %v2309_v2, %v2317_v29  ;;  %v1584_v18 = vpop.f32.mrb[13].mxu1  ;;  %v8518_v20 = vadd.f32 %v1582_v49, %v8455_v36  ;;  %v7191_v62 = vld [vmem:[#allocation5 + $0x24] ss:$16 sps:$4 sm:$0xff]  }
 0x2bf   :  { %v2565_v13 = vrot.slane %v2564_v19, 1  ;;  %v1767_v6 = vpop.f32.mrb[41].mxu0  ;;  %v2617_v9 = vrot.slane %v2616_v54, 4  ;;  %v8521_v26 = vadd.f32 %v1765_v60, %v8480_v14  ;;  %v1586_v15 = vpop.f32.mrb[14].mxu1  ;;  %v2666_v28 = vrot.slane %v2665_v53, 4 }
 0x2c0   :  { %v2572_v58 = vrot.slane %v2571_v50, 1  ;;  %v1769_v35 = vpop.f32.mrb[42].mxu0  ;;  %1937 = vmatmul.mubr.bf16.vlgmr.msra.gmra.mrb[64].mxu1 %v8330_v51  ;;  %2130 = vmatmul.mubr.bf16.vlgmr.msra.gmra.mrb[96].mxu0 %v8330_v51  ;;  %v2660_v44 = vmax.f32 %v2658_v10, %v2659_v25  ;;  %v2624_v55 = vrot.slane %v2623_v17, 4  ;;  %v1588_v27 = vpop.f32.mrb[15].mxu1  ;;  %v2338_v52 = vmax.f32 %v8518_v20, 0.0 }
 0x2c1   :  { %v2566_v31 = vmax.f32 %v2564_v19, %v2565_v13  ;;  %v1771_v33 = vpop.f32.mrb[43].mxu0  ;;  %1946 = vmatprep.mubr.bf16.mxu1 %v9688_v1  ;;  %2139 = vmatprep.mubr.bf16.mxu0 %v9688_v1  ;;  %v2618_v24 = vmax.f32 %v2616_v54, %v2617_v9  ;;  %v2324_v61 = vmax.f32 %v8521_v26, 0.0  ;;  %v2667_v2 = vmax.f32 %v2665_v53, %v2666_v28 }
 0x2c2   :  { %v2573_v38 = vmax.f32 %v2571_v50, %v2572_v58  ;;  %v2661_v5 = vrot.slane %v2660_v44, 2  ;;  %v2625_v3 = vmax.f32 %v2623_v17, %v2624_v55  ;;  %v1585_v11 = vadd.f32 %v1584_v18, %v8459_v16  ;;  %5520 = vmatpush1.bf16.msra.mxu1 %v7186_v0  ;;  %v7189_v17 = vld [vmem:[#allocation5 + $0x20] ss:$16 sps:$4 sm:$0xff]   ;;  %v7194_v55 = vld [vmem:[#allocation5 + $0x44] ss:$16 sps:$4 sm:$0xff]  }
 0x2c3   :  { %v3444_v51 = vpack.c.bf16 %v2566_v31, %v2566_v31  ;;  %v2619_v10 = vrot.slane %v2618_v24, 2  ;;  %v1768_v29 = vadd.f32 %v1767_v6, %v8485_v43  ;;  %v2668_v49 = vrot.slane %v2667_v2, 2  ;;  %5521 = vmatprep.subr.bf16.mxu1 %v7191_v62 }
 0x2c4   :  { %v3445_v19 = vpack.c.bf16 %v2573_v38, %v2573_v38  ;;  %v2662_v54 = vmax.f32 %v2660_v44, %v2661_v5  ;;  %v2626_v60 = vrot.slane %v2625_v3, 2  ;;  %v2339_v58 = vmax.f32 %v1585_v11, 0.0 }
 0x2c5   :  { %v3978_v50 = vunpack.c.l.b16 %v3444_v51  ;;  %v2620_v25 = vmax.f32 %v2618_v24, %v2619_v10  ;;  %v2325_v9 = vmax.f32 %v1768_v29, 0.0  ;;  %v2669_v26 = vmax.f32 %v2667_v2, %v2668_v49 }
 0x2c6   :  { %v3979_v13 = vunpack.c.l.b16 %v3445_v19  ;;  %v1775_v53 = vpop.f32.mrb[44].mxu0  ;;  %v2663_v20 = vrot.slane %v2662_v54, 1  ;;  %v2627_v31 = vmax.f32 %v2625_v3, %v2626_v60  ;;  %v1587_v28 = vadd.f32 %v1586_v15, %v8455_v36  ;;  %5522 = vmatpush1.bf16.msra.mxu1 %v7189_v17 }
 0x2c7   :  { %v1777_v18 = vpop.f32.mrb[45].mxu0  ;;  %v2621_v6 = vrot.slane %v2620_v25, 1  ;;  %v1770_v0 = vadd.f32 %v1769_v35, %v8480_v14  ;;  %v1589_v44 = vadd.f32 %v1588_v27, %v8459_v16  ;;  %v1772_v56 = vadd.f32 %v1771_v33, %v8485_v43  ;;  %v7192_v33 = vld [vmem:[#allocation5 + $0x40] ss:$16 sps:$4 sm:$0xff]   ;;  %5523 = vmatprep.subr.bf16.mxu1 %v7194_v55 }
 0x2c8   :  { %v1779_v38 = vpop.f32.mrb[46].mxu0  ;;  %1947 = vmatmul.mubr.bf16.gmra.mrb[68].mxu1 %v8328_v39  ;;  %2140 = vmatmul.mubr.bf16.gmra.mrb[100].mxu0 %v8328_v39  ;;  %v2664_v24 = vmax.f32 %v2662_v54, %v2663_v20  ;;  %v2670_v62 = vrot.slane %v2669_v26, 1  ;;  %v2628_v51 = vrot.slane %v2627_v31, 1  ;;  %v2346_v5 = vmax.f32 %v1587_v28, 0.0 }
 0x2c9   :  { %v1781_v2 = vpop.f32.mrb[47].mxu0  ;;  %1956 = vmatprep.mubr.bf16.mxu1 %v9688_v1  ;;  %2149 = vmatprep.mubr.bf16.mxu0 %v9688_v1  ;;  %v2622_v15 = vmax.f32 %v2620_v25, %v2621_v6  ;;  %v2332_v35 = vmax.f32 %v1770_v0, 0.0  ;;  %v2347_v3 = vmax.f32 %v1589_v44, 0.0  ;;  %v2333_v27 = vmax.f32 %v1772_v56, 0.0 }
 0x2ca   :  { %v3458_v19 = vpack.c.bf16 %v2664_v24, %v2664_v24  ;;  %v2671_v10 = vmax.f32 %v2669_v26, %v2670_v62  ;;  %v2629_v11 = vmax.f32 %v2627_v31, %v2628_v51  ;;  %v2714_v29 = vmax.f32 %v2338_v52, %v2346_v5  ;;  %5524 = vmatpush1.bf16.msra.mxu1 %v7192_v33 }
 0x2cb   :  { %v3452_v39 = vpack.c.bf16 %v2622_v15, %v2622_v15  ;;  %v2672_v54 = vmax.f32 %v2324_v61, %v2332_v35  ;;  %v2721_v49 = vmax.f32 %v2339_v58, %v2347_v3  ;;  %v2679_v60 = vmax.f32 %v2325_v9, %v2333_v27 }
 0x2cc   :  { %v3992_v20 = vunpack.c.l.b16 %v3458_v19  ;;  %v3459_v28 = vpack.c.bf16 %v2671_v10, %v2671_v10  ;;  %v3453_v7 = vpack.c.bf16 %v2629_v11, %v2629_v11  ;;  %v2715_v45 = vrot.slane %v2714_v29, 4 }
 0x2cd   :  { %v3986_v1 = vunpack.c.l.b16 %v3452_v39  ;;  %v2673_v25 = vrot.slane %v2672_v54, 4  ;;  %v2722_v6 = vrot.slane %v2721_v49, 4  ;;  %v2680_v0 = vrot.slane %v2679_v60, 4 }
 0x2ce   :  { %v8541_v17 = vsel %vm4106_vm2, %v3992_v20, %v8500_v57  ;;  %v3993_v26 = vunpack.c.l.b16 %v3459_v28  ;;  %v3987_v52 = vunpack.c.l.b16 %v3453_v7  ;;  %v2716_v31 = vmax.f32 %v2714_v29, %v2715_v45 }
 0x2cf   :  { %v8544_v61 = vsel %vm4104_vm1, %v3986_v1, %v3978_v50  ;;  %v2674_v58 = vmax.f32 %v2672_v54, %v2673_v25  ;;  %v2723_v9 = vmax.f32 %v2721_v49, %v2722_v6  ;;  %v2681_v55 = vmax.f32 %v2679_v60, %v2680_v0 }
 0x2d0   :  { %1957 = vmatmul.mubr.bf16.gmra.mrb[72].mxu1 %v8360_v37  ;;  %v8549_v44 = vsel %vm4106_vm2, %v3993_v26, %v8503_v40  ;;  %v8552_v56 = vsel %vm4104_vm1, %v3987_v52, %v3979_v13  ;;  %v2717_v57 = vrot.slane %v2716_v31, 2  ;;  %v1776_v24 = vadd.f32 %v1775_v53, %v8480_v14  ;;  %2150 = vmatmul.mubr.bf16.gmra.mrb[104].mxu0 %v8360_v37  ;;  %v7195_v52 = vld [vmem:[#allocation5 + $0x60] ss:$16 sps:$4 sm:$0xff]  }
 0x2d1   :  { %v9702_v45 = vmov 0   ;;  %v2675_v1 = vrot.slane %v2674_v58, 2  ;;  %v2724_v7 = vrot.slane %v2723_v9, 2  ;;  %v2682_v50 = vrot.slane %v2681_v55, 2 }
 0x2d2   :  { %1966 = vmatprep.mubr.bf16.mxu1 %v9702_v45  ;;  %v1778_v62 = vadd.f32 %v1777_v18, %v8485_v43  ;;  %2159 = vmatprep.mubr.bf16.mxu0 %v9702_v45  ;;  %v2718_v51 = vmax.f32 %v2716_v31, %v2717_v57  ;;  %v1780_v40 = vadd.f32 %v1779_v38, %v8480_v14  ;;  %v2340_v53 = vmax.f32 %v1776_v24, 0.0  ;;  %v7197_v31 = vld [vmem:[#allocation5 + $0x64] ss:$16 sps:$4 sm:$0xff]  }
 0x2d3   :  { %v1782_v13 = vadd.f32 %v1781_v2, %v8485_v43  ;;  %v2676_v5 = vmax.f32 %v2674_v58, %v2675_v1  ;;  %v2725_v15 = vmax.f32 %v2723_v9, %v2724_v7  ;;  %v2683_v35 = vmax.f32 %v2681_v55, %v2682_v50  ;;  %5525 = vmatprep.subr.bf16.mxu1 %v7197_v31 }
 0x2d4   :  { %v2719_v3 = vrot.slane %v2718_v51, 1  ;;  %v2341_v37 = vmax.f32 %v1778_v62, 0.0  ;;  %v2348_v27 = vmax.f32 %v1780_v40, 0.0  ;;  %5526 = vmatpush1.bf16.msra.mxu1 %v7195_v52  ;;  %v7198_v52 = vld [vmem:[#allocation5 + $0x80] ss:$16 sps:$4 sm:$0xff]  }
 0x2d5   :  { %v2349_v33 = vmax.f32 %v1782_v13, 0.0  ;;  %v2677_v19 = vrot.slane %v2676_v5, 1  ;;  %v2726_v10 = vrot.slane %v2725_v15, 1  ;;  %v2684_v11 = vrot.slane %v2683_v35, 1 }
 0x2d6   :  { %v1592_v18 = vpop.f32.mrb[16].mxu1  ;;  %v1785_v29 = vpop.f32.mrb[48].mxu0  ;;  %v2720_v39 = vmax.f32 %v2718_v51, %v2719_v3  ;;  %v2728_v54 = vmax.f32 %v2340_v53, %v2348_v27 }
 0x2d7   :  { %v2735_v49 = vmax.f32 %v2341_v37, %v2349_v33  ;;  %v8562_v38 = vadd.f32 %v1592_v18, %v8455_v36  ;;  %v1594_v2 = vpop.f32.mrb[17].mxu1  ;;  %v1787_v60 = vpop.f32.mrb[49].mxu0  ;;  %v2678_v20 = vmax.f32 %v2676_v5, %v2677_v19  ;;  %v2727_v28 = vmax.f32 %v2725_v15, %v2726_v10 }
 0x2d8   :  { %v2685_v25 = vmax.f32 %v2683_v35, %v2684_v11  ;;  %v8565_v6 = vadd.f32 %v1785_v29, %v8480_v14  ;;  %v1596_v0 = vpop.f32.mrb[18].mxu1  ;;  %v1789_v26 = vpop.f32.mrb[50].mxu0  ;;  %1967 = vmatmul.mubr.bf16.gmra.mrb[76].mxu1 %v8358_v59  ;;  %v3466_v58 = vpack.c.bf16 %v2720_v39, %v2720_v39  ;;  %v2729_v9 = vrot.slane %v2728_v54, 4  ;;  %2160 = vmatmul.mubr.bf16.gmra.mrb[108].mxu0 %v8358_v59 }
 0x2d9   :  { %v2736_v55 = vrot.slane %v2735_v49, 4  ;;  %v2354_v57 = vmax.f32 %v8562_v38, 0.0  ;;  %v1598_v24 = vpop.f32.mrb[19].mxu1  ;;  %v1791_v1 = vpop.f32.mrb[51].mxu0  ;;  %1976 = vmatprep.mubr.bf16.mxu1 %v9702_v45  ;;  %v3460_v7 = vpack.c.bf16 %v2678_v20, %v2678_v20  ;;  %v3467_v50 = vpack.c.bf16 %v2727_v28, %v2727_v28  ;;  %2169 = vmatprep.mubr.bf16.mxu0 %v9702_v45 }
 0x2da   :  { %v3461_v62 = vpack.c.bf16 %v2685_v25, %v2685_v25  ;;  %v2356_v51 = vmax.f32 %v8565_v6, 0.0  ;;  %v4000_v40 = vunpack.c.l.b16 %v3466_v58  ;;  %v2730_v13 = vmax.f32 %v2728_v54, %v2729_v9 }
 0x2db   :  { %v2737_v5 = vmax.f32 %v2735_v49, %v2736_v55  ;;  %v1595_v15 = vadd.f32 %v1594_v2, %v8459_v16  ;;  %v3994_v35 = vunpack.c.l.b16 %v3460_v7  ;;  %v8574_v59 = vunpack.c.l.b16 %v3467_v50 }
 0x2dc   :  { %v3995_v53 = vunpack.c.l.b16 %v3461_v62  ;;  %v1788_v3 = vadd.f32 %v1787_v60, %v8485_v43  ;;  %v8579_v37 = vsel %vm4108_vm3, %v4000_v40, %v8541_v17  ;;  %v2731_v27 = vrot.slane %v2730_v13, 2  ;;  %v7200_v40 = vld [vmem:[#allocation5 + $0x84] ss:$16 sps:$4 sm:$0xff]  }
 0x2dd   :  { %v2738_v33 = vrot.slane %v2737_v5, 2  ;;  %v2355_v19 = vmax.f32 %v1595_v15, 0.0  ;;  %v8583_v10 = vsel %vm4106_vm2, %v3994_v35, %v8544_v61  ;;  %v1597_v29 = vadd.f32 %v1596_v0, %v8455_v36  ;;  %5527 = vmatprep.subr.bf16.mxu1 %v7200_v40 }
 0x2de   :  { %v8587_v11 = vsel %vm4106_vm2, %v3995_v53, %v8552_v56  ;;  %v2357_v18 = vmax.f32 %v1788_v3, 0.0  ;;  %v1602_v39 = vpop.f32.mrb[20].mxu1  ;;  %v1795_v54 = vpop.f32.mrb[52].mxu0  ;;  %v2732_v49 = vmax.f32 %v2730_v13, %v2731_v27  ;;  %v1790_v17 = vadd.f32 %v1789_v26, %v8480_v14  ;;  %v7203_v53 = vld [vmem:[#allocation5 + $0xa4] ss:$16 sps:$4 sm:$0xff]   ;;  %5528 = vmatpush1.bf16.msra.mxu1 %v7198_v52 }
 0x2df   :  { %v2739_v38 = vmax.f32 %v2737_v5, %v2738_v33  ;;  %v1599_v2 = vadd.f32 %v1598_v24, %v8459_v16  ;;  %v1604_v60 = vpop.f32.mrb[21].mxu1  ;;  %v1797_v20 = vpop.f32.mrb[53].mxu0  ;;  %v2362_v28 = vmax.f32 %v1597_v29, 0.0  ;;  %v1792_v61 = vadd.f32 %v1791_v1, %v8485_v43  ;;  %5529 = vmatprep.subr.bf16.mxu1 %v7203_v53 }
 0x2e0   :  { %v8594_v25 = vadd.f32 %v1602_v39, %v8455_v36  ;;  %v8597_v56 = vadd.f32 %v1795_v54, %v8480_v14  ;;  %v1606_v6 = vpop.f32.mrb[22].mxu1  ;;  %v1799_v0 = vpop.f32.mrb[54].mxu0  ;;  %1977 = vmatmul.mubr.bf16.gmra.mrb[80].mxu1 %v8378_v12  ;;  %v2733_v31 = vrot.slane %v2732_v49, 1  ;;  %v2364_v58 = vmax.f32 %v1790_v17, 0.0  ;;  %2170 = vmatmul.mubr.bf16.gmra.mrb[112].mxu0 %v8378_v12 }
 0x2e1   :  { %v2740_v26 = vrot.slane %v2739_v38, 1  ;;  %v2363_v9 = vmax.f32 %v1599_v2, 0.0  ;;  %v1608_v55 = vpop.f32.mrb[23].mxu1  ;;  %v1801_v24 = vpop.f32.mrb[55].mxu0  ;;  %1986 = vmatprep.mubr.bf16.mxu1 %v9702_v45  ;;  %v2770_v1 = vmax.f32 %v2354_v57, %v2362_v28  ;;  %v2365_v7 = vmax.f32 %v1792_v61, 0.0  ;;  %2179 = vmatprep.mubr.bf16.mxu0 %v9702_v45 }
 0x2e2   :  { %v2370_v50 = vmax.f32 %v8594_v25, 0.0  ;;  %v2372_v62 = vmax.f32 %v8597_v56, 0.0  ;;  %v2734_v13 = vmax.f32 %v2732_v49, %v2733_v31  ;;  %v2784_v15 = vmax.f32 %v2356_v51, %v2364_v58 }
 0x2e3   :  { %v2741_v5 = vmax.f32 %v2739_v38, %v2740_v26  ;;  %v2777_v35 = vmax.f32 %v2355_v19, %v2363_v9  ;;  %v2771_v3 = vrot.slane %v2770_v1, 4  ;;  %v2791_v12 = vmax.f32 %v2357_v18, %v2365_v7  ;;  %v7201_v38 = vld [vmem:[#allocation5 + $0xa0] ss:$16 sps:$4 sm:$0xff]  }
 0x2e4   :  { %v1605_v27 = vadd.f32 %v1604_v60, %v8459_v16  ;;  %v1798_v33 = vadd.f32 %v1797_v20, %v8485_v43  ;;  %v3468_v57 = vpack.c.bf16 %v2734_v13, %v2734_v13  ;;  %v2785_v39 = vrot.slane %v2784_v15, 4  ;;  %v7206_v60 = vld [vmem:[#allocation5 + $0xc4] ss:$16 sps:$4 sm:$0xff]   ;;  %5530 = vmatpush1.bf16.msra.mxu1 %v7201_v38 }
 0x2e5   :  { %v3469_v29 = vpack.c.bf16 %v2741_v5, %v2741_v5  ;;  %v2778_v54 = vrot.slane %v2777_v35, 4  ;;  %v2772_v17 = vmax.f32 %v2770_v1, %v2771_v3  ;;  %v2792_v2 = vrot.slane %v2791_v12, 4  ;;  %5531 = vmatprep.subr.bf16.mxu1 %v7206_v60 }
 0x2e6   :  { %v2371_v28 = vmax.f32 %v1605_v27, 0.0  ;;  %v2373_v49 = vmax.f32 %v1798_v33, 0.0  ;;  %v4002_v51 = vunpack.c.l.b16 %v3468_v57  ;;  %v2786_v18 = vmax.f32 %v2784_v15, %v2785_v39 }
 0x2e7   :  { %v8607_v19 = vunpack.c.l.b16 %v3469_v29  ;;  %v2779_v61 = vmax.f32 %v2777_v35, %v2778_v54  ;;  %v2773_v25 = vrot.slane %v2772_v17, 2  ;;  %v2793_v20 = vmax.f32 %v2791_v12, %v2792_v2  ;;  %v7209_v35 = vld [vmem:[#allocation5 + $0xe4] ss:$16 sps:$4 sm:$0xff]   ;;  %v7207_v2 = vld [vmem:[#allocation5 + $0xe0] ss:$16 sps:$4 sm:$0xff]  }
 0x2e8   :  { %v1607_v56 = vadd.f32 %v1606_v6, %v8455_v36  ;;  %v1800_v31 = vadd.f32 %v1799_v0, %v8480_v14  ;;  %1987 = vmatmul.mubr.bf16.gmra.mrb[84].mxu1 %v8376_v30  ;;  %v8614_v52 = vsel %vm4108_vm3, %v4002_v51, %v8583_v10  ;;  %v2787_v26 = vrot.slane %v2786_v18, 2  ;;  %2180 = vmatmul.mubr.bf16.gmra.mrb[116].mxu0 %v8376_v30  ;;  %v7204_v0 = vld [vmem:[#allocation5 + $0xc0] ss:$16 sps:$4 sm:$0xff]  }
 0x2e9   :  { %v2780_v58 = vrot.slane %v2779_v61, 2  ;;  %v1609_v9 = vadd.f32 %v1608_v55, %v8459_v16  ;;  %1996 = vmatprep.mubr.bf16.mxu1 %v9702_v45  ;;  %v2774_v1 = vmax.f32 %v2772_v17, %v2773_v25  ;;  %v2794_v7 = vrot.slane %v2793_v20, 2  ;;  %2189 = vmatprep.mubr.bf16.mxu0 %v9702_v45 }
 0x2ea   :  { %v2378_v6 = vmax.f32 %v1607_v56, 0.0  ;;  %v2380_v40 = vmax.f32 %v1800_v31, 0.0  ;;  %v2788_v13 = vmax.f32 %v2786_v18, %v2787_v26  ;;  %v1802_v15 = vadd.f32 %v1801_v24, %v8485_v43  ;;  %5532 = vmatpush1.bf16.msra.mxu1 %v7204_v0  ;;  %v7210_v26 = vld [vmem:[#allocation5 + $0x8] ss:$16 sps:$4 sm:$0xff]  }
 0x2eb   :  { %v2781_v10 = vmax.f32 %v2779_v61, %v2780_v58  ;;  %v2379_v5 = vmax.f32 %v1609_v9, 0.0  ;;  %v2775_v55 = vrot.slane %v2774_v1, 1  ;;  %v2795_v53 = vmax.f32 %v2793_v20, %v2794_v7  ;;  %5533 = vmatprep.subr.bf16.mxu1 %v7209_v35 }
 0x2ec   :  { %v2826_v30 = vmax.f32 %v2370_v50, %v2378_v6  ;;  %v2840_v3 = vmax.f32 %v2372_v62, %v2380_v40  ;;  %v2789_v12 = vrot.slane %v2788_v13, 1  ;;  %v2381_v57 = vmax.f32 %v1802_v15, 0.0  ;;  %v7212_v62 = vld [vmem:[#allocation5 + $0xc] ss:$16 sps:$4 sm:$0xff]  }
 0x2ed   :  { %v2782_v27 = vrot.slane %v2781_v10, 1  ;;  %v2833_v33 = vmax.f32 %v2371_v28, %v2379_v5  ;;  %v2776_v29 = vmax.f32 %v2774_v1, %v2775_v55  ;;  %v2796_v39 = vrot.slane %v2795_v53, 1  ;;  %5691 = vmatprep.subr.bf16.mxu0 %v7212_v62  ;;  %v7218_v15 = vld [vmem:[#allocation5 + $0x2c] ss:$16 sps:$4 sm:$0xff]  }
 0x2ee   :  { %v2827_v54 = vrot.slane %v2826_v30, 4  ;;  %v2841_v17 = vrot.slane %v2840_v3, 4  ;;  %v2790_v38 = vmax.f32 %v2788_v13, %v2789_v12  ;;  %v2847_v24 = vmax.f32 %v2373_v49, %v2381_v57  ;;  %5534 = vmatpush1.bf16.msra.mxu1 %v7207_v2  ;;  %5692 = vmatpush1.bf16.msra.mxu0 %v7210_v26  ;;  %v7222_v26 = vld [vmem:[#allocation5 + $0x48] ss:$16 sps:$4 sm:$0xff]  }
 0x2ef   :  { %v2783_v51 = vmax.f32 %v2781_v10, %v2782_v27  ;;  %v2834_v18 = vrot.slane %v2833_v33, 4  ;;  %v3474_v61 = vpack.c.bf16 %v2776_v29, %v2776_v29  ;;  %v2797_v60 = vmax.f32 %v2795_v53, %v2796_v39  ;;  %v7216_v27 = vld [vmem:[#allocation5 + $0x28] ss:$16 sps:$4 sm:$0xff]   ;;  %5693 = vmatprep.subr.bf16.mxu0 %v7218_v15 }
 0x2f0   :  { %v2828_v25 = vmax.f32 %v2826_v30, %v2827_v54  ;;  %v2842_v50 = vmax.f32 %v2840_v3, %v2841_v17  ;;  %1997 = vmatmul.mubr.bf16.gmra.mrb[88].mxu1 %v8394_v23  ;;  %v3476_v28 = vpack.c.bf16 %v2790_v38, %v2790_v38  ;;  %v2848_v31 = vrot.slane %v2847_v24, 4  ;;  %2190 = vmatmul.mubr.bf16.gmra.mrb[120].mxu0 %v8394_v23 }
 0x2f1   :  { %v3475_v20 = vpack.c.bf16 %v2783_v51, %v2783_v51  ;;  %v2835_v56 = vmax.f32 %v2833_v33, %v2834_v18  ;;  %2006 = vmatprep.mubr.bf16.mxu1 %v9702_v45  ;;  %v4008_v58 = vunpack.c.l.b16 %v3474_v61  ;;  %v3477_v9 = vpack.c.bf16 %v2797_v60, %v2797_v60  ;;  %2199 = vmatprep.mubr.bf16.mxu0 %v9702_v45  ;;  %v7224_v18 = vld [vmem:[#allocation5 + $0x4c] ss:$16 sps:$4 sm:$0xff]  }
 0x2f2   :  { %v2829_v49 = vrot.slane %v2828_v25, 2  ;;  %v2843_v1 = vrot.slane %v2842_v50, 2  ;;  %v4010_v7 = vunpack.c.l.b16 %v3476_v28  ;;  %v2849_v0 = vmax.f32 %v2847_v24, %v2848_v31  ;;  %5694 = vmatpush1.bf16.msra.mxu0 %v7216_v27 }
 0x2f3   :  { %v4009_v6 = vunpack.c.l.b16 %v3475_v20  ;;  %v2836_v40 = vrot.slane %v2835_v56, 2  ;;  %v8627_v13 = vsel %vm4110_vm4, %v4008_v58, %v8579_v37  ;;  %v4011_v23 = vunpack.c.l.b16 %v3477_v9  ;;  %5695 = vmatprep.subr.bf16.mxu0 %v7224_v18  ;;  %v7233_v18 = vld [vmem:[#allocation5 + $0x8c] ss:$16 sps:$4 sm:$0xff]  }
 0x2f4   :  { %v2830_v10 = vmax.f32 %v2828_v25, %v2829_v49  ;;  %v2844_v5 = vmax.f32 %v2842_v50, %v2843_v1  ;;  %v8631_v35 = vsel %vm4110_vm4, %v4010_v7, %v8614_v52  ;;  %v2850_v53 = vrot.slane %v2849_v0, 2  ;;  %v7213_v7 = vld [vmem:[#allocation5 + $0x100] ss:$16 sps:$4 sm:$0xff]  }
 0x2f5   :  { %v2837_v55 = vmax.f32 %v2835_v56, %v2836_v40  ;;  %v4120_v30 = vsel %vm4108_vm3, %v8574_v59, %v8549_v44  ;;  %v4134_v33 = vsel %vm4108_vm3, %v8607_v19, %v8587_v11 }
 0x2f6   :  { %v2831_v3 = vrot.slane %v2830_v10, 1  ;;  %v2845_v12 = vrot.slane %v2844_v5, 1  ;;  %v8637_v37 = vsel %vm4110_vm4, %v4009_v6, %v4120_v30  ;;  %v2851_v57 = vmax.f32 %v2849_v0, %v2850_v53  ;;  %5696 = vmatpush1.bf16.msra.mxu0 %v7222_v26 }
 0x2f7   :  { %v2838_v52 = vrot.slane %v2837_v55, 1  ;;  %v1612_v29 = vpop.f32.mrb[24].mxu1  ;;  %v1805_v39 = vpop.f32.mrb[56].mxu0  ;;  %v8643_v54 = vsel %vm4110_vm4, %v4011_v23, %v4134_v33 }
 0x2f8   :  { %v2832_v44 = vmax.f32 %v2830_v10, %v2831_v3  ;;  %v2846_v59 = vmax.f32 %v2844_v5, %v2845_v12  ;;  %v1613_v17 = vadd.f32 %v1612_v29, %v8455_v36  ;;  %v1806_v2 = vadd.f32 %v1805_v39, %v8480_v14  ;;  %v1614_v38 = vpop.f32.mrb[25].mxu1  ;;  %v1807_v51 = vpop.f32.mrb[57].mxu0  ;;  %2007 = vmatmul.mubr.bf16.gmra.mrb[92].mxu1 %v8392_v63  ;;  %v7227_v10 = vld [vmem:[#allocation5 + $0x6c] ss:$16 sps:$4 sm:$0xff]  }
 0x2f9   :  { %v2839_v11 = vmax.f32 %v2837_v55, %v2838_v52  ;;  %v2852_v19 = vrot.slane %v2851_v57, 1  ;;  %v1615_v24 = vadd.f32 %v1614_v38, %v8459_v16  ;;  %v1808_v61 = vadd.f32 %v1807_v51, %v8485_v43  ;;  %2200 = vmatmul.mubr.bf16.gmra.mrb[124].mxu0 %v8392_v63  ;;  %v1616_v60 = vpop.f32.mrb[26].mxu1  ;;  %v1809_v25 = vpop.f32.mrb[58].mxu0  ;;  %2016 = vmatprep.mubr.bf16.mxu1 %v9702_v45  ;;  %v7215_v63 = vld [vmem:[#allocation5 + $0x104] ss:$16 sps:$4 sm:$0xff]  }
 0x2fa   :  { %v3482_v50 = vpack.c.bf16 %v2832_v44, %v2832_v44  ;;  %v3484_v62 = vpack.c.bf16 %v2846_v59, %v2846_v59  ;;  %v2386_v28 = vmax.f32 %v1613_v17, 0.0  ;;  %v2388_v20 = vmax.f32 %v1806_v2, 0.0  ;;  %v1618_v56 = vpop.f32.mrb[27].mxu1  ;;  %v1811_v31 = vpop.f32.mrb[59].mxu0  ;;  %2209 = vmatprep.mubr.bf16.mxu0 %v9702_v45  ;;  %5535 = vmatprep.subr.bf16.mxu1 %v7215_v63  ;;  %v7225_v44 = vld [vmem:[#allocation5 + $0x68] ss:$16 sps:$4 sm:$0xff]  }
 0x2fb   :  { %v3483_v58 = vpack.c.bf16 %v2839_v11, %v2839_v11  ;;  %v2853_v9 = vmax.f32 %v2851_v57, %v2852_v19  ;;  %v2387_v49 = vmax.f32 %v1615_v24, 0.0  ;;  %v2389_v1 = vmax.f32 %v1808_v61, 0.0  ;;  %5536 = vmatpush1.bf16.msra.mxu1 %v7213_v7  ;;  %5697 = vmatprep.subr.bf16.mxu0 %v7227_v10  ;;  %v7221_v10 = vld [vmem:[#allocation5 + $0x124] ss:$16 sps:$4 sm:$0xff]  }
 0x2fc   :  { %v4016_v6 = vunpack.c.l.b16 %v3482_v50  ;;  %v4018_v40 = vunpack.c.l.b16 %v3484_v62  ;;  %v1617_v0 = vadd.f32 %v1616_v60, %v8455_v36  ;;  %v1810_v23 = vadd.f32 %v1809_v25, %v8480_v14  ;;  %5698 = vmatpush1.bf16.msra.mxu0 %v7225_v44  ;;  %5537 = vmatprep.subr.bf16.mxu1 %v7221_v10 }
 0x2fd   :  { %v4017_v5 = vunpack.c.l.b16 %v3483_v58  ;;  %v3485_v15 = vpack.c.bf16 %v2853_v9, %v2853_v9  ;;  %v1619_v55 = vadd.f32 %v1618_v56, %v8459_v16  ;;  %v1812_v53 = vadd.f32 %v1811_v31, %v8485_v43  ;;  %5699 = vmatprep.subr.bf16.mxu0 %v7233_v18 }
 0x2fe   :  { %v8659_v30 = vsel %vm4112_vm5, %v4016_v6, %v8627_v13  ;;  %v2394_v3 = vmax.f32 %v1617_v0, 0.0  ;;  %v2396_v12 = vmax.f32 %v1810_v23, 0.0  ;;  %v8663_v27 = vsel %vm4112_vm5, %v4018_v40, %v8631_v35 }
 0x2ff   :  { %v8665_v33 = vunpack.c.l.b16 %v3485_v15  ;;  %v2395_v52 = vmax.f32 %v1619_v55, 0.0  ;;  %v2397_v57 = vmax.f32 %v1812_v53, 0.0  ;;  %v1622_v29 = vpop.f32.mrb[28].mxu1  ;;  %v1815_v39 = vpop.f32.mrb[60].mxu0  ;;  %v8669_v13 = vsel %vm4112_vm5, %v4017_v5, %v8637_v37 }
 0x300   :  { %v2882_v59 = vmax.f32 %v2386_v28, %v2394_v3  ;;  %v2896_v17 = vmax.f32 %v2388_v20, %v2396_v12  ;;  %v1623_v2 = vadd.f32 %v1622_v29, %v8455_v36  ;;  %v1816_v38 = vadd.f32 %v1815_v39, %v8480_v14  ;;  %v1624_v35 = vpop.f32.mrb[29].mxu1  ;;  %v1817_v51 = vpop.f32.mrb[61].mxu0  ;;  %2017 = vmatmul.mubr.bf16.gmra.mrb[96].mxu1 %v8410_v22  ;;  %v7236_v3 = vld [vmem:[#allocation5 + $0xac] ss:$16 sps:$4 sm:$0xff]   ;;  %v7219_v39 = vld [vmem:[#allocation5 + $0x120] ss:$16 sps:$4 sm:$0xff]  }
 0x301   :  { %v2889_v11 = vmax.f32 %v2387_v49, %v2395_v52  ;;  %v2903_v19 = vmax.f32 %v2389_v1, %v2397_v57  ;;  %v1625_v24 = vadd.f32 %v1624_v35, %v8459_v16  ;;  %v1818_v61 = vadd.f32 %v1817_v51, %v8485_v43  ;;  %2210 = vmatmul.mubr.bf16.gmra.mrb[128].mxu0 %v8410_v22  ;;  %v1626_v37 = vpop.f32.mrb[30].mxu1  ;;  %v1819_v60 = vpop.f32.mrb[62].mxu0  ;;  %v7231_v49 = vld [vmem:[#allocation5 + $0x88] ss:$16 sps:$4 sm:$0xff]  }
 0x302   :  { %v2883_v25 = vrot.slane %v2882_v59, 4  ;;  %v2897_v50 = vrot.slane %v2896_v17, 4  ;;  %v2402_v62 = vmax.f32 %v1623_v2, 0.0  ;;  %v2404_v28 = vmax.f32 %v1816_v38, 0.0  ;;  %v1628_v20 = vpop.f32.mrb[31].mxu1  ;;  %v1821_v56 = vpop.f32.mrb[63].mxu0  ;;  %2026 = vmatprep.mubr.bf16.mxu1 %v9702_v45  ;;  %2219 = vmatprep.mubr.bf16.mxu0 %v9702_v45 }
 0x303   :  { %v2890_v31 = vrot.slane %v2889_v11, 4  ;;  %v2904_v26 = vrot.slane %v2903_v19, 4  ;;  %v2403_v58 = vmax.f32 %v1625_v24, 0.0  ;;  %v2405_v9 = vmax.f32 %v1818_v61, 0.0  ;;  %5700 = vmatpush1.bf16.msra.mxu0 %v7231_v49  ;;  %v7230_v38 = vld [vmem:[#allocation5 + $0x144] ss:$16 sps:$4 sm:$0xff]   ;;  %5538 = vmatpush1.bf16.msra.mxu1 %v7219_v39 }
 0x304   :  { %v2884_v1 = vmax.f32 %v2882_v59, %v2883_v25  ;;  %v2898_v22 = vmax.f32 %v2896_v17, %v2897_v50  ;;  %v1627_v7 = vadd.f32 %v1626_v37, %v8455_v36  ;;  %v1820_v63 = vadd.f32 %v1819_v60, %v8480_v14  ;;  %v7242_v25 = vld [vmem:[#allocation5 + $0xcc] ss:$16 sps:$4 sm:$0xff]   ;;  %5701 = vmatprep.subr.bf16.mxu0 %v7236_v3 }
 0x305   :  { %v2891_v6 = vmax.f32 %v2889_v11, %v2890_v31  ;;  %v2905_v40 = vmax.f32 %v2903_v19, %v2904_v26  ;;  %v1629_v0 = vadd.f32 %v1628_v20, %v8459_v16  ;;  %v1822_v23 = vadd.f32 %v1821_v56, %v8485_v43  ;;  %v7234_v19 = vld [vmem:[#allocation5 + $0xa8] ss:$16 sps:$4 sm:$0xff]   ;;  %v7228_v56 = vld [vmem:[#allocation5 + $0x140] ss:$16 sps:$4 sm:$0xff]   ;;  %5539 = vmatprep.subr.bf16.mxu1 %v7230_v38  ;;  %v7245_v3 = vld [vmem:[#allocation5 + $0xec] ss:$16 sps:$4 sm:$0xff]  }
 0x306   :  { %v2885_v5 = vrot.slane %v2884_v1, 2  ;;  %v2899_v15 = vrot.slane %v2898_v22, 2  ;;  %v2410_v55 = vmax.f32 %v1627_v7, 0.0  ;;  %v2412_v53 = vmax.f32 %v1820_v63, 0.0 }
 0x307   :  { %v2892_v12 = vrot.slane %v2891_v6, 2  ;;  %v2906_v52 = vrot.slane %v2905_v40, 2  ;;  %v2411_v57 = vmax.f32 %v1629_v0, 0.0  ;;  %v2413_v29 = vmax.f32 %v1822_v23, 0.0  ;;  %5702 = vmatpush1.bf16.msra.mxu0 %v7234_v19  ;;  %v7240_v23 = vld [vmem:[#allocation5 + $0xc8] ss:$16 sps:$4 sm:$0xff]   ;;  %5540 = vmatpush1.bf16.msra.mxu1 %v7228_v56 }
 0x308   :  { %v2886_v44 = vmax.f32 %v2884_v1, %v2885_v5  ;;  %v2900_v59 = vmax.f32 %v2898_v22, %v2899_v15  ;;  %v2938_v17 = vmax.f32 %v2402_v62, %v2410_v55  ;;  %v2952_v2 = vmax.f32 %v2404_v28, %v2412_v53  ;;  %2027 = vmatmul.mubr.bf16.gmra.mrb[100].mxu1 %v8408_v21  ;;  %v7237_v53 = vld [vmem:[#allocation5 + $0x160] ss:$16 sps:$4 sm:$0xff]   ;;  %v7254_v56 = vld [vmem:[#allocation5 + $0x12c] ss:$16 sps:$4 sm:$0xff]  }
 0x309   :  { %v2893_v35 = vmax.f32 %v2891_v6, %v2892_v12  ;;  %v2907_v51 = vmax.f32 %v2905_v40, %v2906_v52  ;;  %v2945_v18 = vmax.f32 %v2403_v58, %v2411_v57  ;;  %v2959_v11 = vmax.f32 %v2405_v9, %v2413_v29  ;;  %2220 = vmatmul.mubr.bf16.gmra.mrb[132].mxu0 %v8408_v21  ;;  %v7239_v9 = vld [vmem:[#allocation5 + $0x164] ss:$16 sps:$4 sm:$0xff]  }
 0x30a   :  { %v2887_v24 = vrot.slane %v2886_v44, 1  ;;  %v2901_v61 = vrot.slane %v2900_v59, 1  ;;  %v2939_v37 = vrot.slane %v2938_v17, 4  ;;  %v2953_v60 = vrot.slane %v2952_v2, 4  ;;  %2036 = vmatprep.mubr.bf16.mxu1 %v9702_v45  ;;  %2229 = vmatprep.mubr.bf16.mxu0 %v9702_v45 }
 0x30b   :  { %v2894_v50 = vrot.slane %v2893_v35, 1  ;;  %v2908_v62 = vrot.slane %v2907_v51, 1  ;;  %v2946_v28 = vrot.slane %v2945_v18, 4  ;;  %v2960_v20 = vrot.slane %v2959_v11, 4  ;;  %5703 = vmatprep.subr.bf16.mxu0 %v7242_v25  ;;  %5541 = vmatprep.subr.bf16.mxu1 %v7239_v9 }
 0x30c   :  { %v2888_v31 = vmax.f32 %v2886_v44, %v2887_v24  ;;  %v2902_v26 = vmax.f32 %v2900_v59, %v2901_v61  ;;  %v2940_v21 = vmax.f32 %v2938_v17, %v2939_v37  ;;  %v2954_v58 = vmax.f32 %v2952_v2, %v2953_v60  ;;  %5704 = vmatpush1.bf16.msra.mxu0 %v7240_v23 }
 0x30d   :  { %v2895_v49 = vmax.f32 %v2893_v35, %v2894_v50  ;;  %v2909_v1 = vmax.f32 %v2907_v51, %v2908_v62  ;;  %v2947_v22 = vmax.f32 %v2945_v18, %v2946_v28  ;;  %v2961_v7 = vmax.f32 %v2959_v11, %v2960_v20  ;;  %v7243_v51 = vld [vmem:[#allocation5 + $0xe8] ss:$16 sps:$4 sm:$0xff]   ;;  %5542 = vmatpush1.bf16.msra.mxu1 %v7237_v53 }
 0x30e   :  { %v3490_v63 = vpack.c.bf16 %v2888_v31, %v2888_v31  ;;  %v3492_v6 = vpack.c.bf16 %v2902_v26, %v2902_v26  ;;  %v2941_v40 = vrot.slane %v2940_v21, 2  ;;  %v2955_v0 = vrot.slane %v2954_v58, 2  ;;  %5705 = vmatprep.subr.bf16.mxu0 %v7245_v3  ;;  %v7258_v3 = vld [vmem:[#allocation5 + $0x148] ss:$16 sps:$4 sm:$0xff]  }
 0x30f   :  { %v3491_v10 = vpack.c.bf16 %v2895_v49, %v2895_v49  ;;  %v3493_v5 = vpack.c.bf16 %v2909_v1, %v2909_v1  ;;  %v2948_v15 = vrot.slane %v2947_v22, 2  ;;  %v2962_v55 = vrot.slane %v2961_v7, 2  ;;  %v7260_v49 = vld [vmem:[#allocation5 + $0x14c] ss:$16 sps:$4 sm:$0xff]  }
 0x310   :  { %v4024_v12 = vunpack.c.l.b16 %v3490_v63  ;;  %v4026_v52 = vunpack.c.l.b16 %v3492_v6  ;;  %v2942_v57 = vmax.f32 %v2940_v21, %v2941_v40  ;;  %v2956_v29 = vmax.f32 %v2954_v58, %v2955_v0  ;;  %2037 = vmatmul.mubr.bf16.gmra.mrb[104].mxu1 %v8426_v46  ;;  %5706 = vmatpush1.bf16.msra.mxu0 %v7243_v51  ;;  %v7252_v21 = vld [vmem:[#allocation5 + $0x128] ss:$16 sps:$4 sm:$0xff]   ;;  %v7246_v63 = vld [vmem:[#allocation5 + $0x180] ss:$16 sps:$4 sm:$0xff]   ;;  %v7248_v6 = vld [vmem:[#allocation5 + $0x184] ss:$16 sps:$4 sm:$0xff]  }
 0x311   :  { %v4025_v39 = vunpack.c.l.b16 %v3491_v10  ;;  %v4027_v44 = vunpack.c.l.b16 %v3493_v5  ;;  %v2949_v59 = vmax.f32 %v2947_v22, %v2948_v15  ;;  %v2963_v17 = vmax.f32 %v2961_v7, %v2962_v55  ;;  %2230 = vmatmul.mubr.bf16.gmra.mrb[136].mxu0 %v8426_v46  ;;  %2046 = vmatprep.mubr.bf16.mxu1 %v9702_v45  ;;  %v7251_v46 = vld [vmem:[#allocation5 + $0x10c] ss:$16 sps:$4 sm:$0xff]  }
 0x312   :  { %v4115_v2 = vsel %vm4114_vm6, %v4024_v12, %v8659_v30  ;;  %v2943_v38 = vrot.slane %v2942_v57, 1  ;;  %v2957_v35 = vrot.slane %v2956_v29, 1  ;;  %2239 = vmatprep.mubr.bf16.mxu0 %v9702_v45  ;;  %v4136_v18 = vsel %vm4112_vm5, %v8665_v33, %v8643_v54  ;;  %v7249_v54 = vld [vmem:[#allocation5 + $0x108] ss:$16 sps:$4 sm:$0xff]   ;;  %5707 = vmatprep.subr.bf16.mxu0 %v7251_v46 }
 0x313   :  { %v2950_v11 = vrot.slane %v2949_v59, 1  ;;  %v2964_v19 = vrot.slane %v2963_v17, 1  ;;  %v4123_v24 = vsel %vm4114_vm6, %v4025_v39, %v8669_v13  ;;  %v4137_v30 = vsel %vm4114_vm6, %v4027_v44, %v4136_v18  ;;  %5543 = vmatprep.subr.bf16.mxu1 %v7248_v6  ;;  %v7263_v39 = vld [vmem:[#allocation5 + $0x16c] ss:$16 sps:$4 sm:$0xff]   ;;  %v7261_v46 = vld [vmem:[#allocation5 + $0x168] ss:$16 sps:$4 sm:$0xff]  }
 0x314   :  { %v2944_v61 = vmax.f32 %v2942_v57, %v2943_v38  ;;  %v2958_v37 = vmax.f32 %v2956_v29, %v2957_v35  ;;  %v4130_v60 = vsel %vm4114_vm6, %v4026_v52, %v8663_v27  ;;  %5708 = vmatpush1.bf16.msra.mxu0 %v7249_v54  ;;  %5544 = vmatpush1.bf16.msra.mxu1 %v7246_v63 }
 0x315   :  { %v2951_v25 = vmax.f32 %v2949_v59, %v2950_v11  ;;  %v2965_v50 = vmax.f32 %v2963_v17, %v2964_v19  ;;  %5709 = vmatprep.subr.bf16.mxu0 %v7254_v56 }
 0x316   :  { %v3498_v62 = vpack.c.bf16 %v2944_v61, %v2944_v61  ;;  %v3500_v28 = vpack.c.bf16 %v2958_v37, %v2958_v37  ;;  %v7269_v61 = vld [vmem:[#allocation5 + $0x18c] ss:$16 sps:$4 sm:$0xff]  }
 0x317   :  { %v3499_v33 = vpack.c.bf16 %v2951_v25, %v2951_v25  ;;  %v3501_v20 = vpack.c.bf16 %v2965_v50, %v2965_v50 }
 0x318   :  { %v4032_v31 = vunpack.c.l.b16 %v3498_v62  ;;  %v4034_v13 = vunpack.c.l.b16 %v3500_v28  ;;  %2047 = vmatmul.mubr.bf16.gmra.mrb[108].mxu1 %v8424_v8  ;;  %5710 = vmatpush1.bf16.msra.mxu0 %v7252_v21  ;;  %v7255_v62 = vld [vmem:[#allocation5 + $0x1a0] ss:$16 sps:$4 sm:$0xff]   ;;  %v7267_v21 = vld [vmem:[#allocation5 + $0x188] ss:$16 sps:$4 sm:$0xff]  }
 0x319   :  { %2240 = vmatmul.mubr.bf16.gmra.mrb[140].mxu0 %v8424_v8  ;;  %2056 = vmatprep.mubr.bf16.mxu1 %v9702_v45  ;;  %v4033_v27 = vunpack.c.l.b16 %v3499_v33  ;;  %v4035_v26 = vunpack.c.l.b16 %v3501_v20 }
 0x31a   :  { %2249 = vmatprep.mubr.bf16.mxu0 %v9702_v45  ;;  %v8706_v58 = vsel %vm4116_vm7, %v4032_v31, %v4115_v2  ;;  %v8709_v9 = vsel %vm4116_vm7, %v4034_v13, %v4130_v60  ;;  %5711 = vmatprep.subr.bf16.mxu0 %v7260_v49 }
 0x31b   :  { %9703 = vst [vmem:[#allocation16_spill] sm:$0xff] %v8709_v9  ;;  %v8712_v1 = vsel %vm4116_vm7, %v4033_v27, %v4123_v24  ;;  %v8715_v8 = vsel %vm4116_vm7, %v4035_v26, %v4137_v30 }
 0x31c   :  { %v1632_v22 = vpop.f32.mrb[32].mxu1  ;;  %v1825_v7 = vpop.f32.mrb[64].mxu0  ;;  %5712 = vmatpush1.bf16.msra.mxu0 %v7258_v3 }
 0x31d   :  { %v1633_v40 = vadd.f32 %v1632_v22, %v8455_v36  ;;  %v1826_v0 = vadd.f32 %v1825_v7, %v8480_v14  ;;  %v1634_v23 = vpop.f32.mrb[33].mxu1  ;;  %v1827_v10 = vpop.f32.mrb[65].mxu0  ;;  %5713 = vmatprep.subr.bf16.mxu0 %v7263_v39 }
 0x31e   :  { %v1635_v5 = vadd.f32 %v1634_v23, %v8459_v16  ;;  %v1828_v15 = vadd.f32 %v1827_v10, %v8485_v43  ;;  %v1636_v55 = vpop.f32.mrb[34].mxu1  ;;  %v1829_v53 = vpop.f32.mrb[66].mxu0 }
 0x31f   :  { %v1637_v12 = vadd.f32 %v1636_v55, %v8455_v36  ;;  %v1830_v52 = vadd.f32 %v1829_v53, %v8480_v14  ;;  %v1638_v57 = vpop.f32.mrb[35].mxu1  ;;  %v1831_v29 = vpop.f32.mrb[67].mxu0  ;;  %v2418_v17 = vmax.f32 %v1633_v40, 0.0  ;;  %v2420_v2 = vmax.f32 %v1826_v0, 0.0  ;;  %v7272_v40 = vld [vmem:[#allocation5 + $0x1ac] ss:$16 sps:$4 sm:$0xff]  }
 0x320   :  { %v1639_v44 = vadd.f32 %v1638_v57, %v8459_v16  ;;  %v1832_v59 = vadd.f32 %v1831_v29, %v8485_v43  ;;  %2057 = vmatmul.mubr.bf16.gmra.mrb[112].mxu1 %v8442_v4  ;;  %v2419_v51 = vmax.f32 %v1635_v5, 0.0  ;;  %v2421_v18 = vmax.f32 %v1828_v15, 0.0  ;;  %5714 = vmatpush1.bf16.msra.mxu0 %v7261_v46 }
 0x321   :  { %v2426_v38 = vmax.f32 %v1637_v12, 0.0  ;;  %v2428_v35 = vmax.f32 %v1830_v52, 0.0  ;;  %2250 = vmatmul.mubr.bf16.gmra.mrb[144].mxu0 %v8442_v4  ;;  %2066 = vmatprep.mubr.bf16.mxu1 %v9702_v45  ;;  %v7257_v4 = vld [vmem:[#allocation5 + $0x1a4] ss:$16 sps:$4 sm:$0xff]  }
 0x322   :  { %v2427_v11 = vmax.f32 %v1639_v44, 0.0  ;;  %v2429_v19 = vmax.f32 %v1832_v59, 0.0  ;;  %2259 = vmatprep.mubr.bf16.mxu0 %v9702_v45  ;;  %5545 = vmatprep.subr.bf16.mxu1 %v7257_v4  ;;  %v7266_v12 = vld [vmem:[#allocation5 + $0x1c4] ss:$16 sps:$4 sm:$0xff]   ;;  %v7264_v44 = vld [vmem:[#allocation5 + $0x1c0] ss:$16 sps:$4 sm:$0xff]  }
 0x323   :  { %v2994_v24 = vmax.f32 %v2418_v17, %v2426_v38  ;;  %v3008_v30 = vmax.f32 %v2420_v2, %v2428_v35  ;;  %5546 = vmatpush1.bf16.msra.mxu1 %v7255_v62  ;;  %5715 = vmatprep.subr.bf16.mxu0 %v7269_v61  ;;  %v7270_v59 = vld [vmem:[#allocation5 + $0x1a8] ss:$16 sps:$4 sm:$0xff]  }
 0x324   :  { %v3001_v37 = vmax.f32 %v2419_v51, %v2427_v11  ;;  %v3015_v60 = vmax.f32 %v2421_v18, %v2429_v19  ;;  %v1642_v25 = vpop.f32.mrb[36].mxu1  ;;  %v1835_v50 = vpop.f32.mrb[68].mxu0  ;;  %5716 = vmatpush1.bf16.msra.mxu0 %v7267_v21  ;;  %5547 = vmatprep.subr.bf16.mxu1 %v7266_v12 }
 0x325   :  { %v2995_v28 = vrot.slane %v2994_v24, 4  ;;  %v3009_v54 = vrot.slane %v3008_v30, 4  ;;  %v1644_v33 = vpop.f32.mrb[37].mxu1  ;;  %v1837_v20 = vpop.f32.mrb[69].mxu0  ;;  %v1643_v13 = vadd.f32 %v1642_v25, %v8455_v36  ;;  %v1836_v7 = vadd.f32 %v1835_v50, %v8480_v14  ;;  %5717 = vmatprep.subr.bf16.mxu0 %v7272_v40 }
 0x326   :  { %v3002_v56 = vrot.slane %v3001_v37, 4  ;;  %v3016_v31 = vrot.slane %v3015_v60, 4  ;;  %v1646_v27 = vpop.f32.mrb[38].mxu1  ;;  %v1839_v26 = vpop.f32.mrb[70].mxu0  ;;  %v1645_v10 = vadd.f32 %v1644_v33, %v8459_v16  ;;  %v1838_v5 = vadd.f32 %v1837_v20, %v8485_v43 }
 0x327   :  { %v2996_v49 = vmax.f32 %v2994_v24, %v2995_v28  ;;  %v3010_v22 = vmax.f32 %v3008_v30, %v3009_v54  ;;  %v1648_v63 = vpop.f32.mrb[39].mxu1  ;;  %v1841_v6 = vpop.f32.mrb[71].mxu0  ;;  %v1647_v53 = vadd.f32 %v1646_v27, %v8455_v36  ;;  %v1840_v3 = vadd.f32 %v1839_v26, %v8480_v14  ;;  %5548 = vmatpush1.bf16.msra.mxu1 %v7264_v44  ;;  %v7273_v54 = vld [vmem:[#allocation5 + $0x1e0] ss:$16 sps:$4 sm:$0xff]  }
 0x328   :  { %v3003_v0 = vmax.f32 %v3001_v37, %v3002_v56  ;;  %v3017_v23 = vmax.f32 %v3015_v60, %v3016_v31  ;;  %2067 = vmatmul.mubr.bf16.gmra.mrb[116].mxu1 %v8440_v42  ;;  %v1649_v29 = vadd.f32 %v1648_v63, %v8459_v16  ;;  %v1842_v39 = vadd.f32 %v1841_v6, %v8485_v43  ;;  %v7275_v37 = vld [vmem:[#allocation5 + $0x1e4] ss:$16 sps:$4 sm:$0xff]   ;;  %v7276_v56 = vld [vmem:[#allocation5 + $0x1c8] ss:$16 sps:$4 sm:$0xff]  }
 0x329   :  { %v2997_v15 = vrot.slane %v2996_v49, 2  ;;  %v3011_v55 = vrot.slane %v3010_v22, 2  ;;  %2260 = vmatmul.mubr.bf16.gmra.mrb[148].mxu0 %v8440_v42  ;;  %2076 = vmatprep.mubr.bf16.mxu1 %v9702_v45  ;;  %v2434_v17 = vmax.f32 %v1643_v13, 0.0  ;;  %v2436_v2 = vmax.f32 %v1836_v7, 0.0  ;;  %v7278_v42 = vld [vmem:[#allocation5 + $0x1cc] ss:$16 sps:$4 sm:$0xff]  }
 0x32a   :  { %v3004_v52 = vrot.slane %v3003_v0, 2  ;;  %v3018_v57 = vrot.slane %v3017_v23, 2  ;;  %2269 = vmatprep.mubr.bf16.mxu0 %v9702_v45  ;;  %v2442_v38 = vmax.f32 %v1647_v53, 0.0  ;;  %v2444_v35 = vmax.f32 %v1840_v3, 0.0  ;;  %5718 = vmatpush1.bf16.msra.mxu0 %v7270_v59 }
 0x32b   :  { %v2435_v51 = vmax.f32 %v1645_v10, 0.0  ;;  %v2437_v18 = vmax.f32 %v1838_v5, 0.0  ;;  %v2443_v11 = vmax.f32 %v1649_v29, 0.0  ;;  %v2445_v19 = vmax.f32 %v1842_v39, 0.0  ;;  %5549 = vmatprep.subr.bf16.mxu1 %v7275_v37  ;;  %5719 = vmatprep.subr.bf16.mxu0 %v7278_v42 }
 0x32c   :  { %v2998_v46 = vmax.f32 %v2996_v49, %v2997_v15  ;;  %v3012_v24 = vmax.f32 %v3010_v22, %v3011_v55  ;;  %v3050_v30 = vmax.f32 %v2434_v17, %v2442_v38  ;;  %v3064_v61 = vmax.f32 %v2436_v2, %v2444_v35  ;;  %5550 = vmatpush1.bf16.msra.mxu1 %v7273_v54  ;;  %v7281_v55 = vld [vmem:[#allocation5 + $0x1ec] ss:$16 sps:$4 sm:$0xff]  }
 0x32d   :  { %v3005_v60 = vmax.f32 %v3003_v0, %v3004_v52  ;;  %v3019_v25 = vmax.f32 %v3017_v23, %v3018_v57  ;;  %v3057_v50 = vmax.f32 %v2435_v51, %v2443_v11  ;;  %v3071_v62 = vmax.f32 %v2437_v18, %v2445_v19  ;;  %v7279_v52 = vld [vmem:[#allocation5 + $0x1e8] ss:$16 sps:$4 sm:$0xff]  }
 0x32e   :  { %v3051_v4 = vrot.slane %v3050_v30, 4  ;;  %v3065_v28 = vrot.slane %v3064_v61, 4  ;;  %v2999_v31 = vrot.slane %v2998_v46, 1  ;;  %v3013_v13 = vrot.slane %v3012_v24, 1  ;;  %5720 = vmatpush1.bf16.msra.mxu0 %v7276_v56 }
 0x32f   :  { %v3058_v33 = vrot.slane %v3057_v50, 4  ;;  %v3072_v20 = vrot.slane %v3071_v62, 4  ;;  %v3006_v21 = vrot.slane %v3005_v60, 1  ;;  %v3020_v49 = vrot.slane %v3019_v25, 1  ;;  %5721 = vmatprep.subr.bf16.mxu0 %v7281_v55 }
 0x330   :  { %2077 = vmatmul.mubr.bf16.gmra.mrb[120].mxu1 %v8489_v32  ;;  %v3052_v27 = vmax.f32 %v3050_v30, %v3051_v4  ;;  %v3066_v26 = vmax.f32 %v3064_v61, %v3065_v28  ;;  %v3000_v23 = vmax.f32 %v2998_v46, %v2999_v31  ;;  %v3014_v10 = vmax.f32 %v3012_v24, %v3013_v13 }
 0x331   :  { %2270 = vmatmul.mubr.bf16.gmra.mrb[152].mxu0 %v8489_v32  ;;  %v3059_v22 = vmax.f32 %v3057_v50, %v3058_v33  ;;  %v3073_v7 = vmax.f32 %v3071_v62, %v3072_v20  ;;  %2086 = vmatprep.mubr.bf16.mxu1 %v9702_v45  ;;  %v3007_v32 = vmax.f32 %v3005_v60, %v3006_v21 }
 0x332   :  { %v3053_v63 = vrot.slane %v3052_v27, 2  ;;  %v3067_v6 = vrot.slane %v3066_v26, 2  ;;  %2279 = vmatprep.mubr.bf16.mxu0 %v9702_v45  ;;  %v3021_v53 = vmax.f32 %v3019_v25, %v3020_v49  ;;  %5722 = vmatpush1.bf16.msra.mxu0 %v7279_v52  ;;  %v3506_v45 = vpack.c.bf16 %v3000_v23, %v3000_v23 }
 0x333   :  { %v3060_v40 = vrot.slane %v3059_v22, 2  ;;  %v3074_v0 = vrot.slane %v3073_v7, 2  ;;  %v3508_v59 = vpack.c.bf16 %v3014_v10, %v3014_v10  ;;  %v3507_v38 = vpack.c.bf16 %v3007_v32, %v3007_v32 }
 0x334   :  { %v3054_v5 = vmax.f32 %v3052_v27, %v3053_v63  ;;  %v3068_v15 = vmax.f32 %v3066_v26, %v3067_v6  ;;  %v3509_v35 = vpack.c.bf16 %v3021_v53, %v3021_v53  ;;  %v4040_v24 = vunpack.c.l.b16 %v3506_v45 }
 0x335   :  { %v3061_v3 = vmax.f32 %v3059_v22, %v3060_v40  ;;  %v3075_v12 = vmax.f32 %v3073_v7, %v3074_v0  ;;  %v4042_v30 = vunpack.c.l.b16 %v3508_v59  ;;  %v4041_v50 = vunpack.c.l.b16 %v3507_v38 }
 0x336   :  { %v3055_v57 = vrot.slane %v3054_v5, 1  ;;  %v3069_v29 = vrot.slane %v3068_v15, 1  ;;  %v4043_v62 = vunpack.c.l.b16 %v3509_v35 }
 0x337   :  { %v3062_v39 = vrot.slane %v3061_v3, 1  ;;  %v3076_v44 = vrot.slane %v3075_v12, 1 }
 0x338   :  { %2087 = vmatmul.mubr.bf16.gmra.mrb[124].mxu1 %v8487_v34  ;;  %v3056_v17 = vmax.f32 %v3054_v5, %v3055_v57  ;;  %v3070_v2 = vmax.f32 %v3068_v15, %v3069_v29 }
 0x339   :  { %2280 = vmatmul.mubr.bf16.gmra.mrb[156].mxu0 %v8487_v34  ;;  %v3063_v42 = vmax.f32 %v3061_v3, %v3062_v39  ;;  %v3077_v51 = vmax.f32 %v3075_v12, %v3076_v44 }
 0x33a   :  { %v3514_v18 = vpack.c.bf16 %v3056_v17, %v3056_v17  ;;  %v3516_v11 = vpack.c.bf16 %v3070_v2, %v3070_v2 }
 0x33b   :  { %v3515_v19 = vpack.c.bf16 %v3063_v42, %v3063_v42  ;;  %v3517_v46 = vpack.c.bf16 %v3077_v51, %v3077_v51 }
 0x33c   :  { %v4048_v61 = vunpack.c.l.b16 %v3514_v18  ;;  %v4050_v37 = vunpack.c.l.b16 %v3516_v11 }
 0x33d   :  { %v1652_v60 = vpop.f32.mrb[40].mxu1  ;;  %v1845_v25 = vpop.f32.mrb[72].mxu0  ;;  %v4049_v4 = vunpack.c.l.b16 %v3515_v19  ;;  %v4051_v28 = vunpack.c.l.b16 %v3517_v46 }
 0x33e   :  { %v1654_v54 = vpop.f32.mrb[41].mxu1  ;;  %v1847_v34 = vpop.f32.mrb[73].mxu0  ;;  %v8748_v33 = vsel %vm4104_vm1, %v4048_v61, %v4040_v24  ;;  %v8751_v20 = vsel %vm4104_vm1, %v4050_v37, %v4042_v30  ;;  %v1653_v56 = vadd.f32 %v1652_v60, %v8455_v36  ;;  %v1846_v31 = vadd.f32 %v1845_v25, %v8480_v14 }
 0x33f   :  { %v1656_v13 = vpop.f32.mrb[42].mxu1  ;;  %v1849_v27 = vpop.f32.mrb[74].mxu0  ;;  %v8756_v26 = vsel %vm4104_vm1, %v4049_v4, %v4041_v50  ;;  %v8759_v21 = vsel %vm4104_vm1, %v4051_v28, %v4043_v62  ;;  %v1655_v49 = vadd.f32 %v1654_v54, %v8459_v16  ;;  %v1848_v22 = vadd.f32 %v1847_v34, %v8485_v43 }
 0x340   :  { %v1658_v7 = vpop.f32.mrb[43].mxu1  ;;  %v1851_v63 = vpop.f32.mrb[75].mxu0  ;;  %v1657_v6 = vadd.f32 %v1656_v13, %v8455_v36  ;;  %v1850_v40 = vadd.f32 %v1849_v27, %v8480_v14  ;;  %v2450_v10 = vmax.f32 %v1653_v56, 0.0  ;;  %v2452_v5 = vmax.f32 %v1846_v31, 0.0  ;;  %v7284_v31 = vld [vmem:[#allocation5 + $0x204] ss:$16 sps:$4 sm:$0xff]  }
 0x341   :  { %v1659_v0 = vadd.f32 %v1658_v7, %v8459_v16  ;;  %v1852_v23 = vadd.f32 %v1851_v63, %v8485_v43  ;;  %v2451_v32 = vmax.f32 %v1655_v49, 0.0  ;;  %v2453_v53 = vmax.f32 %v1848_v22, 0.0  ;;  %v7287_v13 = vld [vmem:[#allocation5 + $0x20c] ss:$16 sps:$4 sm:$0xff]   ;;  %5562 = vmatprep.subr.bf16.mxu1 %v7284_v31 }
 0x342   :  { %v2458_v15 = vmax.f32 %v1657_v6, 0.0  ;;  %v2460_v55 = vmax.f32 %v1850_v40, 0.0  ;;  %5734 = vmatprep.subr.bf16.mxu0 %v7287_v13 }
 0x343   :  { %v2459_v3 = vmax.f32 %v1659_v0, 0.0  ;;  %v2461_v12 = vmax.f32 %v1852_v23, 0.0 }
 0x344   :  { %v3106_v52 = vmax.f32 %v2450_v10, %v2458_v15  ;;  %v3120_v57 = vmax.f32 %v2452_v5, %v2460_v55 }
 0x345   :  { %v1662_v29 = vpop.f32.mrb[44].mxu1  ;;  %v1855_v39 = vpop.f32.mrb[76].mxu0  ;;  %v3113_v44 = vmax.f32 %v2451_v32, %v2459_v3  ;;  %v3127_v45 = vmax.f32 %v2453_v53, %v2461_v12 }
 0x346   :  { %v1663_v59 = vadd.f32 %v1662_v29, %v8455_v36  ;;  %v1856_v17 = vadd.f32 %v1855_v39, %v8480_v14  ;;  %v1664_v2 = vpop.f32.mrb[45].mxu1  ;;  %v1857_v38 = vpop.f32.mrb[77].mxu0  ;;  %v3107_v35 = vrot.slane %v3106_v52, 4  ;;  %v3121_v42 = vrot.slane %v3120_v57, 4 }
 0x347   :  { %v1665_v51 = vadd.f32 %v1664_v2, %v8459_v16  ;;  %v1858_v18 = vadd.f32 %v1857_v38, %v8485_v43  ;;  %v1666_v11 = vpop.f32.mrb[46].mxu1  ;;  %v1859_v19 = vpop.f32.mrb[78].mxu0  ;;  %v3114_v46 = vrot.slane %v3113_v44, 4  ;;  %v3128_v24 = vrot.slane %v3127_v45, 4 }
 0x348   :  { %v2466_v30 = vmax.f32 %v1663_v59, 0.0  ;;  %v2468_v61 = vmax.f32 %v1856_v17, 0.0  ;;  %v1668_v37 = vpop.f32.mrb[47].mxu1  ;;  %v1861_v60 = vpop.f32.mrb[79].mxu0  ;;  %v3108_v25 = vmax.f32 %v3106_v52, %v3107_v35  ;;  %v3122_v50 = vmax.f32 %v3120_v57, %v3121_v42 }
 0x349   :  { %v2467_v62 = vmax.f32 %v1665_v51, 0.0  ;;  %v2469_v4 = vmax.f32 %v1858_v18, 0.0  ;;  %v3115_v28 = vmax.f32 %v3113_v44, %v3114_v46  ;;  %v3129_v54 = vmax.f32 %v3127_v45, %v3128_v24 }
 0x34a   :  { %v1667_v34 = vadd.f32 %v1666_v11, %v8455_v36  ;;  %v1860_v56 = vadd.f32 %v1859_v19, %v8480_v14  ;;  %v3109_v27 = vrot.slane %v3108_v25, 2  ;;  %v3123_v49 = vrot.slane %v3122_v50, 2 }
 0x34b   :  { %v1669_v22 = vadd.f32 %v1668_v37, %v8459_v16  ;;  %v1862_v7 = vadd.f32 %v1861_v60, %v8485_v43  ;;  %v3116_v63 = vrot.slane %v3115_v28, 2  ;;  %v3130_v6 = vrot.slane %v3129_v54, 2 }
 0x34c   :  { %v2474_v40 = vmax.f32 %v1667_v34, 0.0  ;;  %v2476_v0 = vmax.f32 %v1860_v56, 0.0  ;;  %v3110_v23 = vmax.f32 %v3108_v25, %v3109_v27  ;;  %v3124_v10 = vmax.f32 %v3122_v50, %v3123_v49 }
 0x34d   :  { %v2475_v5 = vmax.f32 %v1669_v22, 0.0  ;;  %v2477_v15 = vmax.f32 %v1862_v7, 0.0  ;;  %v3117_v55 = vmax.f32 %v3115_v28, %v3116_v63  ;;  %v3131_v32 = vmax.f32 %v3129_v54, %v3130_v6 }
 0x34e   :  { %v3162_v53 = vmax.f32 %v2466_v30, %v2474_v40  ;;  %v3176_v3 = vmax.f32 %v2468_v61, %v2476_v0  ;;  %v3111_v12 = vrot.slane %v3110_v23, 1  ;;  %v3125_v52 = vrot.slane %v3124_v10, 1 }
 0x34f   :  { %v3169_v57 = vmax.f32 %v2467_v62, %v2475_v5  ;;  %v3183_v29 = vmax.f32 %v2469_v4, %v2477_v15  ;;  %v3118_v39 = vrot.slane %v3117_v55, 1  ;;  %v3132_v44 = vrot.slane %v3131_v32, 1 }
 0x350   :  { %v3163_v45 = vrot.slane %v3162_v53, 4  ;;  %v3177_v59 = vrot.slane %v3176_v3, 4  ;;  %v3112_v17 = vmax.f32 %v3110_v23, %v3111_v12  ;;  %v3126_v2 = vmax.f32 %v3124_v10, %v3125_v52 }
 0x351   :  { %v3170_v38 = vrot.slane %v3169_v57, 4  ;;  %v3184_v35 = vrot.slane %v3183_v29, 4  ;;  %v3119_v42 = vmax.f32 %v3117_v55, %v3118_v39  ;;  %v3133_v51 = vmax.f32 %v3131_v32, %v3132_v44 }
 0x352   :  { %v3164_v18 = vmax.f32 %v3162_v53, %v3163_v45  ;;  %v3178_v11 = vmax.f32 %v3176_v3, %v3177_v59  ;;  %v3522_v19 = vpack.c.bf16 %v3112_v17, %v3112_v17  ;;  %v3524_v46 = vpack.c.bf16 %v3126_v2, %v3126_v2 }
 0x353   :  { %v3171_v24 = vmax.f32 %v3169_v57, %v3170_v38  ;;  %v3185_v30 = vmax.f32 %v3183_v29, %v3184_v35  ;;  %v3523_v61 = vpack.c.bf16 %v3119_v42, %v3119_v42  ;;  %v3525_v37 = vpack.c.bf16 %v3133_v51, %v3133_v51 }
 0x354   :  { %v3165_v60 = vrot.slane %v3164_v18, 2  ;;  %v3179_v25 = vrot.slane %v3178_v11, 2  ;;  %v4056_v50 = vunpack.c.l.b16 %v3522_v19  ;;  %v4058_v62 = vunpack.c.l.b16 %v3524_v46 }
 0x355   :  { %v3172_v4 = vrot.slane %v3171_v24, 2  ;;  %v3186_v28 = vrot.slane %v3185_v30, 2  ;;  %v4057_v54 = vunpack.c.l.b16 %v3523_v61  ;;  %v4059_v34 = vunpack.c.l.b16 %v3525_v37 }
 0x356   :  { %v3166_v56 = vmax.f32 %v3164_v18, %v3165_v60  ;;  %v3180_v31 = vmax.f32 %v3178_v11, %v3179_v25  ;;  %v4168_v13 = vsel %vm4106_vm2, %v4056_v50, %v8748_v33  ;;  %v4182_v27 = vsel %vm4106_vm2, %v4058_v62, %v8751_v20 }
 0x357   :  { %v3173_v49 = vmax.f32 %v3171_v24, %v3172_v4  ;;  %v3187_v22 = vmax.f32 %v3185_v30, %v3186_v28  ;;  %v4175_v7 = vsel %vm4106_vm2, %v4057_v54, %v8756_v26  ;;  %v4189_v63 = vsel %vm4106_vm2, %v4059_v34, %v8759_v21 }
 0x358   :  { %v3167_v6 = vrot.slane %v3166_v56, 1  ;;  %v3181_v40 = vrot.slane %v3180_v31, 1 }
 0x359   :  { %v3174_v0 = vrot.slane %v3173_v49, 1  ;;  %v3188_v23 = vrot.slane %v3187_v22, 1 }
 0x35a   :  { %v3168_v10 = vmax.f32 %v3166_v56, %v3167_v6  ;;  %v3182_v5 = vmax.f32 %v3180_v31, %v3181_v40 }
 0x35b   :  { %v3175_v15 = vmax.f32 %v3173_v49, %v3174_v0  ;;  %v3189_v55 = vmax.f32 %v3187_v22, %v3188_v23 }
 0x35c   :  { %v3530_v33 = vpack.c.bf16 %v3168_v10, %v3168_v10  ;;  %v3532_v32 = vpack.c.bf16 %v3182_v5, %v3182_v5 }
 0x35d   :  { %v3531_v53 = vpack.c.bf16 %v3175_v15, %v3175_v15  ;;  %v3533_v20 = vpack.c.bf16 %v3189_v55, %v3189_v55 }
 0x35e   :  { %v4064_v3 = vunpack.c.l.b16 %v3530_v33  ;;  %v4066_v12 = vunpack.c.l.b16 %v3532_v32 }
 0x35f   :  { %v4065_v52 = vunpack.c.l.b16 %v3531_v53  ;;  %v4067_v57 = vunpack.c.l.b16 %v3533_v20 }
 0x360   :  { %v8784_v26 = vsel %vm4108_vm3, %v4064_v3, %v4168_v13  ;;  %v8787_v21 = vsel %vm4108_vm3, %v4066_v12, %v4182_v27 }
 0x361   :  { %v8790_v29 = vsel %vm4108_vm3, %v4065_v52, %v4175_v7  ;;  %v8793_v39 = vsel %vm4108_vm3, %v4067_v57, %v4189_v63 }
 0x362   :  { %v1672_v44 = vpop.f32.mrb[48].mxu1  ;;  %v1865_v45 = vpop.f32.mrb[80].mxu0 }
 0x363   :  { %v1673_v59 = vadd.f32 %v1672_v44, %v8455_v36  ;;  %v1866_v17 = vadd.f32 %v1865_v45, %v8480_v14  ;;  %v1674_v2 = vpop.f32.mrb[49].mxu1  ;;  %v1867_v38 = vpop.f32.mrb[81].mxu0 }
 0x364   :  { %v1675_v35 = vadd.f32 %v1674_v2, %v8459_v16  ;;  %v1868_v42 = vadd.f32 %v1867_v38, %v8485_v43  ;;  %v1676_v51 = vpop.f32.mrb[50].mxu1  ;;  %v1869_v18 = vpop.f32.mrb[82].mxu0 }
 0x365   :  { %v1677_v11 = vadd.f32 %v1676_v51, %v8455_v36  ;;  %v1870_v19 = vadd.f32 %v1869_v18, %v8480_v14  ;;  %v1678_v46 = vpop.f32.mrb[51].mxu1  ;;  %v1871_v24 = vpop.f32.mrb[83].mxu0  ;;  %v2482_v37 = vmax.f32 %v1673_v59, 0.0  ;;  %v2484_v60 = vmax.f32 %v1866_v17, 0.0 }
 0x366   :  { %v1679_v30 = vadd.f32 %v1678_v46, %v8459_v16  ;;  %v1872_v61 = vadd.f32 %v1871_v24, %v8485_v43  ;;  %v2483_v62 = vmax.f32 %v1675_v35, 0.0  ;;  %v2485_v4 = vmax.f32 %v1868_v42, 0.0 }
 0x367   :  { %v2490_v25 = vmax.f32 %v1677_v11, 0.0  ;;  %v2492_v50 = vmax.f32 %v1870_v19, 0.0 }
 0x368   :  { %v2491_v28 = vmax.f32 %v1679_v30, 0.0  ;;  %v2493_v54 = vmax.f32 %v1872_v61, 0.0 }
 0x369   :  { %v3218_v34 = vmax.f32 %v2482_v37, %v2490_v25  ;;  %v3232_v56 = vmax.f32 %v2484_v60, %v2492_v50 }
 0x36a   :  { %v3225_v31 = vmax.f32 %v2483_v62, %v2491_v28  ;;  %v3239_v13 = vmax.f32 %v2485_v4, %v2493_v54  ;;  %v1682_v27 = vpop.f32.mrb[52].mxu1  ;;  %v1875_v49 = vpop.f32.mrb[84].mxu0 }
 0x36b   :  { %v3219_v22 = vrot.slane %v3218_v34, 4  ;;  %v3233_v7 = vrot.slane %v3232_v56, 4  ;;  %v1683_v63 = vadd.f32 %v1682_v27, %v8455_v36  ;;  %v1876_v6 = vadd.f32 %v1875_v49, %v8480_v14  ;;  %v1684_v40 = vpop.f32.mrb[53].mxu1  ;;  %v1877_v0 = vpop.f32.mrb[85].mxu0 }
 0x36c   :  { %v3226_v23 = vrot.slane %v3225_v31, 4  ;;  %v3240_v10 = vrot.slane %v3239_v13, 4  ;;  %v1685_v5 = vadd.f32 %v1684_v40, %v8459_v16  ;;  %v1878_v15 = vadd.f32 %v1877_v0, %v8485_v43  ;;  %v1686_v55 = vpop.f32.mrb[54].mxu1  ;;  %v1879_v33 = vpop.f32.mrb[86].mxu0 }
 0x36d   :  { %v3220_v32 = vmax.f32 %v3218_v34, %v3219_v22  ;;  %v3234_v53 = vmax.f32 %v3232_v56, %v3233_v7  ;;  %v2498_v20 = vmax.f32 %v1683_v63, 0.0  ;;  %v2500_v3 = vmax.f32 %v1876_v6, 0.0  ;;  %v1688_v12 = vpop.f32.mrb[55].mxu1  ;;  %v1881_v52 = vpop.f32.mrb[87].mxu0 }
 0x36e   :  { %v3227_v57 = vmax.f32 %v3225_v31, %v3226_v23  ;;  %v3241_v44 = vmax.f32 %v3239_v13, %v3240_v10  ;;  %v2499_v45 = vmax.f32 %v1685_v5, 0.0  ;;  %v2501_v59 = vmax.f32 %v1878_v15, 0.0 }
 0x36f   :  { %v3221_v17 = vrot.slane %v3220_v32, 2  ;;  %v3235_v2 = vrot.slane %v3234_v53, 2  ;;  %v1687_v38 = vadd.f32 %v1686_v55, %v8455_v36  ;;  %v1880_v35 = vadd.f32 %v1879_v33, %v8480_v14 }
 0x370   :  { %v3228_v42 = vrot.slane %v3227_v57, 2  ;;  %v3242_v51 = vrot.slane %v3241_v44, 2  ;;  %v1689_v18 = vadd.f32 %v1688_v12, %v8459_v16  ;;  %v1882_v11 = vadd.f32 %v1881_v52, %v8485_v43 }
 0x371   :  { %v3222_v19 = vmax.f32 %v3220_v32, %v3221_v17  ;;  %v3236_v46 = vmax.f32 %v3234_v53, %v3235_v2  ;;  %v2506_v24 = vmax.f32 %v1687_v38, 0.0  ;;  %v2508_v30 = vmax.f32 %v1880_v35, 0.0 }
 0x372   :  { %v3229_v61 = vmax.f32 %v3227_v57, %v3228_v42  ;;  %v3243_v37 = vmax.f32 %v3241_v44, %v3242_v51  ;;  %v2507_v60 = vmax.f32 %v1689_v18, 0.0  ;;  %v2509_v25 = vmax.f32 %v1882_v11, 0.0 }
 0x373   :  { %v3223_v50 = vrot.slane %v3222_v19, 1  ;;  %v3237_v62 = vrot.slane %v3236_v46, 1  ;;  %v3274_v4 = vmax.f32 %v2498_v20, %v2506_v24  ;;  %v3288_v28 = vmax.f32 %v2500_v3, %v2508_v30 }
 0x374   :  { %v3230_v54 = vrot.slane %v3229_v61, 1  ;;  %v3244_v34 = vrot.slane %v3243_v37, 1  ;;  %v3281_v56 = vmax.f32 %v2499_v45, %v2507_v60  ;;  %v3295_v31 = vmax.f32 %v2501_v59, %v2509_v25 }
 0x375   :  { %v3224_v13 = vmax.f32 %v3222_v19, %v3223_v50  ;;  %v3238_v27 = vmax.f32 %v3236_v46, %v3237_v62  ;;  %v3275_v49 = vrot.slane %v3274_v4, 4  ;;  %v3289_v22 = vrot.slane %v3288_v28, 4 }
 0x376   :  { %v3231_v7 = vmax.f32 %v3229_v61, %v3230_v54  ;;  %v3245_v63 = vmax.f32 %v3243_v37, %v3244_v34  ;;  %v3282_v6 = vrot.slane %v3281_v56, 4  ;;  %v3296_v40 = vrot.slane %v3295_v31, 4 }
 0x377   :  { %v3538_v0 = vpack.c.bf16 %v3224_v13, %v3224_v13  ;;  %v3540_v23 = vpack.c.bf16 %v3238_v27, %v3238_v27  ;;  %v3276_v10 = vmax.f32 %v3274_v4, %v3275_v49  ;;  %v3290_v5 = vmax.f32 %v3288_v28, %v3289_v22 }
 0x378   :  { %v3539_v15 = vpack.c.bf16 %v3231_v7, %v3231_v7  ;;  %v3541_v55 = vpack.c.bf16 %v3245_v63, %v3245_v63  ;;  %v3283_v33 = vmax.f32 %v3281_v56, %v3282_v6  ;;  %v3297_v32 = vmax.f32 %v3295_v31, %v3296_v40 }
 0x379   :  { %v4072_v53 = vunpack.c.l.b16 %v3538_v0  ;;  %v4074_v20 = vunpack.c.l.b16 %v3540_v23  ;;  %v3277_v3 = vrot.slane %v3276_v10, 2  ;;  %v3291_v12 = vrot.slane %v3290_v5, 2 }
 0x37a   :  { %v4073_v52 = vunpack.c.l.b16 %v3539_v15  ;;  %v4075_v57 = vunpack.c.l.b16 %v3541_v55  ;;  %v3284_v44 = vrot.slane %v3283_v33, 2  ;;  %v3298_v45 = vrot.slane %v3297_v32, 2 }
 0x37b   :  { %v4170_v59 = vsel %vm4110_vm4, %v4072_v53, %v8784_v26  ;;  %v4184_v17 = vsel %vm4110_vm4, %v4074_v20, %v8787_v21  ;;  %v3278_v2 = vmax.f32 %v3276_v10, %v3277_v3  ;;  %v3292_v38 = vmax.f32 %v3290_v5, %v3291_v12 }
 0x37c   :  { %v3285_v35 = vmax.f32 %v3283_v33, %v3284_v44  ;;  %v3299_v42 = vmax.f32 %v3297_v32, %v3298_v45  ;;  %v4177_v51 = vsel %vm4110_vm4, %v4073_v52, %v8790_v29  ;;  %v4191_v18 = vsel %vm4110_vm4, %v4075_v57, %v8793_v39 }
 0x37d   :  { %v3279_v11 = vrot.slane %v3278_v2, 1  ;;  %v3293_v19 = vrot.slane %v3292_v38, 1  ;;  %v1176_v29 = vsub.s32 4, %v8064_v41  ;;  %v1184_v39 = vsub.s32 6, %v8064_v41 }
 0x37e   :  { %v3286_v46 = vrot.slane %v3285_v35, 1  ;;  %v3300_v24 = vrot.slane %v3299_v42, 1  ;;  %v1180_v55 = vsub.s32 5, %v8064_v41  ;;  %v1188_v33 = vsub.s32 7, %v8064_v41 }
 0x37f   :  { %v3280_v30 = vmax.f32 %v3278_v2, %v3279_v11  ;;  %v3294_v61 = vmax.f32 %v3292_v38, %v3293_v19 }
 0x380   :  { %v3287_v26 = vmax.f32 %v3285_v35, %v3286_v46  ;;  %v3301_v37 = vmax.f32 %v3299_v42, %v3300_v24  ;;  %v7690_v42 = vld [vmem:[%s9677_s6] sm:$0xff] }
 0x381   :  { %v3546_v60 = vpack.c.bf16 %v3280_v30, %v3280_v30  ;;  %v3548_v21 = vpack.c.bf16 %v3294_v61, %v3294_v61  ;;  %v8846_v11 = vrot.slane %v7690_v42, %v1176_v29  ;;  %v8848_v19 = vrot.slane %v7690_v42, %v1184_v39 }
 0x382   :  { %v3547_v25 = vpack.c.bf16 %v3287_v26, %v3287_v26  ;;  %v3549_v50 = vpack.c.bf16 %v3301_v37, %v3301_v37  ;;  %v8852_v61 = vrot.slane %v7690_v42, %v1188_v33 }
 0x383   :  { %v4080_v62 = vunpack.c.l.b16 %v3546_v60  ;;  %v4082_v4 = vunpack.c.l.b16 %v3548_v21  ;;  %v1692_v28 = vpop.f32.mrb[56].mxu1  ;;  %v1885_v54 = vpop.f32.mrb[88].mxu0 }
 0x384   :  { %v4081_v34 = vunpack.c.l.b16 %v3547_v25  ;;  %v4083_v56 = vunpack.c.l.b16 %v3549_v50  ;;  %v1693_v31 = vadd.f32 %v1692_v28, %v8455_v36  ;;  %v1886_v13 = vadd.f32 %v1885_v54, %v8480_v14  ;;  %v1694_v27 = vpop.f32.mrb[57].mxu1  ;;  %v1887_v49 = vpop.f32.mrb[89].mxu0 }
 0x385   :  { %v8824_v22 = vsel %vm4112_vm5, %v4080_v62, %v4170_v59  ;;  %v1695_v7 = vadd.f32 %v1694_v27, %v8459_v16  ;;  %v1888_v63 = vadd.f32 %v1887_v49, %v8485_v43  ;;  %v1696_v6 = vpop.f32.mrb[58].mxu1  ;;  %v1889_v40 = vpop.f32.mrb[90].mxu0  ;;  %v8829_v0 = vsel %vm4112_vm5, %v4082_v4, %v4184_v17 }
 0x386   :  { %9704 = vst [vmem:[#allocation17_spill] sm:$0xff] %v8829_v0  ;;  %v1697_v23 = vadd.f32 %v1696_v6, %v8455_v36  ;;  %v1890_v10 = vadd.f32 %v1889_v40, %v8480_v14  ;;  %v1698_v5 = vpop.f32.mrb[59].mxu1  ;;  %v1891_v15 = vpop.f32.mrb[91].mxu0  ;;  %v2514_v32 = vmax.f32 %v1693_v31, 0.0  ;;  %v2516_v53 = vmax.f32 %v1886_v13, 0.0 }
 0x387   :  { %v1699_v20 = vadd.f32 %v1698_v5, %v8459_v16  ;;  %v1892_v3 = vadd.f32 %v1891_v15, %v8485_v43  ;;  %v8838_v57 = vsel %vm4112_vm5, %v4081_v34, %v4177_v51  ;;  %v8841_v44 = vsel %vm4112_vm5, %v4083_v56, %v4191_v18 }
 0x388   :  { %v2522_v12 = vmax.f32 %v1697_v23, 0.0  ;;  %v2524_v52 = vmax.f32 %v1890_v10, 0.0  ;;  %v2515_v45 = vmax.f32 %v1695_v7, 0.0  ;;  %v2517_v59 = vmax.f32 %v1888_v63, 0.0 }
 0x389   :  { %v2523_v17 = vmax.f32 %v1699_v20, 0.0  ;;  %v2525_v2 = vmax.f32 %v1892_v3, 0.0  ;;  %v8850_v18 = vrot.slane %v7690_v42, %v1180_v55 }
 0x38a   :  { %v3330_v38 = vmax.f32 %v2514_v32, %v2522_v12  ;;  %v3344_v35 = vmax.f32 %v2516_v53, %v2524_v52 }
 0x38b   :  { %v3337_v46 = vmax.f32 %v2515_v45, %v2523_v17  ;;  %v3351_v51 = vmax.f32 %v2517_v59, %v2525_v2  ;;  %v1702_v24 = vpop.f32.mrb[60].mxu1  ;;  %v1895_v30 = vpop.f32.mrb[92].mxu0 }
 0x38c   :  { %v3331_v26 = vrot.slane %v3330_v38, 4  ;;  %v3345_v37 = vrot.slane %v3344_v35, 4  ;;  %v1703_v60 = vadd.f32 %v1702_v24, %v8455_v36  ;;  %v1896_v21 = vadd.f32 %v1895_v30, %v8480_v14  ;;  %v1704_v25 = vpop.f32.mrb[61].mxu1  ;;  %v1897_v50 = vpop.f32.mrb[93].mxu0 }
 0x38d   :  { %v3338_v62 = vrot.slane %v3337_v46, 4  ;;  %v3352_v4 = vrot.slane %v3351_v51, 4  ;;  %v1705_v28 = vadd.f32 %v1704_v25, %v8459_v16  ;;  %v1898_v54 = vadd.f32 %v1897_v50, %v8485_v43  ;;  %v1706_v29 = vpop.f32.mrb[62].mxu1  ;;  %v1899_v39 = vpop.f32.mrb[94].mxu0 }
 0x38e   :  { %v3332_v34 = vmax.f32 %v3330_v38, %v3331_v26  ;;  %v3346_v56 = vmax.f32 %v3344_v35, %v3345_v37  ;;  %v2530_v31 = vmax.f32 %v1703_v60, 0.0  ;;  %v2532_v13 = vmax.f32 %v1896_v21, 0.0  ;;  %v1708_v27 = vpop.f32.mrb[63].mxu1  ;;  %v1901_v49 = vpop.f32.mrb[95].mxu0 }
 0x38f   :  { %v3339_v7 = vmax.f32 %v3337_v46, %v3338_v62  ;;  %v3353_v63 = vmax.f32 %v3351_v51, %v3352_v4  ;;  %v2531_v6 = vmax.f32 %v1705_v28, 0.0  ;;  %v2533_v40 = vmax.f32 %v1898_v54, 0.0 }
 0x390   :  { %v3333_v23 = vrot.slane %v3332_v34, 2  ;;  %v3347_v10 = vrot.slane %v3346_v56, 2  ;;  %v1707_v5 = vadd.f32 %v1706_v29, %v8455_v36  ;;  %v1900_v15 = vadd.f32 %v1899_v39, %v8480_v14 }
 0x391   :  { %v3340_v55 = vrot.slane %v3339_v7, 2  ;;  %v3354_v33 = vrot.slane %v3353_v63, 2  ;;  %v1709_v32 = vadd.f32 %v1708_v27, %v8459_v16  ;;  %v1902_v53 = vadd.f32 %v1901_v49, %v8485_v43 }
 0x392   :  { %v3334_v20 = vmax.f32 %v3332_v34, %v3333_v23  ;;  %v3348_v3 = vmax.f32 %v3346_v56, %v3347_v10  ;;  %v2538_v12 = vmax.f32 %v1707_v5, 0.0  ;;  %v2540_v52 = vmax.f32 %v1900_v15, 0.0 }
 0x393   :  { %v3341_v45 = vmax.f32 %v3339_v7, %v3340_v55  ;;  %v3355_v59 = vmax.f32 %v3353_v63, %v3354_v33  ;;  %v2539_v17 = vmax.f32 %v1709_v32, 0.0  ;;  %v2541_v2 = vmax.f32 %v1902_v53, 0.0  ;;  %v1938_v38 = vpop.f32.mrb[64].mxu1  ;;  %v2131_v35 = vpop.f32.mrb[96].mxu0 }
 0x394   :  { %v3335_v42 = vrot.slane %v3334_v20, 1  ;;  %v3349_v36 = vrot.slane %v3348_v3, 1  ;;  %v3386_v46 = vmax.f32 %v2530_v31, %v2538_v12  ;;  %v3400_v14 = vmax.f32 %v2532_v13, %v2540_v52  ;;  %v1940_v51 = vpop.f32.mrb[65].mxu1  ;;  %v2133_v24 = vpop.f32.mrb[97].mxu0 }
 0x395   :  { %v3342_v30 = vrot.slane %v3341_v45, 1  ;;  %v3356_v16 = vrot.slane %v3355_v59, 1  ;;  %v3393_v26 = vmax.f32 %v2531_v6, %v2539_v17  ;;  %v3407_v43 = vmax.f32 %v2533_v40, %v2541_v2  ;;  %v1942_v37 = vpop.f32.mrb[66].mxu1  ;;  %v2135_v60 = vpop.f32.mrb[98].mxu0 }
 0x396   :  { %v3336_v21 = vmax.f32 %v3334_v20, %v3335_v42  ;;  %v3350_v25 = vmax.f32 %v3348_v3, %v3349_v36  ;;  %v3387_v50 = vrot.slane %v3386_v46, 4  ;;  %v3401_v62 = vrot.slane %v3400_v14, 4  ;;  %v1944_v4 = vpop.f32.mrb[67].mxu1  ;;  %v2137_v28 = vpop.f32.mrb[99].mxu0 }
 0x397   :  { %v3343_v54 = vmax.f32 %v3341_v45, %v3342_v30  ;;  %v3357_v29 = vmax.f32 %v3355_v59, %v3356_v16  ;;  %v3394_v39 = vrot.slane %v3393_v26, 4  ;;  %v3408_v34 = vrot.slane %v3407_v43, 4 }
 0x398   :  { %v3554_v56 = vpack.c.bf16 %v3336_v21, %v3336_v21  ;;  %v3556_v31 = vpack.c.bf16 %v3350_v25, %v3350_v25  ;;  %v3388_v13 = vmax.f32 %v3386_v46, %v3387_v50  ;;  %v3402_v27 = vmax.f32 %v3400_v14, %v3401_v62 }
 0x399   :  { %v3555_v49 = vpack.c.bf16 %v3343_v54, %v3343_v54  ;;  %v3557_v7 = vpack.c.bf16 %v3357_v29, %v3357_v29  ;;  %v3395_v63 = vmax.f32 %v3393_v26, %v3394_v39  ;;  %v3409_v6 = vmax.f32 %v3407_v43, %v3408_v34 }
 0x39a   :  { %v4088_v40 = vunpack.c.l.b16 %v3554_v56  ;;  %v8862_v23 = vunpack.c.l.b16 %v3556_v31  ;;  %v3389_v10 = vrot.slane %v3388_v13, 2  ;;  %v3403_v5 = vrot.slane %v3402_v27, 2 }
 0x39b   :  { %v8864_v15 = vunpack.c.l.b16 %v3555_v49  ;;  %v8866_v55 = vunpack.c.l.b16 %v3557_v7  ;;  %v3396_v33 = vrot.slane %v3395_v63, 2  ;;  %v3410_v32 = vrot.slane %v3409_v6, 2  ;;  %v1948_v53 = vpop.f32.mrb[68].mxu1  ;;  %v2141_v20 = vpop.f32.mrb[100].mxu0 }
 0x39c   :  { %9705 = vst [vmem:[#allocation18_spill] sm:$0xff] %v8862_v23  ;;  %v8870_v3 = vsel %vm4114_vm6, %v4088_v40, %v8824_v22  ;;  %v3390_v12 = vmax.f32 %v3388_v13, %v3389_v10  ;;  %v3404_v52 = vmax.f32 %v3402_v27, %v3403_v5  ;;  %v1939_v45 = vadd.f32 %v1938_v38, %v8846_v11  ;;  %v1950_v59 = vpop.f32.mrb[69].mxu1  ;;  %v2143_v17 = vpop.f32.mrb[101].mxu0 }
 0x39d   :  { %v3397_v2 = vmax.f32 %v3395_v63, %v3396_v33  ;;  %v3411_v42 = vmax.f32 %v3409_v6, %v3410_v32  ;;  %v2132_v36 = vadd.f32 %v2131_v35, %v8848_v19  ;;  %v1941_v46 = vadd.f32 %v1940_v51, %v8850_v18  ;;  %v1952_v14 = vpop.f32.mrb[70].mxu1  ;;  %v2145_v30 = vpop.f32.mrb[102].mxu0 }
 0x39e   :  { %v3391_v16 = vrot.slane %v3390_v12, 1  ;;  %v3405_v26 = vrot.slane %v3404_v52, 1  ;;  %v2294_v43 = vmax.f32 %v1939_v45, 0.0  ;;  %v2134_v22 = vadd.f32 %v2133_v24, %v8852_v61  ;;  %v1954_v21 = vpop.f32.mrb[71].mxu1  ;;  %v2147_v25 = vpop.f32.mrb[103].mxu0 }
 0x39f   :  { %v3398_v50 = vrot.slane %v3397_v2, 1  ;;  %v3412_v62 = vrot.slane %v3411_v42, 1  ;;  %v2296_v38 = vmax.f32 %v2132_v36, 0.0  ;;  %v2295_v54 = vmax.f32 %v1941_v46, 0.0 }
 0x3a0   :  { %v3392_v29 = vmax.f32 %v3390_v12, %v3391_v16  ;;  %v3406_v39 = vmax.f32 %v3404_v52, %v3405_v26  ;;  %v2297_v34 = vmax.f32 %v2134_v22, 0.0  ;;  %v1943_v35 = vadd.f32 %v1942_v37, %v8846_v11 }
 0x3a1   :  { %v8877_v56 = vmax.f32 %v3397_v2, %v3398_v50  ;;  %v8879_v51 = vmax.f32 %v3411_v42, %v3412_v62  ;;  %v2136_v31 = vadd.f32 %v2135_v60, %v8848_v19  ;;  %v1945_v13 = vadd.f32 %v1944_v4, %v8850_v18 }
 0x3a2   :  { %v3562_v24 = vpack.c.bf16 %v3392_v29, %v3392_v29  ;;  %v3564_v27 = vpack.c.bf16 %v3406_v39, %v3406_v39  ;;  %v2302_v49 = vmax.f32 %v1943_v35, 0.0  ;;  %v2138_v7 = vadd.f32 %v2137_v28, %v8852_v61 }
 0x3a3   :  { %v2304_v37 = vmax.f32 %v2136_v31, 0.0  ;;  %v2303_v40 = vmax.f32 %v1945_v13, 0.0  ;;  %v8888_v10 = vpop.f32.mrb[72].mxu1  ;;  %v8894_v32 = vpop.f32.mrb[104].mxu0  ;;  %v1949_v45 = vadd.f32 %v1948_v53, %v8846_v11  ;;  %v2142_v2 = vadd.f32 %v2141_v20, %v8848_v19 }
 0x3a4   :  { %v8890_v5 = vunpack.c.l.b16 %v3562_v24  ;;  %v8892_v60 = vunpack.c.l.b16 %v3564_v27  ;;  %v2574_v4 = vmax.f32 %v2294_v43, %v2302_v49  ;;  %v2305_v33 = vmax.f32 %v2138_v7, 0.0  ;;  %v8896_v12 = vpop.f32.mrb[73].mxu1  ;;  %v8900_v42 = vpop.f32.mrb[105].mxu0 }
 0x3a5   :  { %v2588_v28 = vmax.f32 %v2296_v38, %v2304_v37  ;;  %v2581_v52 = vmax.f32 %v2295_v54, %v2303_v40  ;;  %v8902_v36 = vpop.f32.mrb[74].mxu1  ;;  %v1951_v26 = vadd.f32 %v1950_v59, %v8850_v18  ;;  %v2144_v43 = vadd.f32 %v2143_v17, %v8852_v61  ;;  %v8906_v22 = vpop.f32.mrb[106].mxu0 }
 0x3a6   :  { %9706 = vst [vmem:[#allocation19_spill] sm:$0xff] %v8892_v60  ;;  %v2575_v46 = vrot.slane %v2574_v4, 4  ;;  %v2595_v16 = vmax.f32 %v2297_v34, %v2305_v33  ;;  %v8908_v50 = vpop.f32.mrb[75].mxu1  ;;  %v2310_v54 = vmax.f32 %v1949_v45, 0.0  ;;  %v2312_v53 = vmax.f32 %v2142_v2, 0.0  ;;  %v8910_v29 = vpop.f32.mrb[107].mxu0 }
 0x3a7   :  { %v2589_v62 = vrot.slane %v2588_v28, 4  ;;  %v2582_v38 = vrot.slane %v2581_v52, 4  ;;  %v2311_v35 = vmax.f32 %v1951_v26, 0.0  ;;  %v2313_v31 = vmax.f32 %v2144_v43, 0.0 }
 0x3a8   :  { %v2576_v20 = vmax.f32 %v2574_v4, %v2575_v46  ;;  %v2596_v39 = vrot.slane %v2595_v16, 4  ;;  %v1953_v59 = vadd.f32 %v1952_v14, %v8846_v11  ;;  %v2146_v17 = vadd.f32 %v2145_v30, %v8848_v19 }
 0x3a9   :  { %v2590_v13 = vmax.f32 %v2588_v28, %v2589_v62  ;;  %v2583_v34 = vmax.f32 %v2581_v52, %v2582_v38  ;;  %v1955_v49 = vadd.f32 %v1954_v21, %v8850_v18  ;;  %v2148_v7 = vadd.f32 %v2147_v25, %v8852_v61 }
 0x3aa   :  { %v2577_v24 = vrot.slane %v2576_v20, 2  ;;  %v2597_v27 = vmax.f32 %v2595_v16, %v2596_v39  ;;  %v2318_v33 = vmax.f32 %v1953_v59, 0.0  ;;  %v2320_v45 = vmax.f32 %v2146_v17, 0.0 }
 0x3ab   :  { %v2591_v37 = vrot.slane %v2590_v13, 2  ;;  %v2584_v40 = vrot.slane %v2583_v34, 2  ;;  %v8916_v4 = vpop.f32.mrb[76].mxu1  ;;  %v2319_v28 = vmax.f32 %v1955_v49, 0.0  ;;  %v2321_v52 = vmax.f32 %v2148_v7, 0.0  ;;  %v8918_v26 = vpop.f32.mrb[108].mxu0 }
 0x3ac   :  { %v2578_v2 = vmax.f32 %v2576_v20, %v2577_v24  ;;  %v2598_v46 = vrot.slane %v2597_v27, 2  ;;  %v8920_v14 = vpop.f32.mrb[77].mxu1  ;;  %v2630_v43 = vmax.f32 %v2310_v54, %v2318_v33  ;;  %v2644_v21 = vmax.f32 %v2312_v53, %v2320_v45  ;;  %v8922_v62 = vpop.f32.mrb[109].mxu0 }
 0x3ad   :  { %v2592_v30 = vmax.f32 %v2590_v13, %v2591_v37  ;;  %v2585_v16 = vmax.f32 %v2583_v34, %v2584_v40  ;;  %v8924_v25 = vpop.f32.mrb[78].mxu1  ;;  %v2637_v59 = vmax.f32 %v2311_v35, %v2319_v28  ;;  %v2651_v17 = vmax.f32 %v2313_v31, %v2321_v52  ;;  %v8926_v20 = vpop.f32.mrb[110].mxu0 }
 0x3ae   :  { %v2579_v38 = vrot.slane %v2578_v2, 1  ;;  %v2599_v39 = vmax.f32 %v2597_v27, %v2598_v46  ;;  %v8928_v24 = vpop.f32.mrb[79].mxu1  ;;  %v2631_v6 = vrot.slane %v2630_v43, 4  ;;  %v2645_v63 = vrot.slane %v2644_v21, 4  ;;  %v8930_v13 = vpop.f32.mrb[111].mxu0 }
 0x3af   :  { %v2593_v49 = vrot.slane %v2592_v30, 1  ;;  %v2586_v7 = vrot.slane %v2585_v16, 1  ;;  %v2638_v34 = vrot.slane %v2637_v59, 4  ;;  %v2652_v37 = vrot.slane %v2651_v17, 4 }
 0x3b0   :  { %v2580_v54 = vmax.f32 %v2578_v2, %v2579_v38  ;;  %v2600_v53 = vrot.slane %v2599_v39, 1  ;;  %v2632_v45 = vmax.f32 %v2630_v43, %v2631_v6  ;;  %v2646_v27 = vmax.f32 %v2644_v21, %v2645_v63 }
 0x3b1   :  { %v2594_v40 = vmax.f32 %v2592_v30, %v2593_v49  ;;  %v2587_v33 = vmax.f32 %v2585_v16, %v2586_v7  ;;  %v2639_v46 = vmax.f32 %v2637_v59, %v2638_v34  ;;  %v2653_v28 = vmax.f32 %v2651_v17, %v2652_v37 }
 0x3b2   :  { %v3446_v35 = vpack.c.bf16 %v2580_v54, %v2580_v54  ;;  %v2601_v31 = vmax.f32 %v2599_v39, %v2600_v53  ;;  %v2633_v47 = vrot.slane %v2632_v45, 2  ;;  %v2647_v48 = vrot.slane %v2646_v27, 2 }
 0x3b3   :  { %v3448_v52 = vpack.c.bf16 %v2594_v40, %v2594_v40  ;;  %v3447_v41 = vpack.c.bf16 %v2587_v33, %v2587_v33  ;;  %v8932_v9 = vpop.f32.mrb[80].mxu1  ;;  %v2640_v2 = vrot.slane %v2639_v46, 2  ;;  %v2654_v38 = vrot.slane %v2653_v28, 2  ;;  %v8934_v0 = vpop.f32.mrb[112].mxu0 }
 0x3b4   :  { %v3980_v60 = vunpack.c.l.b16 %v3446_v35  ;;  %v3449_v23 = vpack.c.bf16 %v2601_v31, %v2601_v31  ;;  %v8936_v30 = vpop.f32.mrb[81].mxu1  ;;  %v2634_v16 = vmax.f32 %v2632_v45, %v2633_v47  ;;  %v2648_v43 = vmax.f32 %v2646_v27, %v2647_v48  ;;  %v8938_v21 = vpop.f32.mrb[113].mxu0 }
 0x3b5   :  { %v3982_v6 = vunpack.c.l.b16 %v3448_v52  ;;  %v3981_v63 = vunpack.c.l.b16 %v3447_v41  ;;  %v8940_v39 = vpop.f32.mrb[82].mxu1  ;;  %v2641_v17 = vmax.f32 %v2639_v46, %v2640_v2  ;;  %v2655_v49 = vmax.f32 %v2653_v28, %v2654_v38  ;;  %v8944_v54 = vpop.f32.mrb[114].mxu0 }
 0x3b6   :  { %v3983_v59 = vunpack.c.l.b16 %v3449_v23  ;;  %v1959_v7 = vadd.f32 %v8888_v10, %v8846_v11  ;;  %v8946_v53 = vpop.f32.mrb[83].mxu1  ;;  %v2635_v34 = vrot.slane %v2634_v16, 1  ;;  %v2649_v37 = vrot.slane %v2648_v43, 1  ;;  %v8952_v48 = vpop.f32.mrb[115].mxu0 }
 0x3b7   :  { %v2152_v41 = vadd.f32 %v8894_v32, %v8848_v19  ;;  %v1961_v47 = vadd.f32 %v8896_v12, %v8850_v18  ;;  %9707 = vst [vmem:[#allocation20_spill] sm:$0xff] %v8952_v48  ;;  %v2642_v23 = vrot.slane %v2641_v17, 1  ;;  %v2656_v40 = vrot.slane %v2655_v49, 1 }
 0x3b8   :  { %v2326_v33 = vmax.f32 %v1959_v7, 0.0  ;;  %v2154_v10 = vadd.f32 %v8900_v42, %v8852_v61  ;;  %v2636_v45 = vmax.f32 %v2634_v16, %v2635_v34  ;;  %v2650_v27 = vmax.f32 %v2648_v43, %v2649_v37 }
 0x3b9   :  { %v2328_v35 = vmax.f32 %v2152_v41, 0.0  ;;  %v2327_v31 = vmax.f32 %v1961_v47, 0.0  ;;  %v2643_v46 = vmax.f32 %v2641_v17, %v2642_v23  ;;  %v2657_v28 = vmax.f32 %v2655_v49, %v2656_v40 }
 0x3ba   :  { %v2329_v52 = vmax.f32 %v2154_v10, 0.0  ;;  %v1963_v32 = vadd.f32 %v8902_v36, %v8846_v11  ;;  %v3454_v2 = vpack.c.bf16 %v2636_v45, %v2636_v45  ;;  %v3456_v12 = vpack.c.bf16 %v2650_v27, %v2650_v27 }
 0x3bb   :  { %v2156_v38 = vadd.f32 %v8906_v22, %v8848_v19  ;;  %v1965_v7 = vadd.f32 %v8908_v50, %v8850_v18  ;;  %v8962_v48 = vpop.f32.mrb[84].mxu1  ;;  %v3455_v42 = vpack.c.bf16 %v2643_v46, %v2643_v46  ;;  %v3457_v16 = vpack.c.bf16 %v2657_v28, %v2657_v28  ;;  %v8966_v49 = vpop.f32.mrb[116].mxu0 }
 0x3bc   :  { %v2334_v43 = vmax.f32 %v1963_v32, 0.0  ;;  %v2158_v17 = vadd.f32 %v8910_v29, %v8852_v61  ;;  %v8968_v34 = vpop.f32.mrb[85].mxu1  ;;  %v3988_v36 = vunpack.c.l.b16 %v3454_v2  ;;  %v3990_v37 = vunpack.c.l.b16 %v3456_v12  ;;  %v8970_v22 = vpop.f32.mrb[117].mxu0 }
 0x3bd   :  { %v2336_v41 = vmax.f32 %v2156_v38, 0.0  ;;  %v2335_v47 = vmax.f32 %v1965_v7, 0.0  ;;  %v8972_v23 = vpop.f32.mrb[86].mxu1  ;;  %v3989_v50 = vunpack.c.l.b16 %v3455_v42  ;;  %v3991_v40 = vunpack.c.l.b16 %v3457_v16  ;;  %v8974_v27 = vpop.f32.mrb[118].mxu0 }
 0x3be   :  { %v2686_v10 = vmax.f32 %v2326_v33, %v2334_v43  ;;  %v2337_v45 = vmax.f32 %v2158_v17, 0.0  ;;  %v8976_v46 = vpop.f32.mrb[87].mxu1  ;;  %v8979_v29 = vsel %vm4104_vm1, %v3988_v36, %v3980_v60  ;;  %v8982_v28 = vsel %vm4104_vm1, %v3990_v37, %v3982_v6  ;;  %v8984_v12 = vpop.f32.mrb[119].mxu0 }
 0x3bf   :  { %v2700_v32 = vmax.f32 %v2328_v35, %v2336_v41  ;;  %v2693_v2 = vmax.f32 %v2327_v31, %v2335_v47  ;;  %v8987_v38 = vsel %vm4104_vm1, %v3989_v50, %v3981_v63  ;;  %v8990_v33 = vsel %vm4104_vm1, %v3991_v40, %v3983_v59 }
 0x3c0   :  { %v2687_v7 = vrot.slane %v2686_v10, 4  ;;  %v2707_v42 = vmax.f32 %v2329_v52, %v2337_v45  ;;  %v9708_v60 = vpack.c.bf16 %v8877_v56, %v8877_v56  ;;  %v4179_v6 = vsel %vm4114_vm6, %v8864_v15, %v8838_v57  ;;  %v7282_v56 = vld [vmem:[#allocation5 + $0x200] ss:$16 sps:$4 sm:$0xff]  }
 0x3c1   :  { %v2701_v16 = vrot.slane %v2700_v32, 4  ;;  %v2694_v43 = vrot.slane %v2693_v2, 4  ;;  %v4173_v63 = vsel %vm4116_vm7, %v8890_v5, %v8870_v3  ;;  %v9709_v59 = vpack.c.bf16 %v8879_v51, %v8879_v51 }
 0x3c2   :  { %v4097_v17 = vunpack.c.l.b16 %v9708_v60  ;;  %v2688_v35 = vmax.f32 %v2686_v10, %v2687_v7  ;;  %v2708_v31 = vrot.slane %v2707_v42, 4  ;;  %v4223_v47 = vpack.c.b16 %v4173_v63, %v8706_v58  ;;  %v7285_v10 = vld [vmem:[#allocation5 + $0x208] ss:$16 sps:$4 sm:$0xff]   ;;  %v7290_v7 = vld [vmem:[#allocation5 + $0x224] ss:$16 sps:$4 sm:$0xff]  }
 0x3c3   :  { %v4099_v52 = vunpack.c.l.b16 %v9709_v59  ;;  %v2702_v36 = vmax.f32 %v2700_v32, %v2701_v16  ;;  %v2695_v37 = vmax.f32 %v2693_v2, %v2694_v43  ;;  %v9006_v50 = vpop.f32.mrb[88].mxu1  ;;  %v4193_v3 = vsel %vm4114_vm6, %v8866_v55, %v8841_v44  ;;  %v9012_v51 = vpop.f32.mrb[120].mxu0  ;;  %v7293_v60 = vld [vmem:[#allocation5 + $0x22c] ss:$16 sps:$4 sm:$0xff]   ;;  %v7288_v59 = vld [vmem:[#allocation5 + $0x220] ss:$16 sps:$4 sm:$0xff]  }
 0x3c4   :  { %v4180_v41 = vsel %vm4116_vm7, %v4097_v17, %v4179_v6  ;;  %v2689_v57 = vrot.slane %v2688_v35, 2  ;;  %v2709_v15 = vmax.f32 %v2707_v42, %v2708_v31  ;;  %v9014_v5 = vpop.f32.mrb[89].mxu1  ;;  %v1969_v58 = vadd.f32 %v8916_v4, %v8846_v11  ;;  %v9019_v42 = vpop.f32.mrb[121].mxu0 }
 0x3c5   :  { %v4224_v40 = vpack.c.b16 %v4180_v41, %v8712_v1  ;;  %v2703_v45 = vrot.slane %v2702_v36, 2  ;;  %v2696_v32 = vrot.slane %v2695_v37, 2  ;;  %v4194_v2 = vsel %vm4116_vm7, %v4099_v52, %v4193_v3  ;;  %v9021_v1 = vpop.f32.mrb[90].mxu1  ;;  %v9026_v17 = vpop.f32.mrb[122].mxu0 }
 0x3c6   :  { %v2690_v16 = vmax.f32 %v2688_v35, %v2689_v57  ;;  %v2710_v43 = vrot.slane %v2709_v15, 2  ;;  %v4226_v44 = vpack.c.b16 %v4194_v2, %v8715_v8  ;;  %v2162_v55 = vadd.f32 %v8918_v26, %v8848_v19  ;;  %v9028_v6 = vpop.f32.mrb[91].mxu1  ;;  %v9032_v52 = vpop.f32.mrb[123].mxu0 }
 0x3c7   :  { %5551 = vmatprep.mubr.bf16.mxu1 %v4224_v40  ;;  %5723 = vmatprep.mubr.bf16.mxu0 %v4224_v40  ;;  %v2704_v4 = vmax.f32 %v2702_v36, %v2703_v45  ;;  %v2697_v31 = vmax.f32 %v2695_v37, %v2696_v32  ;;  %v2342_v63 = vmax.f32 %v1969_v58, 0.0  ;;  %v1971_v35 = vadd.f32 %v8920_v14, %v8850_v18  ;;  %v7291_v40 = vld [vmem:[#allocation5 + $0x228] ss:$16 sps:$4 sm:$0xff]   ;;  %v7296_v36 = vld [vmem:[#allocation5 + $0x244] ss:$16 sps:$4 sm:$0xff]  }
 0x3c8   :  { %5552 = vmatmul.mubr.bf16.vlgmr.msra.gmra.mrb[128].mxu1 %v4223_v47  ;;  %5724 = vmatmul.mubr.bf16.vlgmr.msra.gmra.mrb[160].mxu0 %v4223_v47  ;;  %9710 = vst [vmem:[#allocation21_spill] sm:$0xff] %v9032_v52  ;;  %v2691_v8 = vrot.slane %v2690_v16, 1  ;;  %v2711_v41 = vmax.f32 %v2709_v15, %v2710_v43  ;;  %v2344_v26 = vmax.f32 %v2162_v55, 0.0  ;;  %v2164_v57 = vadd.f32 %v8922_v62, %v8852_v61  ;;  %v7299_v45 = vld [vmem:[#allocation5 + $0x24c] ss:$16 sps:$4 sm:$0xff]  }
 0x3c9   :  { %5563 = vmatpush1.bf16.msra.mxu1 %v7282_v56  ;;  %5735 = vmatpush1.bf16.msra.mxu0 %v7285_v10  ;;  %v2705_v37 = vrot.slane %v2704_v4, 1  ;;  %v2698_v3 = vrot.slane %v2697_v31, 1  ;;  %v2343_v47 = vmax.f32 %v1971_v35, 0.0  ;;  %v1973_v14 = vadd.f32 %v8924_v25, %v8846_v11  ;;  %v7297_v55 = vld [vmem:[#allocation5 + $0x248] ss:$16 sps:$4 sm:$0xff]  }
 0x3ca   :  { %5594 = vmatprep.mubr.bf16.mxu1 %v4226_v44  ;;  %5766 = vmatprep.mubr.bf16.mxu0 %v4226_v44  ;;  %v2692_v32 = vmax.f32 %v2690_v16, %v2691_v8  ;;  %v2712_v2 = vrot.slane %v2711_v41, 1  ;;  %v2345_v15 = vmax.f32 %v2164_v57, 0.0  ;;  %v2166_v56 = vadd.f32 %v8926_v20, %v8848_v19  ;;  %v7294_v44 = vld [vmem:[#allocation5 + $0x240] ss:$16 sps:$4 sm:$0xff]  }
 0x3cb   :  { %5564 = vmatprep.subr.bf16.mxu1 %v7290_v7  ;;  %5736 = vmatprep.subr.bf16.mxu0 %v7293_v60  ;;  %v2706_v62 = vmax.f32 %v2704_v4, %v2705_v37  ;;  %v2699_v10 = vmax.f32 %v2697_v31, %v2698_v3  ;;  %v2350_v58 = vmax.f32 %v1973_v14, 0.0  ;;  %v1975_v43 = vadd.f32 %v8928_v24, %v8850_v18  ;;  %v9042_v35 = vpop.f32.mrb[92].mxu1  ;;  %v7302_v60 = vld [vmem:[#allocation5 + $0x264] ss:$16 sps:$4 sm:$0xff]   ;;  %v7305_v37 = vld [vmem:[#allocation5 + $0x26c] ss:$16 sps:$4 sm:$0xff]  }
 0x3cc   :  { %v3462_v25 = vpack.c.bf16 %v2692_v32, %v2692_v32  ;;  %v2713_v52 = vmax.f32 %v2711_v41, %v2712_v2  ;;  %v2352_v16 = vmax.f32 %v2166_v56, 0.0  ;;  %v2168_v7 = vadd.f32 %v8930_v13, %v8852_v61  ;;  %v9046_v20 = vpop.f32.mrb[124].mxu0  ;;  %v9048_v4 = vpop.f32.mrb[93].mxu1 }
 0x3cd   :  { %5565 = vmatpush1.bf16.msra.mxu1 %v7288_v59  ;;  %5737 = vmatpush1.bf16.msra.mxu0 %v7291_v40  ;;  %v3464_v31 = vpack.c.bf16 %v2706_v62, %v2706_v62  ;;  %v3463_v8 = vpack.c.bf16 %v2699_v10, %v2699_v10  ;;  %v2742_v24 = vmax.f32 %v2342_v63, %v2350_v58  ;;  %v2351_v57 = vmax.f32 %v1975_v43, 0.0  ;;  %v9050_v3 = vpop.f32.mrb[125].mxu0  ;;  %v9052_v41 = vpop.f32.mrb[94].mxu1 }
 0x3ce   :  { %5566 = vmatprep.subr.bf16.mxu1 %v7296_v36  ;;  %5738 = vmatprep.subr.bf16.mxu0 %v7299_v45  ;;  %v3996_v59 = vunpack.c.l.b16 %v3462_v25  ;;  %v3465_v40 = vpack.c.bf16 %v2713_v52, %v2713_v52  ;;  %v2756_v14 = vmax.f32 %v2344_v26, %v2352_v16  ;;  %v2353_v13 = vmax.f32 %v2168_v7, 0.0  ;;  %v9054_v32 = vpop.f32.mrb[126].mxu0  ;;  %v9056_v2 = vpop.f32.mrb[95].mxu1  ;;  %v7300_v52 = vld [vmem:[#allocation5 + $0x260] ss:$16 sps:$4 sm:$0xff]  }
 0x3cf   :  { %v3998_v56 = vunpack.c.l.b16 %v3464_v31  ;;  %v3997_v62 = vunpack.c.l.b16 %v3463_v8  ;;  %v2743_v10 = vrot.slane %v2742_v24, 4  ;;  %v2749_v63 = vmax.f32 %v2343_v47, %v2351_v57  ;;  %v9058_v58 = vpop.f32.mrb[127].mxu0  ;;  %v7303_v26 = vld [vmem:[#allocation5 + $0x268] ss:$16 sps:$4 sm:$0xff]   ;;  %v7311_v8 = vld [vmem:[#allocation5 + $0x28c] ss:$16 sps:$4 sm:$0xff]  }
 0x3d0   :  { %9711 = vst [vmem:[#allocation22_spill] sm:$0xff] %v9058_v58  ;;  %v9062_v36 = vsel %vm4106_vm2, %v3996_v59, %v8979_v29  ;;  %v3999_v45 = vunpack.c.l.b16 %v3465_v40  ;;  %v2757_v43 = vrot.slane %v2756_v14, 4  ;;  %v2763_v25 = vmax.f32 %v2345_v15, %v2353_v13  ;;  %v7308_v29 = vld [vmem:[#allocation5 + $0x284] ss:$16 sps:$4 sm:$0xff]   ;;  %v7306_v57 = vld [vmem:[#allocation5 + $0x280] ss:$16 sps:$4 sm:$0xff]  }
 0x3d1   :  { %5567 = vmatpush1.bf16.msra.mxu1 %v7294_v44  ;;  %5739 = vmatpush1.bf16.msra.mxu0 %v7297_v55  ;;  %v9066_v16 = vsel %vm4106_vm2, %v3998_v56, %v8982_v28  ;;  %v9070_v47 = vsel %vm4106_vm2, %v3997_v62, %v8987_v38  ;;  %v2744_v7 = vmax.f32 %v2742_v24, %v2743_v10  ;;  %v2750_v31 = vrot.slane %v2749_v63, 4  ;;  %v7309_v24 = vld [vmem:[#allocation5 + $0x288] ss:$16 sps:$4 sm:$0xff]  }
 0x3d2   :  { %9712 = vst [vmem:[#allocation23_spill] sm:$0xff] %v9070_v47  ;;  %5568 = vmatprep.subr.bf16.mxu1 %v7302_v60  ;;  %5740 = vmatprep.subr.bf16.mxu0 %v7305_v37  ;;  %v9074_v15 = vsel %vm4106_vm2, %v3999_v45, %v8990_v33  ;;  %v2758_v44 = vmax.f32 %v2756_v14, %v2757_v43  ;;  %v2764_v55 = vrot.slane %v2763_v25, 4  ;;  %v7314_v37 = vld [vmem:[#allocation5 + $0x2a4] ss:$16 sps:$4 sm:$0xff]  }
 0x3d3   :  { %9713 = vst [vmem:[#allocation24_spill] sm:$0xff] %v9074_v15  ;;  %v1979_v28 = vadd.f32 %v8932_v9, %v8846_v11  ;;  %v2745_v59 = vrot.slane %v2744_v7, 2  ;;  %v2751_v40 = vmax.f32 %v2749_v63, %v2750_v31  ;;  %v2172_v38 = vadd.f32 %v8934_v0, %v8848_v19  ;;  %v9082_v13 = vpop.f32.mrb[96].mxu1  ;;  %v7317_v9 = vld [vmem:[#allocation5 + $0x2ac] ss:$16 sps:$4 sm:$0xff]  }
 0x3d4   :  { %v1981_v60 = vadd.f32 %v8936_v30, %v8850_v18  ;;  %9714 = vst [vmem:[#allocation25_spill] sm:$0xff] %v9082_v13  ;;  %v2759_v33 = vrot.slane %v2758_v44, 2  ;;  %v2765_v56 = vmax.f32 %v2763_v25, %v2764_v55  ;;  %v2174_v62 = vadd.f32 %v8938_v21, %v8852_v61  ;;  %v9086_v10 = vpop.f32.mrb[128].mxu0  ;;  %v9088_v63 = vpop.f32.mrb[97].mxu1 }
 0x3d5   :  { %v2358_v14 = vmax.f32 %v1979_v28, 0.0  ;;  %5569 = vmatpush1.bf16.msra.mxu1 %v7300_v52  ;;  %5741 = vmatpush1.bf16.msra.mxu0 %v7303_v26  ;;  %9715 = vst [vmem:[#allocation26_spill] sm:$0xff] %v9086_v10  ;;  %9716 = vst [vmem:[#allocation27_spill] sm:$0xff] %v9088_v63  ;;  %v2746_v0 = vmax.f32 %v2744_v7, %v2745_v59  ;;  %v2752_v45 = vrot.slane %v2751_v40, 2  ;;  %v2360_v30 = vmax.f32 %v2172_v38, 0.0  ;;  %v9090_v31 = vpop.f32.mrb[129].mxu0 }
 0x3d6   :  { %v2359_v43 = vmax.f32 %v1981_v60, 0.0  ;;  %5570 = vmatprep.subr.bf16.mxu1 %v7308_v29  ;;  %5742 = vmatprep.subr.bf16.mxu0 %v7311_v8  ;;  %9717 = vst [vmem:[#allocation28_spill] sm:$0xff] %v9090_v31  ;;  %v9092_v25 = vpop.f32.mrb[98].mxu1  ;;  %v2760_v55 = vmax.f32 %v2758_v44, %v2759_v33  ;;  %v2766_v28 = vrot.slane %v2765_v56, 2  ;;  %v2361_v21 = vmax.f32 %v2174_v62, 0.0  ;;  %v9096_v26 = vpop.f32.mrb[130].mxu0 }
 0x3d7   :  { %9718 = vst [vmem:[#allocation29_spill] sm:$0xff] %v9092_v25  ;;  %v1983_v52 = vadd.f32 %v8940_v39, %v8846_v11  ;;  %9719 = vst [vmem:[#allocation30_spill] sm:$0xff] %v9096_v26  ;;  %v9098_v15 = vpop.f32.mrb[99].mxu1  ;;  %v2747_v7 = vrot.slane %v2746_v0, 1  ;;  %v2753_v59 = vmax.f32 %v2751_v40, %v2752_v45  ;;  %v2176_v29 = vadd.f32 %v8944_v54, %v8848_v19  ;;  %v7312_v38 = vld [vmem:[#allocation5 + $0x2a0] ss:$16 sps:$4 sm:$0xff]  }
 0x3d8   :  { %9720 = vst [vmem:[#allocation31_spill] sm:$0xff] %v9098_v15  ;;  %v1985_v8 = vadd.f32 %v8946_v53, %v8850_v18  ;;  %v9104_v60 = vpop.f32.mrb[131].mxu0  ;;  %v2761_v44 = vrot.slane %v2760_v55, 1  ;;  %v2767_v33 = vmax.f32 %v2765_v56, %v2766_v28  ;;  %v9722_v39 = vld [vmem:[#allocation20_spill] sm:$0xff]  ;;  %v7315_v15 = vld [vmem:[#allocation5 + $0x2a8] ss:$16 sps:$4 sm:$0xff]  }
 0x3d9   :  { %9721 = vst [vmem:[#allocation32_spill] sm:$0xff] %v9104_v60  ;;  %v2366_v62 = vmax.f32 %v1983_v52, 0.0  ;;  %v2178_v47 = vadd.f32 %v9722_v39, %v8852_v61  ;;  %5571 = vmatpush1.bf16.msra.mxu1 %v7306_v57  ;;  %5743 = vmatpush1.bf16.msra.mxu0 %v7309_v24  ;;  %v7320_v26 = vld [vmem:[#allocation5 + $0x2c4] ss:$16 sps:$4 sm:$0xff]   ;;  %v2748_v40 = vmax.f32 %v2746_v0, %v2747_v7  ;;  %v2754_v45 = vrot.slane %v2753_v59, 1 }
 0x3da   :  { %v2368_v25 = vmax.f32 %v2176_v29, 0.0  ;;  %v2367_v54 = vmax.f32 %v1985_v8, 0.0  ;;  %5572 = vmatprep.subr.bf16.mxu1 %v7314_v37  ;;  %5744 = vmatprep.subr.bf16.mxu0 %v7317_v9  ;;  %v7323_v53 = vld [vmem:[#allocation5 + $0x2cc] ss:$16 sps:$4 sm:$0xff]   ;;  %v2762_v31 = vmax.f32 %v2760_v55, %v2761_v44  ;;  %v2768_v63 = vrot.slane %v2767_v33, 1 }
 0x3db   :  { %v2798_v60 = vmax.f32 %v2358_v14, %v2366_v62  ;;  %v2369_v10 = vmax.f32 %v2178_v47, 0.0  ;;  %v3470_v56 = vpack.c.bf16 %v2748_v40, %v2748_v40  ;;  %v2755_v28 = vmax.f32 %v2753_v59, %v2754_v45  ;;  %v7318_v39 = vld [vmem:[#allocation5 + $0x2c0] ss:$16 sps:$4 sm:$0xff]   ;;  %v7321_v57 = vld [vmem:[#allocation5 + $0x2c8] ss:$16 sps:$4 sm:$0xff]   ;;  %v9108_v24 = vpop.f32.mrb[100].mxu1 }
 0x3dc   :  { %v2812_v52 = vmax.f32 %v2360_v30, %v2368_v25  ;;  %v2805_v13 = vmax.f32 %v2359_v43, %v2367_v54  ;;  %v3472_v58 = vpack.c.bf16 %v2762_v31, %v2762_v31  ;;  %v2769_v0 = vmax.f32 %v2767_v33, %v2768_v63  ;;  %v7326_v37 = vld [vmem:[#allocation5 + $0x2e4] ss:$16 sps:$4 sm:$0xff]   ;;  %v9110_v9 = vpop.f32.mrb[132].mxu0  ;;  %v9112_v55 = vpop.f32.mrb[101].mxu1  ;;  %v7329_v43 = vld [vmem:[#allocation5 + $0x2ec] ss:$16 sps:$4 sm:$0xff]  }
 0x3dd   :  { %v2799_v7 = vrot.slane %v2798_v60, 4  ;;  %v2819_v29 = vmax.f32 %v2361_v21, %v2369_v10  ;;  %5573 = vmatpush1.bf16.msra.mxu1 %v7312_v38  ;;  %5745 = vmatpush1.bf16.msra.mxu0 %v7315_v15  ;;  %v4004_v47 = vunpack.c.l.b16 %v3470_v56  ;;  %v3471_v14 = vpack.c.bf16 %v2755_v28, %v2755_v28  ;;  %v9114_v25 = vpop.f32.mrb[133].mxu0  ;;  %v9116_v31 = vpop.f32.mrb[102].mxu1  ;;  %v7327_v56 = vld [vmem:[#allocation5 + $0x2e8] ss:$16 sps:$4 sm:$0xff]  }
 0x3de   :  { %v2813_v59 = vrot.slane %v2812_v52, 4  ;;  %v2806_v30 = vrot.slane %v2805_v13, 4  ;;  %5574 = vmatprep.subr.bf16.mxu1 %v7320_v26  ;;  %5746 = vmatprep.subr.bf16.mxu0 %v7323_v53  ;;  %v4006_v63 = vunpack.c.l.b16 %v3472_v58  ;;  %v3473_v10 = vpack.c.bf16 %v2769_v0, %v2769_v0  ;;  %v9118_v8 = vpop.f32.mrb[134].mxu0  ;;  %v9120_v38 = vpop.f32.mrb[103].mxu1  ;;  %v7324_v53 = vld [vmem:[#allocation5 + $0x2e0] ss:$16 sps:$4 sm:$0xff]  }
 0x3df   :  { %v2800_v21 = vmax.f32 %v2798_v60, %v2799_v7  ;;  %v2820_v15 = vrot.slane %v2819_v29, 4  ;;  %v9124_v44 = vsel %vm4108_vm3, %v4004_v47, %v9062_v36  ;;  %v9126_v33 = vunpack.c.l.b16 %v3471_v14  ;;  %v9128_v40 = vpop.f32.mrb[135].mxu0  ;;  %v7335_v0 = vld [vmem:[#allocation5 + $0x30c] ss:$16 sps:$4 sm:$0xff]  }
 0x3e0   :  { %v2814_v26 = vmax.f32 %v2812_v52, %v2813_v59  ;;  %v2807_v62 = vmax.f32 %v2805_v13, %v2806_v30  ;;  %v9132_v58 = vsel %vm4108_vm3, %v4006_v63, %v9066_v16  ;;  %v9134_v60 = vunpack.c.l.b16 %v3473_v10  ;;  %v7332_v16 = vld [vmem:[#allocation5 + $0x304] ss:$16 sps:$4 sm:$0xff]   ;;  %v7333_v63 = vld [vmem:[#allocation5 + $0x308] ss:$16 sps:$4 sm:$0xff]  }
 0x3e1   :  { %9723 = vst [vmem:[#allocation20_spill] sm:$0xff] %v9126_v33  ;;  %v2801_v45 = vrot.slane %v2800_v21, 2  ;;  %v2821_v54 = vmax.f32 %v2819_v29, %v2820_v15  ;;  %5575 = vmatpush1.bf16.msra.mxu1 %v7318_v39  ;;  %5747 = vmatpush1.bf16.msra.mxu0 %v7321_v57  ;;  %v1989_v52 = vadd.f32 %v8962_v48, %v8846_v11  ;;  %v7330_v29 = vld [vmem:[#allocation5 + $0x300] ss:$16 sps:$4 sm:$0xff]  }
 0x3e2   :  { %9724 = vst [vmem:[#allocation33_spill] sm:$0xff] %v9134_v60  ;;  %v2815_v36 = vrot.slane %v2814_v26, 2  ;;  %v2808_v28 = vrot.slane %v2807_v62, 2  ;;  %v2182_v13 = vadd.f32 %v8966_v49, %v8848_v19  ;;  %5576 = vmatprep.subr.bf16.mxu1 %v7326_v37  ;;  %5748 = vmatprep.subr.bf16.mxu0 %v7329_v43  ;;  %v1991_v39 = vadd.f32 %v8968_v34, %v8850_v18 }
 0x3e3   :  { %v2802_v7 = vmax.f32 %v2800_v21, %v2801_v45  ;;  %v2822_v47 = vrot.slane %v2821_v54, 2  ;;  %v2184_v57 = vadd.f32 %v8970_v22, %v8852_v61  ;;  %v2374_v30 = vmax.f32 %v1989_v52, 0.0  ;;  %v9144_v10 = vpop.f32.mrb[104].mxu1 }
 0x3e4   :  { %v2816_v14 = vmax.f32 %v2814_v26, %v2815_v36  ;;  %v2809_v59 = vmax.f32 %v2807_v62, %v2808_v28  ;;  %v2376_v48 = vmax.f32 %v2182_v13, 0.0  ;;  %v2375_v43 = vmax.f32 %v1991_v39, 0.0  ;;  %v9146_v21 = vpop.f32.mrb[136].mxu0  ;;  %v9148_v34 = vpop.f32.mrb[105].mxu1  ;;  %v7338_v36 = vld [vmem:[#allocation5 + $0x324] ss:$16 sps:$4 sm:$0xff]  }
 0x3e5   :  { %v2803_v49 = vrot.slane %v2802_v7, 1  ;;  %v2823_v37 = vmax.f32 %v2821_v54, %v2822_v47  ;;  %v2377_v15 = vmax.f32 %v2184_v57, 0.0  ;;  %5577 = vmatpush1.bf16.msra.mxu1 %v7324_v53  ;;  %5749 = vmatpush1.bf16.msra.mxu0 %v7327_v56  ;;  %9725 = vst [vmem:[#allocation34_spill] sm:$0xff] %v9146_v21  ;;  %9726 = vst [vmem:[#allocation35_spill] sm:$0xff] %v9148_v34  ;;  %v9154_v54 = vpop.f32.mrb[137].mxu0  ;;  %v9156_v28 = vpop.f32.mrb[106].mxu1 }
 0x3e6   :  { %v2817_v45 = vrot.slane %v2816_v14, 1  ;;  %v2810_v22 = vrot.slane %v2809_v59, 1  ;;  %v1993_v26 = vadd.f32 %v8972_v23, %v8846_v11  ;;  %v2186_v62 = vadd.f32 %v8974_v27, %v8848_v19  ;;  %5578 = vmatprep.subr.bf16.mxu1 %v7332_v16  ;;  %5750 = vmatprep.subr.bf16.mxu0 %v7335_v0  ;;  %9727 = vst [vmem:[#allocation36_spill] sm:$0xff] %v9154_v54  ;;  %v7341_v47 = vld [vmem:[#allocation5 + $0x32c] ss:$16 sps:$4 sm:$0xff]   ;;  %v9162_v23 = vpop.f32.mrb[138].mxu0 }
 0x3e7   :  { %9728 = vst [vmem:[#allocation37_spill] sm:$0xff] %v9156_v28  ;;  %v2804_v53 = vmax.f32 %v2802_v7, %v2803_v49  ;;  %v2824_v56 = vrot.slane %v2823_v37, 1  ;;  %v1995_v52 = vadd.f32 %v8976_v46, %v8850_v18  ;;  %v2188_v13 = vadd.f32 %v8984_v12, %v8852_v61  ;;  %9729 = vst [vmem:[#allocation38_spill] sm:$0xff] %v9162_v23  ;;  %v9164_v39 = vpop.f32.mrb[107].mxu1  ;;  %v9166_v60 = vpop.f32.mrb[139].mxu0 }
 0x3e8   :  { %9730 = vst [vmem:[#allocation39_spill] sm:$0xff] %v9164_v39  ;;  %v2818_v27 = vmax.f32 %v2816_v14, %v2817_v45  ;;  %v2811_v16 = vmax.f32 %v2809_v59, %v2810_v22  ;;  %v2382_v0 = vmax.f32 %v1993_v26, 0.0  ;;  %v2384_v57 = vmax.f32 %v2186_v62, 0.0  ;;  %v7336_v46 = vld [vmem:[#allocation5 + $0x320] ss:$16 sps:$4 sm:$0xff]  }
 0x3e9   :  { %v3478_v33 = vpack.c.bf16 %v2804_v53, %v2804_v53  ;;  %v2825_v7 = vmax.f32 %v2823_v37, %v2824_v56  ;;  %v2383_v49 = vmax.f32 %v1995_v52, 0.0  ;;  %v2385_v28 = vmax.f32 %v2188_v13, 0.0  ;;  %5579 = vmatpush1.bf16.msra.mxu1 %v7330_v29  ;;  %5751 = vmatpush1.bf16.msra.mxu0 %v7333_v63  ;;  %v7339_v54 = vld [vmem:[#allocation5 + $0x328] ss:$16 sps:$4 sm:$0xff]   ;;  %v7344_v39 = vld [vmem:[#allocation5 + $0x344] ss:$16 sps:$4 sm:$0xff]  }
 0x3ea   :  { %v3480_v12 = vpack.c.bf16 %v2818_v27, %v2818_v27  ;;  %v3479_v34 = vpack.c.bf16 %v2811_v16, %v2811_v16  ;;  %v2854_v21 = vmax.f32 %v2374_v30, %v2382_v0  ;;  %v2868_v23 = vmax.f32 %v2376_v48, %v2384_v57  ;;  %5580 = vmatprep.subr.bf16.mxu1 %v7338_v36  ;;  %v7347_v26 = vld [vmem:[#allocation5 + $0x34c] ss:$16 sps:$4 sm:$0xff]   ;;  %v7342_v63 = vld [vmem:[#allocation5 + $0x340] ss:$16 sps:$4 sm:$0xff]  }
 0x3eb   :  { %v4012_v14 = vunpack.c.l.b16 %v3478_v33  ;;  %v3481_v59 = vpack.c.bf16 %v2825_v7, %v2825_v7  ;;  %v2861_v45 = vmax.f32 %v2375_v43, %v2383_v49  ;;  %v2875_v22 = vmax.f32 %v2377_v15, %v2385_v28  ;;  %5752 = vmatprep.subr.bf16.mxu0 %v7341_v47  ;;  %v9170_v56 = vpop.f32.mrb[108].mxu1  ;;  %v7345_v43 = vld [vmem:[#allocation5 + $0x348] ss:$16 sps:$4 sm:$0xff]   ;;  %v7350_v47 = vld [vmem:[#allocation5 + $0x364] ss:$16 sps:$4 sm:$0xff]  }
 0x3ec   :  { %v4014_v62 = vunpack.c.l.b16 %v3480_v12  ;;  %v9168_v37 = vunpack.c.l.b16 %v3479_v34  ;;  %v2855_v53 = vrot.slane %v2854_v21, 4  ;;  %v2869_v29 = vrot.slane %v2868_v23, 4  ;;  %v9178_v15 = vpop.f32.mrb[140].mxu0  ;;  %v9180_v34 = vpop.f32.mrb[109].mxu1  ;;  %v7353_v27 = vld [vmem:[#allocation5 + $0x36c] ss:$16 sps:$4 sm:$0xff]  }
 0x3ed   :  { %v9174_v30 = vsel %vm4110_vm4, %v4012_v14, %v9124_v44  ;;  %v9176_v48 = vunpack.c.l.b16 %v3481_v59  ;;  %v2862_v33 = vrot.slane %v2861_v45, 4  ;;  %v2876_v36 = vrot.slane %v2875_v22, 4  ;;  %5581 = vmatpush1.bf16.msra.mxu1 %v7336_v46  ;;  %5753 = vmatpush1.bf16.msra.mxu0 %v7339_v54  ;;  %v9188_v16 = vpop.f32.mrb[141].mxu0  ;;  %v9190_v54 = vpop.f32.mrb[110].mxu1  ;;  %v7348_v12 = vld [vmem:[#allocation5 + $0x360] ss:$16 sps:$4 sm:$0xff]  }
 0x3ee   :  { %9731 = vst [vmem:[#allocation40_spill] sm:$0xff] %v9168_v37  ;;  %9732 = vst [vmem:[#allocation41_spill] sm:$0xff] %v9174_v30  ;;  %v9184_v28 = vsel %vm4110_vm4, %v4014_v62, %v9132_v58  ;;  %v2856_v52 = vmax.f32 %v2854_v21, %v2855_v53  ;;  %v2870_v13 = vmax.f32 %v2868_v23, %v2869_v29  ;;  %5582 = vmatprep.subr.bf16.mxu1 %v7344_v39  ;;  %v9196_v21 = vpop.f32.mrb[142].mxu0  ;;  %v9198_v23 = vpop.f32.mrb[111].mxu1 }
 0x3ef   :  { %9733 = vst [vmem:[#allocation42_spill] sm:$0xff] %v9176_v48  ;;  %9734 = vst [vmem:[#allocation43_spill] sm:$0xff] %v9184_v28  ;;  %v1999_v44 = vadd.f32 %v9006_v50, %v8846_v11  ;;  %v2863_v0 = vmax.f32 %v2861_v45, %v2862_v33  ;;  %v2877_v57 = vmax.f32 %v2875_v22, %v2876_v36  ;;  %5754 = vmatprep.subr.bf16.mxu0 %v7347_v26  ;;  %v9202_v14 = vpop.f32.mrb[143].mxu0  ;;  %v7356_v33 = vld [vmem:[#allocation5 + $0x384] ss:$16 sps:$4 sm:$0xff]  }
 0x3f0   :  { %v2192_v7 = vadd.f32 %v9012_v51, %v8848_v19  ;;  %v2001_v58 = vadd.f32 %v9014_v5, %v8850_v18  ;;  %v2857_v50 = vrot.slane %v2856_v52, 2  ;;  %v2871_v39 = vrot.slane %v2870_v13, 2  ;;  %v7351_v5 = vld [vmem:[#allocation5 + $0x368] ss:$16 sps:$4 sm:$0xff]  }
 0x3f1   :  { %v2390_v49 = vmax.f32 %v1999_v44, 0.0  ;;  %v2194_v46 = vadd.f32 %v9019_v42, %v8852_v61  ;;  %v2864_v59 = vrot.slane %v2863_v0, 2  ;;  %v2878_v45 = vrot.slane %v2877_v57, 2  ;;  %5583 = vmatpush1.bf16.msra.mxu1 %v7342_v63  ;;  %5755 = vmatpush1.bf16.msra.mxu0 %v7345_v43  ;;  %v7359_v42 = vld [vmem:[#allocation5 + $0x38c] ss:$16 sps:$4 sm:$0xff]  }
 0x3f2   :  { %v2392_v51 = vmax.f32 %v2192_v7, 0.0  ;;  %v2391_v22 = vmax.f32 %v2001_v58, 0.0  ;;  %v2858_v26 = vmax.f32 %v2856_v52, %v2857_v50  ;;  %v2872_v62 = vmax.f32 %v2870_v13, %v2871_v39  ;;  %5584 = vmatprep.subr.bf16.mxu1 %v7350_v47  ;;  %5756 = vmatprep.subr.bf16.mxu0 %v7353_v27  ;;  %v7354_v43 = vld [vmem:[#allocation5 + $0x380] ss:$16 sps:$4 sm:$0xff]   ;;  %v7357_v7 = vld [vmem:[#allocation5 + $0x388] ss:$16 sps:$4 sm:$0xff]  }
 0x3f3   :  { %v2393_v53 = vmax.f32 %v2194_v46, 0.0  ;;  %v2003_v29 = vadd.f32 %v9021_v1, %v8846_v11  ;;  %v2865_v36 = vmax.f32 %v2863_v0, %v2864_v59  ;;  %v2879_v44 = vmax.f32 %v2877_v57, %v2878_v45  ;;  %v9735_v50 = vld [vmem:[#allocation21_spill] sm:$0xff]  ;;  %v7362_v47 = vld [vmem:[#allocation5 + $0x3a4] ss:$16 sps:$4 sm:$0xff]   ;;  %v9212_v27 = vpop.f32.mrb[112].mxu1 }
 0x3f4   :  { %v2196_v28 = vadd.f32 %v9026_v17, %v8848_v19  ;;  %v2005_v63 = vadd.f32 %v9028_v6, %v8850_v18  ;;  %v2859_v52 = vrot.slane %v2858_v26, 1  ;;  %v2873_v13 = vrot.slane %v2872_v62, 1  ;;  %9736 = vst [vmem:[#allocation21_spill] sm:$0xff] %v9212_v27  ;;  %v9214_v17 = vpop.f32.mrb[144].mxu0  ;;  %v9216_v6 = vpop.f32.mrb[113].mxu1 }
 0x3f5   :  { %v2398_v58 = vmax.f32 %v2003_v29, 0.0  ;;  %v2198_v1 = vadd.f32 %v9735_v50, %v8852_v61  ;;  %v2866_v39 = vrot.slane %v2865_v36, 1  ;;  %v2880_v0 = vrot.slane %v2879_v44, 1  ;;  %5585 = vmatpush1.bf16.msra.mxu1 %v7348_v12  ;;  %5757 = vmatpush1.bf16.msra.mxu0 %v7351_v5  ;;  %9737 = vst [vmem:[#allocation44_spill] sm:$0xff] %v9214_v17  ;;  %9738 = vst [vmem:[#allocation45_spill] sm:$0xff] %v9216_v6  ;;  %v9218_v30 = vpop.f32.mrb[145].mxu0 }
 0x3f6   :  { %v2400_v57 = vmax.f32 %v2196_v28, 0.0  ;;  %v2399_v46 = vmax.f32 %v2005_v63, 0.0  ;;  %v2860_v59 = vmax.f32 %v2858_v26, %v2859_v52  ;;  %v2874_v45 = vmax.f32 %v2872_v62, %v2873_v13  ;;  %5586 = vmatprep.subr.bf16.mxu1 %v7356_v33  ;;  %5758 = vmatprep.subr.bf16.mxu0 %v7359_v42  ;;  %v7365_v50 = vld [vmem:[#allocation5 + $0x3ac] ss:$16 sps:$4 sm:$0xff]   ;;  %v9220_v37 = vpop.f32.mrb[114].mxu1  ;;  %v9222_v5 = vpop.f32.mrb[146].mxu0 }
 0x3f7   :  { %v2910_v48 = vmax.f32 %v2390_v49, %v2398_v58  ;;  %v2401_v29 = vmax.f32 %v2198_v1, 0.0  ;;  %v2867_v27 = vmax.f32 %v2865_v36, %v2866_v39  ;;  %v2881_v28 = vmax.f32 %v2879_v44, %v2880_v0  ;;  %v9224_v17 = vpop.f32.mrb[115].mxu1  ;;  %v9226_v52 = vpop.f32.mrb[147].mxu0  ;;  %v7360_v36 = vld [vmem:[#allocation5 + $0x3a0] ss:$16 sps:$4 sm:$0xff]  }
 0x3f8   :  { %v2924_v63 = vmax.f32 %v2392_v51, %v2400_v57  ;;  %v2917_v12 = vmax.f32 %v2391_v22, %v2399_v46  ;;  %v3486_v6 = vpack.c.bf16 %v2860_v59, %v2860_v59  ;;  %v3488_v26 = vpack.c.bf16 %v2874_v45, %v2874_v45  ;;  %v7363_v44 = vld [vmem:[#allocation5 + $0x3a8] ss:$16 sps:$4 sm:$0xff]   ;;  %v7368_v0 = vld [vmem:[#allocation5 + $0x3c4] ss:$16 sps:$4 sm:$0xff]  }
 0x3f9   :  { %v2911_v62 = vrot.slane %v2910_v48, 4  ;;  %v2931_v49 = vmax.f32 %v2393_v53, %v2401_v29  ;;  %v3487_v33 = vpack.c.bf16 %v2867_v27, %v2867_v27  ;;  %v3489_v42 = vpack.c.bf16 %v2881_v28, %v2881_v28  ;;  %5587 = vmatpush1.bf16.msra.mxu1 %v7354_v43  ;;  %5759 = vmatpush1.bf16.msra.mxu0 %v7357_v7  ;;  %v7371_v53 = vld [vmem:[#allocation5 + $0x3cc] ss:$16 sps:$4 sm:$0xff]   ;;  %v7366_v43 = vld [vmem:[#allocation5 + $0x3c0] ss:$16 sps:$4 sm:$0xff]  }
 0x3fa   :  { %v2925_v13 = vrot.slane %v2924_v63, 4  ;;  %v2918_v58 = vrot.slane %v2917_v12, 4  ;;  %v9228_v51 = vunpack.c.l.b16 %v3486_v6  ;;  %v9230_v22 = vunpack.c.l.b16 %v3488_v26  ;;  %5588 = vmatprep.subr.bf16.mxu1 %v7362_v47  ;;  %5760 = vmatprep.subr.bf16.mxu0 %v7365_v50  ;;  %v7369_v29 = vld [vmem:[#allocation5 + $0x3c8] ss:$16 sps:$4 sm:$0xff]   ;;  %v7374_v47 = vld [vmem:[#allocation5 + $0x3e4] ss:$16 sps:$4 sm:$0xff]  }
 0x3fb   :  { %v2912_v1 = vmax.f32 %v2910_v48, %v2911_v62  ;;  %v2932_v39 = vrot.slane %v2931_v49, 4  ;;  %v9232_v57 = vunpack.c.l.b16 %v3487_v33  ;;  %v9234_v27 = vunpack.c.l.b16 %v3489_v42  ;;  %v9240_v50 = vpop.f32.mrb[116].mxu1 }
 0x3fc   :  { %9739 = vst [vmem:[#allocation46_spill] sm:$0xff] %v9228_v51  ;;  %9740 = vst [vmem:[#allocation47_spill] sm:$0xff] %v9230_v22  ;;  %v2926_v46 = vmax.f32 %v2924_v63, %v2925_v13  ;;  %v2919_v59 = vmax.f32 %v2917_v12, %v2918_v58  ;;  %v2009_v6 = vadd.f32 %v9042_v35, %v8846_v11  ;;  %v7377_v12 = vld [vmem:[#allocation5 + $0x3ec] ss:$16 sps:$4 sm:$0xff]   ;;  %v9248_v35 = vpop.f32.mrb[117].mxu1 }
 0x3fd   :  { %9741 = vst [vmem:[#allocation48_spill] sm:$0xff] %v9232_v57  ;;  %9742 = vst [vmem:[#allocation49_spill] sm:$0xff] %v9234_v27  ;;  %v2913_v7 = vrot.slane %v2912_v1, 2  ;;  %v2933_v45 = vmax.f32 %v2931_v49, %v2932_v39  ;;  %v2202_v48 = vadd.f32 %v9046_v20, %v8848_v19  ;;  %v2011_v62 = vadd.f32 %v9048_v4, %v8850_v18  ;;  %v9246_v49 = vpop.f32.mrb[148].mxu0  ;;  %v9252_v39 = vpop.f32.mrb[118].mxu1 }
 0x3fe   :  { %v2927_v28 = vrot.slane %v2926_v46, 2  ;;  %v2920_v26 = vrot.slane %v2919_v59, 2  ;;  %v2204_v63 = vadd.f32 %v9050_v3, %v8852_v61  ;;  %5589 = vmatpush1.bf16.msra.mxu1 %v7360_v36  ;;  %5761 = vmatpush1.bf16.msra.mxu0 %v7363_v44  ;;  %9743 = vst [vmem:[#allocation50_spill] sm:$0xff] %v9246_v49  ;;  %9744 = vst [vmem:[#allocation51_spill] sm:$0xff] %v9248_v35  ;;  %v2406_v42 = vmax.f32 %v2009_v6, 0.0  ;;  %v9250_v58 = vpop.f32.mrb[149].mxu0 }
 0x3ff   :  { %v2914_v20 = vmax.f32 %v2912_v1, %v2913_v7  ;;  %v2934_v33 = vrot.slane %v2933_v45, 2  ;;  %v2408_v13 = vmax.f32 %v2202_v48, 0.0  ;;  %5590 = vmatprep.subr.bf16.mxu1 %v7368_v0  ;;  %5762 = vmatprep.subr.bf16.mxu0 %v7371_v53  ;;  %9745 = vst [vmem:[#allocation52_spill] sm:$0xff] %v9250_v58  ;;  %9746 = vst [vmem:[#allocation53_spill] sm:$0xff] %v9252_v39  ;;  %v2407_v3 = vmax.f32 %v2011_v62, 0.0  ;;  %v9254_v44 = vpop.f32.mrb[150].mxu0 }
 0x400   :  { %v2928_v4 = vmax.f32 %v2926_v46, %v2927_v28  ;;  %v2921_v22 = vmax.f32 %v2919_v59, %v2920_v26  ;;  %v2409_v36 = vmax.f32 %v2204_v63, 0.0  ;;  %9747 = vst [vmem:[#allocation54_spill] sm:$0xff] %v9254_v44  ;;  %v9256_v27 = vpop.f32.mrb[119].mxu1  ;;  %v2013_v1 = vadd.f32 %v9052_v41, %v8846_v11  ;;  %v9262_v53 = vpop.f32.mrb[151].mxu0  ;;  %v9750_v59 = vld [vmem:[#allocation22_spill] sm:$0xff] }
 0x401   :  { %9748 = vst [vmem:[#allocation55_spill] sm:$0xff] %v9256_v27  ;;  %v2915_v51 = vrot.slane %v2914_v20, 1  ;;  %v2935_v57 = vmax.f32 %v2933_v45, %v2934_v33  ;;  %v2206_v0 = vadd.f32 %v9054_v32, %v8848_v19  ;;  %9749 = vst [vmem:[#allocation56_spill] sm:$0xff] %v9262_v53  ;;  %v2015_v46 = vadd.f32 %v9056_v2, %v8850_v18  ;;  %v7372_v28 = vld [vmem:[#allocation5 + $0x3e0] ss:$16 sps:$4 sm:$0xff]  }
 0x402   :  { %v2929_v7 = vrot.slane %v2928_v4, 1  ;;  %v2922_v6 = vrot.slane %v2921_v22, 1  ;;  %v2208_v48 = vadd.f32 %v9750_v59, %v8852_v61  ;;  %5591 = vmatpush1.bf16.msra.mxu1 %v7366_v43  ;;  %5763 = vmatpush1.bf16.msra.mxu0 %v7369_v29  ;;  %v7375_v45 = vld [vmem:[#allocation5 + $0x3e8] ss:$16 sps:$4 sm:$0xff]   ;;  %v2414_v41 = vmax.f32 %v2013_v1, 0.0 }
 0x403   :  { %v2916_v26 = vmax.f32 %v2914_v20, %v2915_v51  ;;  %v2936_v62 = vrot.slane %v2935_v57, 1  ;;  %v2416_v63 = vmax.f32 %v2206_v0, 0.0  ;;  %5592 = vmatprep.subr.bf16.mxu1 %v7374_v47  ;;  %5764 = vmatprep.subr.bf16.mxu0 %v7377_v12  ;;  %v7380_v32 = vld [vmem:[#allocation5 + $0x404] ss:$16 sps:$4 sm:$0xff]   ;;  %v2415_v27 = vmax.f32 %v2015_v46, 0.0  ;;  %v9268_v43 = vpop.f32.mrb[120].mxu1 }
 0x404   :  { %v2930_v33 = vmax.f32 %v2928_v4, %v2929_v7  ;;  %v2923_v53 = vmax.f32 %v2921_v22, %v2922_v6  ;;  %v2417_v44 = vmax.f32 %v2208_v48, 0.0  ;;  %v7383_v39 = vld [vmem:[#allocation5 + $0x40c] ss:$16 sps:$4 sm:$0xff]   ;;  %v2966_v35 = vmax.f32 %v2406_v42, %v2414_v41  ;;  %v9270_v1 = vpop.f32.mrb[152].mxu0  ;;  %v9272_v47 = vpop.f32.mrb[121].mxu1 }
 0x405   :  { %v3494_v2 = vpack.c.bf16 %v2916_v26, %v2916_v26  ;;  %v2937_v58 = vmax.f32 %v2935_v57, %v2936_v62  ;;  %v2980_v59 = vmax.f32 %v2408_v13, %v2416_v63  ;;  %v2973_v51 = vmax.f32 %v2407_v3, %v2415_v27  ;;  %v9276_v57 = vpop.f32.mrb[153].mxu0  ;;  %v9278_v42 = vpop.f32.mrb[122].mxu1  ;;  %v9757_v46 = vld [vmem:[#allocation25_spill] sm:$0xff] }
 0x406   :  { %v3496_v29 = vpack.c.bf16 %v2930_v33, %v2930_v33  ;;  %v3495_v49 = vpack.c.bf16 %v2923_v53, %v2923_v53  ;;  %v2987_v20 = vmax.f32 %v2409_v36, %v2417_v44  ;;  %5593 = vmatpush1.bf16.msra.mxu1 %v7372_v28  ;;  %v2967_v4 = vrot.slane %v2966_v35, 4  ;;  %5765 = vmatpush1.bf16.msra.mxu0 %v7375_v45  ;;  %v9284_v44 = vpop.f32.mrb[154].mxu0  ;;  %v9286_v53 = vpop.f32.mrb[123].mxu1 }
 0x407   :  { %v9274_v12 = vunpack.c.l.b16 %v3494_v2  ;;  %v3497_v22 = vpack.c.bf16 %v2937_v58, %v2937_v58  ;;  %v2981_v0 = vrot.slane %v2980_v59, 4  ;;  %5605 = vmatprep.subr.bf16.mxu1 %v7380_v32  ;;  %v2974_v3 = vrot.slane %v2973_v51, 4  ;;  %5777 = vmatprep.subr.bf16.mxu0 %v7383_v39  ;;  %9754 = vst [vmem:[#allocation59_spill] sm:$0xff] %v9284_v44  ;;  %9755 = vst [vmem:[#allocation60_spill] sm:$0xff] %v9286_v53  ;;  %v9292_v28 = vpop.f32.mrb[155].mxu0  ;;  %v9760_v39 = vld [vmem:[#allocation27_spill] sm:$0xff] }
 0x408   :  { %v9280_v13 = vunpack.c.l.b16 %v3496_v29  ;;  %v9282_v27 = vunpack.c.l.b16 %v3495_v49  ;;  %v2988_v36 = vrot.slane %v2987_v20, 4  ;;  %v2968_v7 = vmax.f32 %v2966_v35, %v2967_v4  ;;  %9758 = vst [vmem:[#allocation25_spill] sm:$0xff] %v9292_v28  ;;  %v9759_v49 = vld [vmem:[#allocation26_spill] sm:$0xff]  ;;  %v9761_v2 = vld [vmem:[#allocation28_spill] sm:$0xff] }
 0x409   :  { %9751 = vst [vmem:[#allocation22_spill] sm:$0xff] %v9274_v12  ;;  %v9288_v58 = vunpack.c.l.b16 %v3497_v22  ;;  %v2982_v6 = vmax.f32 %v2980_v59, %v2981_v0  ;;  %v2019_v48 = vadd.f32 %v9757_v46, %v8846_v11  ;;  %v2975_v45 = vmax.f32 %v2973_v51, %v2974_v3 }
 0x40a   :  { %9752 = vst [vmem:[#allocation57_spill] sm:$0xff] %v9280_v13  ;;  %9753 = vst [vmem:[#allocation58_spill] sm:$0xff] %v9282_v27  ;;  %v2989_v26 = vmax.f32 %v2987_v20, %v2988_v36  ;;  %v2212_v62 = vadd.f32 %v9759_v49, %v8848_v19  ;;  %v2021_v41 = vadd.f32 %v9760_v39, %v8850_v18  ;;  %v2969_v63 = vrot.slane %v2968_v7, 2  ;;  %v9762_v20 = vld [vmem:[#allocation29_spill] sm:$0xff]  ;;  %v9764_v13 = vld [vmem:[#allocation30_spill] sm:$0xff] }
 0x40b   :  { %9756 = vst [vmem:[#allocation61_spill] sm:$0xff] %v9288_v58  ;;  %v2983_v32 = vrot.slane %v2982_v6, 2  ;;  %v2422_v33 = vmax.f32 %v2019_v48, 0.0  ;;  %v2214_v35 = vadd.f32 %v9761_v2, %v8852_v61  ;;  %v2976_v59 = vrot.slane %v2975_v45, 2  ;;  %v9302_v36 = vpop.f32.mrb[124].mxu1  ;;  %v9765_v58 = vld [vmem:[#allocation31_spill] sm:$0xff] }
 0x40c   :  { %v2990_v29 = vrot.slane %v2989_v26, 2  ;;  %v2424_v22 = vmax.f32 %v2212_v62, 0.0  ;;  %v2423_v4 = vmax.f32 %v2021_v41, 0.0  ;;  %v2970_v0 = vmax.f32 %v2968_v7, %v2969_v63  ;;  %9763 = vst [vmem:[#allocation26_spill] sm:$0xff] %v9302_v36  ;;  %v9308_v12 = vpop.f32.mrb[156].mxu0  ;;  %v9310_v62 = vpop.f32.mrb[125].mxu1 }
 0x40d   :  { %v2984_v46 = vmax.f32 %v2982_v6, %v2983_v32  ;;  %v2425_v51 = vmax.f32 %v2214_v35, 0.0  ;;  %v2023_v3 = vadd.f32 %v9762_v20, %v8846_v11  ;;  %v2977_v49 = vmax.f32 %v2975_v45, %v2976_v59  ;;  %9766 = vst [vmem:[#allocation27_spill] sm:$0xff] %v9308_v12  ;;  %9767 = vst [vmem:[#allocation28_spill] sm:$0xff] %v9310_v62  ;;  %v9768_v63 = vld [vmem:[#allocation32_spill] sm:$0xff]  ;;  %v9314_v35 = vpop.f32.mrb[157].mxu0  ;;  %v9316_v45 = vpop.f32.mrb[126].mxu1 }
 0x40e   :  { %v2991_v39 = vmax.f32 %v2989_v26, %v2990_v29  ;;  %v2216_v48 = vadd.f32 %v9764_v13, %v8848_v19  ;;  %v2025_v2 = vadd.f32 %v9765_v58, %v8850_v18  ;;  %v2971_v7 = vrot.slane %v2970_v0, 1  ;;  %9769 = vst [vmem:[#allocation29_spill] sm:$0xff] %v9314_v35  ;;  %9770 = vst [vmem:[#allocation30_spill] sm:$0xff] %v9316_v45  ;;  %v9318_v20 = vpop.f32.mrb[158].mxu0  ;;  %v9320_v58 = vpop.f32.mrb[127].mxu1 }
 0x40f   :  { %v2985_v6 = vrot.slane %v2984_v46, 1  ;;  %v2430_v41 = vmax.f32 %v2023_v3, 0.0  ;;  %v2218_v32 = vadd.f32 %v9768_v63, %v8852_v61  ;;  %v2978_v26 = vrot.slane %v2977_v49, 1  ;;  %9771 = vst [vmem:[#allocation31_spill] sm:$0xff] %v9318_v20  ;;  %v9322_v3 = vpop.f32.mrb[159].mxu0 }
 0x410   :  { %v2992_v59 = vrot.slane %v2991_v39, 1  ;;  %v2432_v13 = vmax.f32 %v2216_v48, 0.0  ;;  %v2431_v29 = vmax.f32 %v2025_v2, 0.0  ;;  %v2972_v27 = vmax.f32 %v2970_v0, %v2971_v7  ;;  %9772 = vst [vmem:[#allocation32_spill] sm:$0xff] %v9322_v3 }
 0x411   :  { %v2986_v62 = vmax.f32 %v2984_v46, %v2985_v6  ;;  %v3022_v12 = vmax.f32 %v2422_v33, %v2430_v41  ;;  %v2433_v36 = vmax.f32 %v2218_v32, 0.0  ;;  %v9324_v28 = vmax.f32 %v2977_v49, %v2978_v26 }
 0x412   :  { %v9326_v63 = vmax.f32 %v2991_v39, %v2992_v59  ;;  %v3036_v35 = vmax.f32 %v2424_v22, %v2432_v13  ;;  %v3029_v45 = vmax.f32 %v2423_v4, %v2431_v29  ;;  %v3502_v53 = vpack.c.bf16 %v2972_v27, %v2972_v27 }
 0x413   :  { %9773 = vst [vmem:[#allocation62_spill] sm:$0xff] %v9324_v28  ;;  %v3504_v44 = vpack.c.bf16 %v2986_v62, %v2986_v62  ;;  %v3023_v48 = vrot.slane %v3022_v12, 4  ;;  %v3043_v2 = vmax.f32 %v2425_v51, %v2433_v36  ;;  %v2029_v27 = vadd.f32 %v9108_v24, %v8846_v11 }
 0x414   :  { %9774 = vst [vmem:[#allocation63_spill] sm:$0xff] %v9326_v63  ;;  %v3037_v33 = vrot.slane %v3036_v35, 4  ;;  %v3030_v46 = vrot.slane %v3029_v45, 4  ;;  %v9332_v7 = vunpack.c.l.b16 %v3502_v53  ;;  %v2222_v51 = vadd.f32 %v9110_v9, %v8848_v19 }
 0x415   :  { %v9334_v49 = vunpack.c.l.b16 %v3504_v44  ;;  %v3024_v39 = vmax.f32 %v3022_v12, %v3023_v48  ;;  %v3044_v6 = vrot.slane %v3043_v2, 4  ;;  %v2031_v41 = vadd.f32 %v9112_v55, %v8850_v18 }
 0x416   :  { %9775 = vst [vmem:[#allocation64_spill] sm:$0xff] %v9332_v7  ;;  %v3038_v22 = vmax.f32 %v3036_v35, %v3037_v33  ;;  %v3031_v4 = vmax.f32 %v3029_v45, %v3030_v46  ;;  %v2224_v53 = vadd.f32 %v9114_v25, %v8852_v61  ;;  %v2438_v12 = vmax.f32 %v2029_v27, 0.0 }
 0x417   :  { %9776 = vst [vmem:[#allocation65_spill] sm:$0xff] %v9334_v49  ;;  %v3025_v36 = vrot.slane %v3024_v39, 2  ;;  %v3045_v62 = vmax.f32 %v3043_v2, %v3044_v6  ;;  %v2440_v26 = vmax.f32 %v2222_v51, 0.0  ;;  %v2439_v59 = vmax.f32 %v2031_v41, 0.0 }
 0x418   :  { %v3039_v44 = vrot.slane %v3038_v22, 2  ;;  %v3032_v32 = vrot.slane %v3031_v4, 2  ;;  %v2441_v13 = vmax.f32 %v2224_v53, 0.0  ;;  %v2033_v9 = vadd.f32 %v9116_v31, %v8846_v11 }
 0x419   :  { %v3026_v35 = vmax.f32 %v3024_v39, %v3025_v36  ;;  %v3046_v45 = vrot.slane %v3045_v62, 2  ;;  %v2226_v48 = vadd.f32 %v9118_v8, %v8848_v19  ;;  %v2035_v25 = vadd.f32 %v9120_v38, %v8850_v18 }
 0x41a   :  { %v3040_v24 = vmax.f32 %v3038_v22, %v3039_v44  ;;  %v3033_v29 = vmax.f32 %v3031_v4, %v3032_v32  ;;  %v2228_v33 = vadd.f32 %v9128_v40, %v8852_v61  ;;  %v2446_v6 = vmax.f32 %v2033_v9, 0.0 }
 0x41b   :  { %v3027_v55 = vrot.slane %v3026_v35, 1  ;;  %v3047_v2 = vmax.f32 %v3045_v62, %v3046_v45  ;;  %v2448_v27 = vmax.f32 %v2226_v48, 0.0  ;;  %v2447_v51 = vmax.f32 %v2035_v25, 0.0 }
 0x41c   :  { %v3041_v46 = vrot.slane %v3040_v24, 1  ;;  %v3034_v39 = vrot.slane %v3033_v29, 1  ;;  %v2449_v36 = vmax.f32 %v2228_v33, 0.0  ;;  %v3078_v53 = vmax.f32 %v2438_v12, %v2446_v6 }
 0x41d   :  { %v3028_v22 = vmax.f32 %v3026_v35, %v3027_v55  ;;  %v3048_v4 = vrot.slane %v3047_v2, 1  ;;  %v3092_v8 = vmax.f32 %v2440_v26, %v2448_v27  ;;  %v3085_v32 = vmax.f32 %v2439_v59, %v2447_v51 }
 0x41e   :  { %v3042_v31 = vmax.f32 %v3040_v24, %v3041_v46  ;;  %v3035_v41 = vmax.f32 %v3033_v29, %v3034_v39  ;;  %v3099_v45 = vmax.f32 %v2441_v13, %v2449_v36  ;;  %v3079_v20 = vrot.slane %v3078_v53, 4  ;;  %v9778_v39 = vld [vmem:[#allocation35_spill] sm:$0xff] }
 0x41f   :  { %v3510_v44 = vpack.c.bf16 %v3028_v22, %v3028_v22  ;;  %v3049_v62 = vmax.f32 %v3047_v2, %v3048_v4  ;;  %v3093_v40 = vrot.slane %v3092_v8, 4  ;;  %v3086_v9 = vrot.slane %v3085_v32, 4  ;;  %v9777_v2 = vld [vmem:[#allocation34_spill] sm:$0xff] }
 0x420   :  { %v3512_v38 = vpack.c.bf16 %v3042_v31, %v3042_v31  ;;  %v3511_v0 = vpack.c.bf16 %v3035_v41, %v3035_v41  ;;  %v3100_v48 = vrot.slane %v3099_v45, 4  ;;  %v3080_v25 = vmax.f32 %v3078_v53, %v3079_v20  ;;  %v9779_v20 = vld [vmem:[#allocation36_spill] sm:$0xff] }
 0x421   :  { %v4044_v49 = vunpack.c.l.b16 %v3510_v44  ;;  %v3513_v63 = vpack.c.bf16 %v3049_v62, %v3049_v62  ;;  %v3094_v33 = vmax.f32 %v3092_v8, %v3093_v40  ;;  %v3087_v29 = vmax.f32 %v3085_v32, %v3086_v9  ;;  %v9780_v8 = vld [vmem:[#allocation37_spill] sm:$0xff]  ;;  %v9782_v40 = vld [vmem:[#allocation39_spill] sm:$0xff] }
 0x422   :  { %v4046_v35 = vunpack.c.l.b16 %v3512_v38  ;;  %v4045_v55 = vunpack.c.l.b16 %v3511_v0  ;;  %v3101_v12 = vmax.f32 %v3099_v45, %v3100_v48  ;;  %v2039_v26 = vadd.f32 %v9144_v10, %v8846_v11  ;;  %v9781_v45 = vld [vmem:[#allocation38_spill] sm:$0xff] }
 0x423   :  { %v4047_v24 = vunpack.c.l.b16 %v3513_v63  ;;  %v3081_v59 = vrot.slane %v3080_v25, 2  ;;  %v3095_v13 = vrot.slane %v3094_v33, 2  ;;  %v2232_v46 = vadd.f32 %v9777_v2, %v8848_v19 }
 0x424   :  { %v2041_v6 = vadd.f32 %v9778_v39, %v8850_v18  ;;  %v3088_v27 = vrot.slane %v3087_v29, 2  ;;  %v3102_v22 = vrot.slane %v3101_v12, 2  ;;  %v2454_v4 = vmax.f32 %v2039_v26, 0.0 }
 0x425   :  { %v2234_v0 = vadd.f32 %v9779_v20, %v8852_v61  ;;  %v3082_v63 = vmax.f32 %v3080_v25, %v3081_v59  ;;  %v3096_v51 = vmax.f32 %v3094_v33, %v3095_v13  ;;  %v2456_v36 = vmax.f32 %v2232_v46, 0.0 }
 0x426   :  { %v2455_v31 = vmax.f32 %v2041_v6, 0.0  ;;  %v3089_v41 = vmax.f32 %v3087_v29, %v3088_v27  ;;  %v3103_v10 = vmax.f32 %v3101_v12, %v3102_v22  ;;  %v2043_v44 = vadd.f32 %v9780_v8, %v8846_v11 }
 0x427   :  { %v2457_v53 = vmax.f32 %v2234_v0, 0.0  ;;  %v3083_v62 = vrot.slane %v3082_v63, 1  ;;  %v3097_v32 = vrot.slane %v3096_v51, 1  ;;  %v2236_v38 = vadd.f32 %v9781_v45, %v8848_v19 }
 0x428   :  { %v2045_v9 = vadd.f32 %v9782_v40, %v8850_v18  ;;  %v3090_v48 = vrot.slane %v3089_v41, 1  ;;  %v3104_v26 = vrot.slane %v3103_v10, 1  ;;  %v2462_v25 = vmax.f32 %v2043_v44, 0.0 }
 0x429   :  { %v2238_v33 = vadd.f32 %v9166_v60, %v8852_v61  ;;  %v3084_v29 = vmax.f32 %v3082_v63, %v3083_v62  ;;  %v3098_v12 = vmax.f32 %v3096_v51, %v3097_v32  ;;  %v2464_v59 = vmax.f32 %v2236_v38, 0.0 }
 0x42a   :  { %v2463_v13 = vmax.f32 %v2045_v9, 0.0  ;;  %v3091_v2 = vmax.f32 %v3089_v41, %v3090_v48  ;;  %v3105_v46 = vmax.f32 %v3103_v10, %v3104_v26  ;;  %v3134_v39 = vmax.f32 %v2454_v4, %v2462_v25  ;;  %v9783_v25 = vld [vmem:[#allocation17_spill] sm:$0xff] }
 0x42b   :  { %v2465_v6 = vmax.f32 %v2238_v33, 0.0  ;;  %v3518_v27 = vpack.c.bf16 %v3084_v29, %v3084_v29  ;;  %v3520_v22 = vpack.c.bf16 %v3098_v12, %v3098_v12  ;;  %v3148_v20 = vmax.f32 %v2456_v36, %v2464_v59  ;;  %v9784_v33 = vld [vmem:[#allocation18_spill] sm:$0xff]  ;;  %v9785_v29 = vld [vmem:[#allocation19_spill] sm:$0xff] }
 0x42c   :  { %v3141_v0 = vmax.f32 %v2455_v31, %v2463_v13  ;;  %v3519_v8 = vpack.c.bf16 %v3091_v2, %v3091_v2  ;;  %v3521_v45 = vpack.c.bf16 %v3105_v46, %v3105_v46  ;;  %v3135_v40 = vrot.slane %v3134_v39, 4  ;;  %v7378_v12 = vld [vmem:[#allocation5 + $0x400] ss:$16 sps:$4 sm:$0xff]   ;;  %v7381_v59 = vld [vmem:[#allocation5 + $0x408] ss:$16 sps:$4 sm:$0xff]  }
 0x42d   :  { %v3155_v7 = vmax.f32 %v2457_v53, %v2465_v6  ;;  %v4052_v44 = vunpack.c.l.b16 %v3518_v27  ;;  %v4054_v28 = vunpack.c.l.b16 %v3520_v22  ;;  %v3149_v3 = vrot.slane %v3148_v20, 4  ;;  %v9786_v2 = vld [vmem:[#allocation16_spill] sm:$0xff]  ;;  %v7389_v27 = vld [vmem:[#allocation5 + $0x42c] ss:$16 sps:$4 sm:$0xff]  }
 0x42e   :  { %v3142_v60 = vrot.slane %v3141_v0, 4  ;;  %v4053_v63 = vunpack.c.l.b16 %v3519_v8  ;;  %v4055_v51 = vunpack.c.l.b16 %v3521_v45  ;;  %v3136_v62 = vmax.f32 %v3134_v39, %v3135_v40  ;;  %v7386_v6 = vld [vmem:[#allocation5 + $0x424] ss:$16 sps:$4 sm:$0xff]  }
 0x42f   :  { %v3156_v32 = vrot.slane %v3155_v7, 4  ;;  %v9369_v41 = vsel %vm4104_vm1, %v4052_v44, %v4044_v49  ;;  %v9372_v4 = vsel %vm4104_vm1, %v4054_v28, %v4046_v35  ;;  %v3150_v36 = vmax.f32 %v3148_v20, %v3149_v3 }
 0x430   :  { %v3143_v31 = vmax.f32 %v3141_v0, %v3142_v60  ;;  %v9375_v10 = vsel %vm4104_vm1, %v4053_v63, %v4045_v55  ;;  %v9378_v53 = vsel %vm4104_vm1, %v4055_v51, %v4047_v24  ;;  %v3137_v38 = vrot.slane %v3136_v62, 2  ;;  %v7384_v51 = vld [vmem:[#allocation5 + $0x420] ss:$16 sps:$4 sm:$0xff]  }
 0x431   :  { %v3157_v9 = vmax.f32 %v3155_v7, %v3156_v32  ;;  %v3151_v48 = vrot.slane %v3150_v36, 2  ;;  %v4186_v49 = vsel %vm4114_vm6, %v9784_v33, %v9783_v25  ;;  %v2049_v28 = vadd.f32 %v9170_v56, %v8846_v11 }
 0x432   :  { %v3144_v26 = vrot.slane %v3143_v31, 2  ;;  %v3138_v35 = vmax.f32 %v3136_v62, %v3137_v38  ;;  %v4187_v55 = vsel %vm4116_vm7, %v9785_v29, %v4186_v49  ;;  %v2242_v24 = vadd.f32 %v9178_v15, %v8848_v19  ;;  %v7387_v62 = vld [vmem:[#allocation5 + $0x428] ss:$16 sps:$4 sm:$0xff]  }
 0x433   :  { %v3158_v3 = vrot.slane %v3157_v9, 2  ;;  %v3152_v7 = vmax.f32 %v3150_v36, %v3151_v48  ;;  %v4225_v46 = vpack.c.b16 %v4187_v55, %v9786_v2  ;;  %v2470_v39 = vmax.f32 %v2049_v28, 0.0 }
 0x434   :  { %v3145_v13 = vmax.f32 %v3143_v31, %v3144_v26  ;;  %v3139_v22 = vrot.slane %v3138_v35, 1  ;;  %v2472_v56 = vmax.f32 %v2242_v24, 0.0  ;;  %v2051_v0 = vadd.f32 %v9180_v34, %v8850_v18 }
 0x435   :  { %v3159_v20 = vmax.f32 %v3157_v9, %v3158_v3  ;;  %v3153_v8 = vrot.slane %v3152_v7, 1  ;;  %5595 = vmatmul.mubr.bf16.vlgmr.msra.gmra.mrb[128].mxu1 %v4225_v46  ;;  %5767 = vmatmul.mubr.bf16.vlgmr.msra.gmra.mrb[160].mxu0 %v4225_v46  ;;  %v2244_v15 = vadd.f32 %v9188_v16, %v8852_v61  ;;  %v2053_v40 = vadd.f32 %v9190_v54, %v8846_v11  ;;  %v7392_v16 = vld [vmem:[#allocation5 + $0x444] ss:$16 sps:$4 sm:$0xff]   ;;  %v7395_v9 = vld [vmem:[#allocation5 + $0x44c] ss:$16 sps:$4 sm:$0xff]  }
 0x436   :  { %v3146_v45 = vrot.slane %v3145_v13, 1  ;;  %v3140_v44 = vmax.f32 %v3138_v35, %v3139_v22  ;;  %5606 = vmatpush1.bf16.msra.mxu1 %v7378_v12  ;;  %5778 = vmatpush1.bf16.msra.mxu0 %v7381_v59  ;;  %v2471_v63 = vmax.f32 %v2051_v0, 0.0  ;;  %v2246_v34 = vadd.f32 %v9196_v21, %v8848_v19  ;;  %v7390_v12 = vld [vmem:[#allocation5 + $0x440] ss:$16 sps:$4 sm:$0xff]   ;;  %v7393_v59 = vld [vmem:[#allocation5 + $0x448] ss:$16 sps:$4 sm:$0xff]  }
 0x437   :  { %v3160_v60 = vrot.slane %v3159_v20, 1  ;;  %v3154_v32 = vmax.f32 %v3152_v7, %v3153_v8  ;;  %v2473_v31 = vmax.f32 %v2244_v15, 0.0  ;;  %5607 = vmatprep.subr.bf16.mxu1 %v7386_v6  ;;  %5779 = vmatprep.subr.bf16.mxu0 %v7389_v27  ;;  %v2478_v38 = vmax.f32 %v2053_v40, 0.0  ;;  %v7401_v46 = vld [vmem:[#allocation5 + $0x46c] ss:$16 sps:$4 sm:$0xff]  }
 0x438   :  { %v3147_v36 = vmax.f32 %v3145_v13, %v3146_v45  ;;  %v3526_v48 = vpack.c.bf16 %v3140_v44, %v3140_v44  ;;  %v2480_v26 = vmax.f32 %v2246_v34, 0.0  ;;  %v2055_v25 = vadd.f32 %v9198_v23, %v8850_v18  ;;  %v7398_v23 = vld [vmem:[#allocation5 + $0x464] ss:$16 sps:$4 sm:$0xff]   ;;  %v9787_v15 = vld [vmem:[#allocation21_spill] sm:$0xff]  ;;  %v7396_v44 = vld [vmem:[#allocation5 + $0x460] ss:$16 sps:$4 sm:$0xff]  }
 0x439   :  { %v3161_v54 = vmax.f32 %v3159_v20, %v3160_v60  ;;  %v3528_v33 = vpack.c.bf16 %v3154_v32, %v3154_v32  ;;  %v3190_v28 = vmax.f32 %v2470_v39, %v2478_v38  ;;  %v2248_v21 = vadd.f32 %v9202_v14, %v8852_v61  ;;  %v7407_v32 = vld [vmem:[#allocation5 + $0x48c] ss:$16 sps:$4 sm:$0xff]  }
 0x43a   :  { %v3527_v49 = vpack.c.bf16 %v3147_v36, %v3147_v36  ;;  %v4060_v35 = vunpack.c.l.b16 %v3526_v48  ;;  %v3204_v29 = vmax.f32 %v2472_v56, %v2480_v26  ;;  %5608 = vmatpush1.bf16.msra.mxu1 %v7384_v51  ;;  %5780 = vmatpush1.bf16.msra.mxu0 %v7387_v62  ;;  %v2479_v55 = vmax.f32 %v2055_v25, 0.0  ;;  %v9789_v62 = vld [vmem:[#allocation45_spill] sm:$0xff] }
 0x43b   :  { %v3529_v3 = vpack.c.bf16 %v3161_v54, %v3161_v54  ;;  %v4062_v24 = vunpack.c.l.b16 %v3528_v33  ;;  %v3191_v13 = vrot.slane %v3190_v28, 4  ;;  %v2481_v2 = vmax.f32 %v2248_v21, 0.0  ;;  %5609 = vmatprep.subr.bf16.mxu1 %v7392_v16  ;;  %5781 = vmatprep.subr.bf16.mxu0 %v7395_v9  ;;  %v7402_v21 = vld [vmem:[#allocation5 + $0x480] ss:$16 sps:$4 sm:$0xff]  }
 0x43c   :  { %v4061_v7 = vunpack.c.l.b16 %v3527_v49  ;;  %v9404_v39 = vsel %vm4106_vm2, %v4060_v35, %v9369_v41  ;;  %v3205_v6 = vrot.slane %v3204_v29, 4  ;;  %v3197_v27 = vmax.f32 %v2471_v63, %v2479_v55  ;;  %v7405_v35 = vld [vmem:[#allocation5 + $0x488] ss:$16 sps:$4 sm:$0xff]  }
 0x43d   :  { %v4063_v14 = vunpack.c.l.b16 %v3529_v3  ;;  %v9408_v22 = vsel %vm4106_vm2, %v4062_v24, %v9372_v4  ;;  %v3192_v56 = vmax.f32 %v3190_v28, %v3191_v13  ;;  %v3211_v0 = vmax.f32 %v2473_v31, %v2481_v2  ;;  %v7399_v4 = vld [vmem:[#allocation5 + $0x468] ss:$16 sps:$4 sm:$0xff]  }
 0x43e   :  { %v9412_v20 = vsel %vm4106_vm2, %v4061_v7, %v9375_v10  ;;  %v3206_v45 = vmax.f32 %v3204_v29, %v3205_v6  ;;  %v3198_v41 = vrot.slane %v3197_v27, 4  ;;  %5610 = vmatpush1.bf16.msra.mxu1 %v7390_v12  ;;  %5782 = vmatpush1.bf16.msra.mxu0 %v7393_v59  ;;  %v2059_v40 = vadd.f32 %v9787_v15, %v8846_v11  ;;  %v9788_v10 = vld [vmem:[#allocation44_spill] sm:$0xff]  ;;  %v7413_v59 = vld [vmem:[#allocation5 + $0x4ac] ss:$16 sps:$4 sm:$0xff]  }
 0x43f   :  { %v9416_v8 = vsel %vm4106_vm2, %v4063_v14, %v9378_v53  ;;  %v3193_v60 = vrot.slane %v3192_v56, 2  ;;  %v3212_v63 = vrot.slane %v3211_v0, 4  ;;  %v2252_v51 = vadd.f32 %v9788_v10, %v8848_v19  ;;  %5611 = vmatprep.subr.bf16.mxu1 %v7398_v23  ;;  %5783 = vmatprep.subr.bf16.mxu0 %v7401_v46  ;;  %v7404_v53 = vld [vmem:[#allocation5 + $0x484] ss:$16 sps:$4 sm:$0xff]   ;;  %v7419_v10 = vld [vmem:[#allocation5 + $0x4cc] ss:$16 sps:$4 sm:$0xff]  }
 0x440   :  { %v2061_v34 = vadd.f32 %v9789_v62, %v8850_v18  ;;  %v3207_v36 = vrot.slane %v3206_v45, 2  ;;  %v3199_v31 = vmax.f32 %v3197_v27, %v3198_v41  ;;  %v2486_v38 = vmax.f32 %v2059_v40, 0.0  ;;  %v7410_v12 = vld [vmem:[#allocation5 + $0x4a4] ss:$16 sps:$4 sm:$0xff]  }
 0x441   :  { %v2254_v16 = vadd.f32 %v9218_v30, %v8852_v61  ;;  %v3194_v9 = vmax.f32 %v3192_v56, %v3193_v60  ;;  %v3213_v48 = vmax.f32 %v3211_v0, %v3212_v63  ;;  %v2488_v54 = vmax.f32 %v2252_v51, 0.0  ;;  %v7411_v0 = vld [vmem:[#allocation5 + $0x4a8] ss:$16 sps:$4 sm:$0xff]  }
 0x442   :  { %v2487_v26 = vmax.f32 %v2061_v34, 0.0  ;;  %v3208_v25 = vmax.f32 %v3206_v45, %v3207_v36  ;;  %v3200_v33 = vrot.slane %v3199_v31, 2  ;;  %v2063_v28 = vadd.f32 %v9220_v37, %v8846_v11  ;;  %5612 = vmatpush1.bf16.msra.mxu1 %v7396_v44  ;;  %5784 = vmatpush1.bf16.msra.mxu0 %v7399_v4  ;;  %v7416_v44 = vld [vmem:[#allocation5 + $0x4c4] ss:$16 sps:$4 sm:$0xff]  }
 0x443   :  { %v2489_v49 = vmax.f32 %v2254_v16, 0.0  ;;  %v3195_v3 = vrot.slane %v3194_v9, 1  ;;  %v3214_v29 = vrot.slane %v3213_v48, 2  ;;  %v2256_v55 = vadd.f32 %v9222_v5, %v8848_v19  ;;  %5613 = vmatprep.subr.bf16.mxu1 %v7404_v53  ;;  %5785 = vmatprep.subr.bf16.mxu0 %v7407_v32  ;;  %v7414_v16 = vld [vmem:[#allocation5 + $0x4c0] ss:$16 sps:$4 sm:$0xff]  }
 0x444   :  { %v2065_v30 = vadd.f32 %v9224_v17, %v8850_v18  ;;  %v3209_v24 = vrot.slane %v3208_v25, 1  ;;  %v3201_v7 = vmax.f32 %v3199_v31, %v3200_v33  ;;  %v2494_v13 = vmax.f32 %v2063_v28, 0.0  ;;  %v7408_v17 = vld [vmem:[#allocation5 + $0x4a0] ss:$16 sps:$4 sm:$0xff]   ;;  %v7422_v33 = vld [vmem:[#allocation5 + $0x4e4] ss:$16 sps:$4 sm:$0xff]  }
 0x445   :  { %v2258_v37 = vadd.f32 %v9226_v52, %v8852_v61  ;;  %v3196_v2 = vmax.f32 %v3194_v9, %v3195_v3  ;;  %v3215_v23 = vmax.f32 %v3213_v48, %v3214_v29  ;;  %v2496_v46 = vmax.f32 %v2256_v55, 0.0  ;;  %v7417_v9 = vld [vmem:[#allocation5 + $0x4c8] ss:$16 sps:$4 sm:$0xff]  }
 0x446   :  { %v2495_v14 = vmax.f32 %v2065_v30, 0.0  ;;  %v3210_v6 = vmax.f32 %v3208_v25, %v3209_v24  ;;  %v3202_v27 = vrot.slane %v3201_v7, 1  ;;  %v3246_v5 = vmax.f32 %v2486_v38, %v2494_v13  ;;  %5614 = vmatpush1.bf16.msra.mxu1 %v7402_v21  ;;  %5786 = vmatpush1.bf16.msra.mxu0 %v7405_v35  ;;  %v9790_v24 = vld [vmem:[#allocation50_spill] sm:$0xff] }
 0x447   :  { %v2497_v56 = vmax.f32 %v2258_v37, 0.0  ;;  %v3534_v45 = vpack.c.bf16 %v3196_v2, %v3196_v2  ;;  %v3216_v41 = vrot.slane %v3215_v23, 1  ;;  %v3260_v15 = vmax.f32 %v2488_v54, %v2496_v46  ;;  %5615 = vmatprep.subr.bf16.mxu1 %v7410_v12  ;;  %5787 = vmatprep.subr.bf16.mxu0 %v7413_v59  ;;  %v7420_v37 = vld [vmem:[#allocation5 + $0x4e0] ss:$16 sps:$4 sm:$0xff]   ;;  %v7423_v2 = vld [vmem:[#allocation5 + $0x4e8] ss:$16 sps:$4 sm:$0xff]  }
 0x448   :  { %v3253_v40 = vmax.f32 %v2487_v26, %v2495_v14  ;;  %v3536_v52 = vpack.c.bf16 %v3210_v6, %v3210_v6  ;;  %v3203_v4 = vmax.f32 %v3201_v7, %v3202_v27  ;;  %v3247_v60 = vrot.slane %v3246_v5, 4  ;;  %v9792_v6 = vld [vmem:[#allocation52_spill] sm:$0xff] }
 0x449   :  { %v3267_v63 = vmax.f32 %v2489_v49, %v2497_v56  ;;  %v4068_v51 = vunpack.c.l.b16 %v3534_v45  ;;  %v3217_v62 = vmax.f32 %v3215_v23, %v3216_v41  ;;  %v3261_v34 = vrot.slane %v3260_v15, 4  ;;  %v7425_v49 = vld [vmem:[#allocation5 + $0x4ec] ss:$16 sps:$4 sm:$0xff]  }
 0x44a   :  { %v3254_v53 = vrot.slane %v3253_v40, 4  ;;  %v4070_v32 = vunpack.c.l.b16 %v3536_v52  ;;  %v3535_v36 = vpack.c.bf16 %v3203_v4, %v3203_v4  ;;  %v3248_v31 = vmax.f32 %v3246_v5, %v3247_v60  ;;  %5616 = vmatpush1.bf16.msra.mxu1 %v7408_v17  ;;  %5788 = vmatpush1.bf16.msra.mxu0 %v7411_v0  ;;  %v7431_v5 = vld [vmem:[#allocation5 + $0x50c] ss:$16 sps:$4 sm:$0xff]  }
 0x44b   :  { %v3268_v38 = vrot.slane %v3267_v63, 4  ;;  %v9436_v48 = vsel %vm4108_vm3, %v4068_v51, %v9404_v39  ;;  %v3537_v54 = vpack.c.bf16 %v3217_v62, %v3217_v62  ;;  %v3262_v26 = vmax.f32 %v3260_v15, %v3261_v34  ;;  %5617 = vmatprep.subr.bf16.mxu1 %v7416_v44  ;;  %5789 = vmatprep.subr.bf16.mxu0 %v7419_v10  ;;  %v9793_v44 = vld [vmem:[#allocation53_spill] sm:$0xff]  ;;  %v9795_v51 = vld [vmem:[#allocation55_spill] sm:$0xff]  ;;  %v7426_v34 = vld [vmem:[#allocation5 + $0x500] ss:$16 sps:$4 sm:$0xff]  }
 0x44c   :  { %v3255_v25 = vmax.f32 %v3253_v40, %v3254_v53  ;;  %v9440_v28 = vsel %vm4108_vm3, %v4070_v32, %v9408_v22  ;;  %v9442_v21 = vunpack.c.l.b16 %v3535_v36  ;;  %v3249_v35 = vrot.slane %v3248_v31, 2  ;;  %v9791_v22 = vld [vmem:[#allocation51_spill] sm:$0xff] }
 0x44d   :  { %v3269_v3 = vmax.f32 %v3267_v63, %v3268_v38  ;;  %v9444_v29 = vunpack.c.l.b16 %v3537_v54  ;;  %v3263_v55 = vrot.slane %v3262_v26, 2  ;;  %v2069_v30 = vadd.f32 %v9240_v50, %v8846_v11  ;;  %v7428_v50 = vld [vmem:[#allocation5 + $0x504] ss:$16 sps:$4 sm:$0xff]   ;;  %v7429_v53 = vld [vmem:[#allocation5 + $0x508] ss:$16 sps:$4 sm:$0xff]  }
 0x44e   :  { %v3256_v39 = vrot.slane %v3255_v25, 2  ;;  %v3250_v12 = vmax.f32 %v3248_v31, %v3249_v35  ;;  %v2262_v7 = vadd.f32 %v9790_v24, %v8848_v19  ;;  %v2071_v13 = vadd.f32 %v9791_v22, %v8850_v18  ;;  %5618 = vmatpush1.bf16.msra.mxu1 %v7414_v16  ;;  %5790 = vmatpush1.bf16.msra.mxu0 %v7417_v9  ;;  %v9794_v63 = vld [vmem:[#allocation54_spill] sm:$0xff]  ;;  %v9796_v38 = vld [vmem:[#allocation56_spill] sm:$0xff]  ;;  %v7437_v54 = vld [vmem:[#allocation5 + $0x52c] ss:$16 sps:$4 sm:$0xff]  }
 0x44f   :  { %v3270_v59 = vrot.slane %v3269_v3, 2  ;;  %v3264_v23 = vmax.f32 %v3262_v26, %v3263_v55  ;;  %v2502_v14 = vmax.f32 %v2069_v30, 0.0  ;;  %v2264_v27 = vadd.f32 %v9792_v6, %v8852_v61  ;;  %5619 = vmatprep.subr.bf16.mxu1 %v7422_v33  ;;  %5791 = vmatprep.subr.bf16.mxu0 %v7425_v49  ;;  %v7434_v9 = vld [vmem:[#allocation5 + $0x524] ss:$16 sps:$4 sm:$0xff]  }
 0x450   :  { %v3257_v46 = vmax.f32 %v3255_v25, %v3256_v39  ;;  %v3251_v56 = vrot.slane %v3250_v12, 1  ;;  %v2504_v0 = vmax.f32 %v2262_v7, 0.0  ;;  %v2503_v45 = vmax.f32 %v2071_v13, 0.0  ;;  %v7432_v7 = vld [vmem:[#allocation5 + $0x520] ss:$16 sps:$4 sm:$0xff]  }
 0x451   :  { %v3271_v17 = vmax.f32 %v3269_v3, %v3270_v59  ;;  %v3265_v41 = vrot.slane %v3264_v23, 1  ;;  %v2505_v40 = vmax.f32 %v2264_v27, 0.0  ;;  %v2073_v52 = vadd.f32 %v9793_v44, %v8846_v11  ;;  %v7438_v44 = vld [vmem:[#allocation5 + $0x540] ss:$16 sps:$4 sm:$0xff]  }
 0x452   :  { %v3258_v15 = vrot.slane %v3257_v46, 1  ;;  %v3252_v4 = vmax.f32 %v3250_v12, %v3251_v56  ;;  %v2266_v10 = vadd.f32 %v9794_v63, %v8848_v19  ;;  %v2075_v62 = vadd.f32 %v9795_v51, %v8850_v18  ;;  %5620 = vmatpush1.bf16.msra.mxu1 %v7420_v37  ;;  %5792 = vmatpush1.bf16.msra.mxu0 %v7423_v2  ;;  %v7441_v63 = vld [vmem:[#allocation5 + $0x548] ss:$16 sps:$4 sm:$0xff]  }
 0x453   :  { %v3272_v60 = vrot.slane %v3271_v17, 1  ;;  %v3266_v32 = vmax.f32 %v3264_v23, %v3265_v41  ;;  %v2510_v31 = vmax.f32 %v2073_v52, 0.0  ;;  %v2268_v16 = vadd.f32 %v9796_v38, %v8852_v61  ;;  %5621 = vmatprep.subr.bf16.mxu1 %v7428_v50  ;;  %5793 = vmatprep.subr.bf16.mxu0 %v7431_v5  ;;  %v7435_v23 = vld [vmem:[#allocation5 + $0x528] ss:$16 sps:$4 sm:$0xff]   ;;  %v7443_v5 = vld [vmem:[#allocation5 + $0x54c] ss:$16 sps:$4 sm:$0xff]  }
 0x454   :  { %v3259_v36 = vmax.f32 %v3257_v46, %v3258_v15  ;;  %v3542_v26 = vpack.c.bf16 %v3252_v4, %v3252_v4  ;;  %v2512_v33 = vmax.f32 %v2266_v10, 0.0  ;;  %v2511_v49 = vmax.f32 %v2075_v62, 0.0  ;;  %v7440_v46 = vld [vmem:[#allocation5 + $0x544] ss:$16 sps:$4 sm:$0xff]  }
 0x455   :  { %v3273_v25 = vmax.f32 %v3271_v17, %v3272_v60  ;;  %v3544_v35 = vpack.c.bf16 %v3266_v32, %v3266_v32  ;;  %v3302_v55 = vmax.f32 %v2502_v14, %v2510_v31  ;;  %v2513_v39 = vmax.f32 %v2268_v16, 0.0 }
 0x456   :  { %v3543_v3 = vpack.c.bf16 %v3259_v36, %v3259_v36  ;;  %v4076_v30 = vunpack.c.l.b16 %v3542_v26  ;;  %v3316_v59 = vmax.f32 %v2504_v0, %v2512_v33  ;;  %v3309_v24 = vmax.f32 %v2503_v45, %v2511_v49  ;;  %5622 = vmatpush1.bf16.msra.mxu1 %v7426_v34  ;;  %5794 = vmatpush1.bf16.msra.mxu0 %v7429_v53  ;;  %v7444_v26 = vld [vmem:[#allocation5 + $0x560] ss:$16 sps:$4 sm:$0xff]  }
 0x457   :  { %v3545_v12 = vpack.c.bf16 %v3273_v25, %v3273_v25  ;;  %v4078_v22 = vunpack.c.l.b16 %v3544_v35  ;;  %v3303_v37 = vrot.slane %v3302_v55, 4  ;;  %v3323_v2 = vmax.f32 %v2505_v40, %v2513_v39  ;;  %5623 = vmatprep.subr.bf16.mxu1 %v7434_v9  ;;  %5795 = vmatprep.subr.bf16.mxu0 %v7437_v54  ;;  %v9798_v9 = vld [vmem:[#allocation60_spill] sm:$0xff]  ;;  %v9799_v35 = vld [vmem:[#allocation25_spill] sm:$0xff] }
 0x458   :  { %v9462_v13 = vunpack.c.l.b16 %v3543_v3  ;;  %v9466_v14 = vsel %vm4110_vm4, %v4076_v30, %v9436_v48  ;;  %v3317_v27 = vrot.slane %v3316_v59, 4  ;;  %v3310_v50 = vrot.slane %v3309_v24, 4 }
 0x459   :  { %v9468_v6 = vunpack.c.l.b16 %v3545_v12  ;;  %v9472_v56 = vsel %vm4110_vm4, %v4078_v22, %v9440_v28  ;;  %v3304_v17 = vmax.f32 %v3302_v55, %v3303_v37  ;;  %v3324_v0 = vrot.slane %v3323_v2, 4  ;;  %v7447_v55 = vld [vmem:[#allocation5 + $0x568] ss:$16 sps:$4 sm:$0xff]  }
 0x45a   :  { %v2079_v45 = vadd.f32 %v9268_v43, %v8846_v11  ;;  %v3318_v41 = vmax.f32 %v3316_v59, %v3317_v27  ;;  %v3311_v15 = vmax.f32 %v3309_v24, %v3310_v50  ;;  %v2272_v48 = vadd.f32 %v9270_v1, %v8848_v19  ;;  %5624 = vmatpush1.bf16.msra.mxu1 %v7432_v7  ;;  %v7446_v43 = vld [vmem:[#allocation5 + $0x564] ss:$16 sps:$4 sm:$0xff]   ;;  %v7449_v1 = vld [vmem:[#allocation5 + $0x56c] ss:$16 sps:$4 sm:$0xff]  }
 0x45b   :  { %v2081_v40 = vadd.f32 %v9272_v47, %v8850_v18  ;;  %v3305_v52 = vrot.slane %v3304_v17, 2  ;;  %v3325_v4 = vmax.f32 %v3323_v2, %v3324_v0  ;;  %v2274_v28 = vadd.f32 %v9276_v57, %v8852_v61  ;;  %5796 = vmatpush1.bf16.msra.mxu0 %v7435_v23  ;;  %5625 = vmatprep.subr.bf16.mxu1 %v7440_v46  ;;  %v9797_v57 = vld [vmem:[#allocation59_spill] sm:$0xff] }
 0x45c   :  { %v2518_v60 = vmax.f32 %v2079_v45, 0.0  ;;  %v3319_v10 = vrot.slane %v3318_v41, 2  ;;  %v3312_v51 = vrot.slane %v3311_v15, 2  ;;  %v2520_v62 = vmax.f32 %v2272_v48, 0.0  ;;  %5797 = vmatprep.subr.bf16.mxu0 %v7443_v5  ;;  %v7455_v24 = vld [vmem:[#allocation5 + $0x58c] ss:$16 sps:$4 sm:$0xff]  }
 0x45d   :  { %v2519_v34 = vmax.f32 %v2081_v40, 0.0  ;;  %v3306_v53 = vmax.f32 %v3304_v17, %v3305_v52  ;;  %v3326_v47 = vrot.slane %v3325_v4, 2  ;;  %v2521_v32 = vmax.f32 %v2274_v28, 0.0  ;;  %v7450_v5 = vld [vmem:[#allocation5 + $0x580] ss:$16 sps:$4 sm:$0xff]  }
 0x45e   :  { %v2083_v36 = vadd.f32 %v9278_v42, %v8846_v11  ;;  %v3320_v31 = vmax.f32 %v3318_v41, %v3319_v10  ;;  %v3313_v38 = vmax.f32 %v3311_v15, %v3312_v51  ;;  %v2276_v16 = vadd.f32 %v9797_v57, %v8848_v19  ;;  %5626 = vmatpush1.bf16.msra.mxu1 %v7438_v44  ;;  %v7452_v42 = vld [vmem:[#allocation5 + $0x584] ss:$16 sps:$4 sm:$0xff]   ;;  %v7453_v15 = vld [vmem:[#allocation5 + $0x588] ss:$16 sps:$4 sm:$0xff]  }
 0x45f   :  { %v2085_v54 = vadd.f32 %v9798_v9, %v8850_v18  ;;  %v3307_v25 = vrot.slane %v3306_v53, 1  ;;  %v3327_v33 = vmax.f32 %v3325_v4, %v3326_v47  ;;  %v2278_v3 = vadd.f32 %v9799_v35, %v8852_v61  ;;  %5798 = vmatpush1.bf16.msra.mxu0 %v7441_v63  ;;  %5627 = vmatprep.subr.bf16.mxu1 %v7446_v43  ;;  %v7458_v48 = vld [vmem:[#allocation5 + $0x5a4] ss:$16 sps:$4 sm:$0xff]   ;;  %v7459_v57 = vld [vmem:[#allocation5 + $0x5a8] ss:$16 sps:$4 sm:$0xff]  }
 0x460   :  { %v2526_v49 = vmax.f32 %v2083_v36, 0.0  ;;  %v3321_v39 = vrot.slane %v3320_v31, 1  ;;  %v3314_v30 = vrot.slane %v3313_v38, 1  ;;  %v2528_v12 = vmax.f32 %v2276_v16, 0.0  ;;  %5799 = vmatprep.subr.bf16.mxu0 %v7449_v1  ;;  %v7464_v16 = vld [vmem:[#allocation5 + $0x5c4] ss:$16 sps:$4 sm:$0xff]  }
 0x461   :  { %v2527_v59 = vmax.f32 %v2085_v54, 0.0  ;;  %v3308_v7 = vmax.f32 %v3306_v53, %v3307_v25  ;;  %v3328_v22 = vrot.slane %v3327_v33, 1  ;;  %v2529_v2 = vmax.f32 %v2278_v3, 0.0  ;;  %v7456_v53 = vld [vmem:[#allocation5 + $0x5a0] ss:$16 sps:$4 sm:$0xff]  }
 0x462   :  { %v3358_v37 = vmax.f32 %v2518_v60, %v2526_v49  ;;  %v3322_v23 = vmax.f32 %v3320_v31, %v3321_v39  ;;  %v3315_v46 = vmax.f32 %v3313_v38, %v3314_v30  ;;  %v3372_v27 = vmax.f32 %v2520_v62, %v2528_v12  ;;  %5628 = vmatpush1.bf16.msra.mxu1 %v7444_v26  ;;  %v7461_v60 = vld [vmem:[#allocation5 + $0x5ac] ss:$16 sps:$4 sm:$0xff]   ;;  %v9800_v31 = vld [vmem:[#allocation26_spill] sm:$0xff] }
 0x463   :  { %v3365_v50 = vmax.f32 %v2519_v34, %v2527_v59  ;;  %v3550_v17 = vpack.c.bf16 %v3308_v7, %v3308_v7  ;;  %v3329_v0 = vmax.f32 %v3327_v33, %v3328_v22  ;;  %v3379_v41 = vmax.f32 %v2521_v32, %v2529_v2  ;;  %5800 = vmatpush1.bf16.msra.mxu0 %v7447_v55  ;;  %v9801_v26 = vld [vmem:[#allocation27_spill] sm:$0xff]  ;;  %v9802_v33 = vld [vmem:[#allocation28_spill] sm:$0xff]  ;;  %v9803_v39 = vld [vmem:[#allocation29_spill] sm:$0xff] }
 0x464   :  { %v3359_v45 = vrot.slane %v3358_v37, 4  ;;  %5629 = vmatprep.subr.bf16.mxu1 %v7452_v42  ;;  %v3552_v40 = vpack.c.bf16 %v3322_v23, %v3322_v23  ;;  %v3551_v44 = vpack.c.bf16 %v3315_v46, %v3315_v46  ;;  %v3373_v52 = vrot.slane %v3372_v27, 4  ;;  %5801 = vmatprep.subr.bf16.mxu0 %v7455_v24  ;;  %v7467_v35 = vld [vmem:[#allocation5 + $0x5cc] ss:$16 sps:$4 sm:$0xff]   ;;  %v7462_v22 = vld [vmem:[#allocation5 + $0x5c0] ss:$16 sps:$4 sm:$0xff]  }
 0x465   :  { %v3366_v4 = vrot.slane %v3365_v50, 4  ;;  %v9490_v28 = vunpack.c.l.b16 %v3550_v17  ;;  %v3553_v63 = vpack.c.bf16 %v3329_v0, %v3329_v0  ;;  %v3380_v10 = vrot.slane %v3379_v41, 4  ;;  %v9804_v46 = vld [vmem:[#allocation30_spill] sm:$0xff] }
 0x466   :  { %v3360_v43 = vmax.f32 %v3358_v37, %v3359_v45  ;;  %v9492_v51 = vunpack.c.l.b16 %v3552_v40  ;;  %v9494_v62 = vunpack.c.l.b16 %v3551_v44  ;;  %v3374_v34 = vmax.f32 %v3372_v27, %v3373_v52  ;;  %5630 = vmatpush1.bf16.msra.mxu1 %v7450_v5  ;;  %v7470_v5 = vld [vmem:[#allocation5 + $0x5e4] ss:$16 sps:$4 sm:$0xff]   ;;  %v9805_v45 = vld [vmem:[#allocation31_spill] sm:$0xff] }
 0x467   :  { %v3367_v1 = vmax.f32 %v3365_v50, %v3366_v4  ;;  %v9496_v47 = vunpack.c.l.b16 %v3553_v63  ;;  %v3381_v36 = vmax.f32 %v3379_v41, %v3380_v10  ;;  %v2089_v38 = vadd.f32 %v9800_v31, %v8846_v11  ;;  %5802 = vmatpush1.bf16.msra.mxu0 %v7453_v15  ;;  %5631 = vmatprep.subr.bf16.mxu1 %v7458_v48  ;;  %v7465_v50 = vld [vmem:[#allocation5 + $0x5c8] ss:$16 sps:$4 sm:$0xff]   ;;  %v7473_v48 = vld [vmem:[#allocation5 + $0x5ec] ss:$16 sps:$4 sm:$0xff]   ;;  %v9806_v4 = vld [vmem:[#allocation32_spill] sm:$0xff] }
 0x468   :  { %v3361_v32 = vrot.slane %v3360_v43, 2  ;;  %v3375_v9 = vrot.slane %v3374_v34, 2  ;;  %v2282_v25 = vadd.f32 %v9801_v26, %v8848_v19  ;;  %v2091_v49 = vadd.f32 %v9802_v33, %v8850_v18  ;;  %5803 = vmatprep.subr.bf16.mxu0 %v7461_v60 }
 0x469   :  { %v3368_v54 = vrot.slane %v3367_v1, 2  ;;  %v3382_v55 = vrot.slane %v3381_v36, 2  ;;  %v2534_v42 = vmax.f32 %v2089_v38, 0.0  ;;  %v2284_v30 = vadd.f32 %v9803_v39, %v8852_v61  ;;  %v9807_v39 = vld [vmem:[#allocation62_spill] sm:$0xff] }
 0x46a   :  { %v3362_v3 = vmax.f32 %v3360_v43, %v3361_v32  ;;  %v3376_v12 = vmax.f32 %v3374_v34, %v3375_v9  ;;  %v2536_v24 = vmax.f32 %v2282_v25, 0.0  ;;  %v2535_v7 = vmax.f32 %v2091_v49, 0.0  ;;  %5632 = vmatpush1.bf16.msra.mxu1 %v7456_v53  ;;  %v7468_v34 = vld [vmem:[#allocation5 + $0x5e0] ss:$16 sps:$4 sm:$0xff]  }
 0x46b   :  { %v3369_v59 = vmax.f32 %v3367_v1, %v3368_v54  ;;  %v3383_v2 = vmax.f32 %v3381_v36, %v3382_v55  ;;  %v2537_v23 = vmax.f32 %v2284_v30, 0.0  ;;  %v2093_v27 = vadd.f32 %v9804_v46, %v8846_v11  ;;  %5804 = vmatpush1.bf16.msra.mxu0 %v7459_v57  ;;  %5633 = vmatprep.subr.bf16.mxu1 %v7464_v16 }
 0x46c   :  { %v3363_v37 = vrot.slane %v3362_v3, 1  ;;  %v3377_v17 = vrot.slane %v3376_v12, 1  ;;  %v2286_v41 = vadd.f32 %v9805_v45, %v8848_v19  ;;  %v2095_v15 = vadd.f32 %v9320_v58, %v8850_v18  ;;  %5805 = vmatprep.subr.bf16.mxu0 %v7467_v35  ;;  %v7471_v18 = vld [vmem:[#allocation5 + $0x5e8] ss:$16 sps:$4 sm:$0xff]   ;;  %v7476_v58 = vld [vmem:[#allocation5 + $0x604] ss:$16 sps:$4 sm:$0xff]  }
 0x46d   :  { %v3370_v0 = vrot.slane %v3369_v59, 1  ;;  %v3384_v44 = vrot.slane %v3383_v2, 1  ;;  %v2542_v52 = vmax.f32 %v2093_v27, 0.0  ;;  %v2288_v11 = vadd.f32 %v9806_v4, %v8852_v61  ;;  %v7479_v61 = vld [vmem:[#allocation5 + $0x60c] ss:$16 sps:$4 sm:$0xff]   ;;  %v9811_v27 = vld [vmem:[#allocation40_spill] sm:$0xff] }
 0x46e   :  { %v3364_v40 = vmax.f32 %v3362_v3, %v3363_v37  ;;  %v3378_v60 = vmax.f32 %v3376_v12, %v3377_v17  ;;  %v2544_v43 = vmax.f32 %v2286_v41, 0.0  ;;  %v2543_v10 = vmax.f32 %v2095_v15, 0.0  ;;  %5634 = vmatpush1.bf16.msra.mxu1 %v7462_v22  ;;  %v9810_v22 = vld [vmem:[#allocation20_spill] sm:$0xff] }
 0x46f   :  { %v3371_v63 = vmax.f32 %v3369_v59, %v3370_v0  ;;  %v3385_v53 = vmax.f32 %v3383_v2, %v3384_v44  ;;  %v3414_v19 = vmax.f32 %v2534_v42, %v2542_v52  ;;  %v2545_v32 = vmax.f32 %v2288_v11, 0.0  ;;  %5806 = vmatpush1.bf16.msra.mxu0 %v7465_v50  ;;  %5635 = vmatprep.subr.bf16.mxu1 %v7470_v5  ;;  %v9812_v45 = vld [vmem:[#allocation48_spill] sm:$0xff] }
 0x470   :  { %v3558_v1 = vpack.c.bf16 %v3364_v40, %v3364_v40  ;;  %v3560_v36 = vpack.c.bf16 %v3378_v60, %v3378_v60  ;;  %v3428_v38 = vmax.f32 %v2536_v24, %v2544_v43  ;;  %v3421_v57 = vmax.f32 %v2535_v7, %v2543_v10  ;;  %5807 = vmatprep.subr.bf16.mxu0 %v7473_v48  ;;  %v9809_v7 = vld [vmem:[#allocation23_spill] sm:$0xff]  ;;  %v9815_v60 = vld [vmem:[#allocation46_spill] sm:$0xff] }
 0x471   :  { %v3559_v31 = vpack.c.bf16 %v3371_v63, %v3371_v63  ;;  %v3561_v9 = vpack.c.bf16 %v3385_v53, %v3385_v53  ;;  %v3415_v54 = vrot.slane %v3414_v19, 4  ;;  %v3435_v26 = vmax.f32 %v2537_v23, %v2545_v32  ;;  %v9817_v32 = vld [vmem:[#allocation64_spill] sm:$0xff] }
 0x472   :  { %v4092_v16 = vunpack.c.l.b16 %v3558_v1  ;;  %v9514_v25 = vunpack.c.l.b16 %v3560_v36  ;;  %v3429_v49 = vrot.slane %v3428_v38, 4  ;;  %v3422_v35 = vrot.slane %v3421_v57, 4  ;;  %5636 = vmatpush1.bf16.msra.mxu1 %v7468_v34  ;;  %v9816_v34 = vld [vmem:[#allocation22_spill] sm:$0xff] }
 0x473   :  { %v4093_v33 = vunpack.c.l.b16 %v3559_v31  ;;  %v4095_v3 = vunpack.c.l.b16 %v3561_v9  ;;  %v3416_v55 = vmax.f32 %v3414_v19, %v3415_v54  ;;  %v3436_v42 = vrot.slane %v3435_v26, 4  ;;  %5808 = vmatpush1.bf16.msra.mxu0 %v7471_v18  ;;  %5648 = vmatprep.subr.bf16.mxu1 %v7476_v58  ;;  %v9820_v9 = vld [vmem:[#allocation24_spill] sm:$0xff]  ;;  %v9821_v54 = vld [vmem:[#allocation33_spill] sm:$0xff] }
 0x474   :  { %v9808_v30 = vpack.c.bf16 %v9807_v39, %v9807_v39  ;;  %v3430_v59 = vmax.f32 %v3428_v38, %v3429_v49  ;;  %v3423_v24 = vmax.f32 %v3421_v57, %v3422_v35  ;;  %v4148_v37 = vsel %vm4108_vm3, %v9810_v22, %v9809_v7  ;;  %5820 = vmatprep.subr.bf16.mxu0 %v7479_v61  ;;  %v9818_v38 = vld [vmem:[#allocation63_spill] sm:$0xff] }
 0x475   :  { %v4204_v2 = vsel %vm4108_vm3, %v9442_v21, %v9412_v20  ;;  %v3417_v23 = vrot.slane %v3416_v55, 2  ;;  %v3437_v46 = vmax.f32 %v3435_v26, %v3436_v42  ;;  %v4149_v50 = vsel %vm4110_vm4, %v9811_v27, %v4148_v37  ;;  %v9813_v20 = vld [vmem:[#allocation58_spill] sm:$0xff]  ;;  %v9823_v42 = vld [vmem:[#allocation49_spill] sm:$0xff]  ;;  %v9825_v27 = vld [vmem:[#allocation43_spill] sm:$0xff] }
 0x476   :  { %v4037_v12 = vunpack.c.l.b16 %v9808_v30  ;;  %v4205_v5 = vsel %vm4110_vm4, %v9462_v13, %v4204_v2  ;;  %v3431_v17 = vrot.slane %v3430_v59, 2  ;;  %v3424_v0 = vrot.slane %v3423_v24, 2  ;;  %v9814_v13 = vld [vmem:[#allocation41_spill] sm:$0xff] }
 0x477   :  { %v4150_v41 = vsel %vm4112_vm5, %v9812_v45, %v4149_v50  ;;  %v4206_v15 = vsel %vm4112_vm5, %v9494_v62, %v4205_v5  ;;  %v3418_v48 = vmax.f32 %v3416_v55, %v3417_v23  ;;  %v3438_v40 = vrot.slane %v3437_v46, 2  ;;  %v9826_v50 = vld [vmem:[#allocation47_spill] sm:$0xff] }
 0x478   :  { %v4151_v21 = vsel %vm4114_vm6, %v9813_v20, %v4150_v41  ;;  %v4207_v44 = vsel %vm4114_vm6, %v4093_v33, %v4206_v15  ;;  %v3432_v52 = vmax.f32 %v3430_v59, %v3431_v17  ;;  %v3425_v4 = vmax.f32 %v3423_v24, %v3424_v0  ;;  %v9824_v24 = vld [vmem:[#allocation61_spill] sm:$0xff] }
 0x479   :  { %v4152_v11 = vsel %vm4116_vm7, %v4037_v12, %v4151_v21  ;;  %v4143_v63 = vsel %vm4112_vm5, %v9815_v60, %v9814_v13  ;;  %v3419_v43 = vrot.slane %v3418_v48, 1  ;;  %v3439_v10 = vmax.f32 %v3437_v46, %v3438_v40  ;;  %v7482_v60 = vld [vmem:[#allocation5 + $0x624] ss:$16 sps:$4 sm:$0xff]  }
 0x47a   :  { %v4144_v62 = vsel %vm4114_vm6, %v9816_v34, %v4143_v63  ;;  %v4199_v1 = vsel %vm4112_vm5, %v9490_v28, %v9466_v14  ;;  %v3433_v53 = vrot.slane %v3432_v52, 1  ;;  %v3426_v19 = vrot.slane %v3425_v4, 1  ;;  %v9822_v14 = vld [vmem:[#allocation42_spill] sm:$0xff]  ;;  %v7483_v63 = vld [vmem:[#allocation5 + $0x628] ss:$16 sps:$4 sm:$0xff]  }
 0x47b   :  { %v4145_v18 = vsel %vm4116_vm7, %v9817_v32, %v4144_v62  ;;  %v4200_v58 = vsel %vm4114_vm6, %v4092_v16, %v4199_v1  ;;  %v3420_v36 = vmax.f32 %v3418_v48, %v3419_v43  ;;  %v3440_v31 = vrot.slane %v3439_v10, 1  ;;  %v9828_v48 = vld [vmem:[#allocation65_spill] sm:$0xff]  ;;  %v7494_v62 = vld [vmem:[#allocation5 + $0x664] ss:$16 sps:$4 sm:$0xff]  }
 0x47c   :  { %v9819_v57 = vpack.c.bf16 %v9818_v38, %v9818_v38  ;;  %v4162_v26 = vsel %vm4108_vm3, %v9821_v54, %v9820_v9  ;;  %v3434_v33 = vmax.f32 %v3432_v52, %v3433_v53  ;;  %v3427_v49 = vmax.f32 %v3425_v4, %v3426_v19  ;;  %v7474_v52 = vld [vmem:[#allocation5 + $0x600] ss:$16 sps:$4 sm:$0xff]   ;;  %v7491_v43 = vld [vmem:[#allocation5 + $0x64c] ss:$16 sps:$4 sm:$0xff]   ;;  %v7489_v34 = vld [vmem:[#allocation5 + $0x648] ss:$16 sps:$4 sm:$0xff]  }
 0x47d   :  { %v4163_v28 = vsel %vm4110_vm4, %v9822_v14, %v4162_v26  ;;  %v4218_v35 = vsel %vm4108_vm3, %v9444_v29, %v9416_v8  ;;  %v3566_v16 = vpack.c.bf16 %v3420_v36, %v3420_v36  ;;  %v3441_v55 = vmax.f32 %v3439_v10, %v3440_v31  ;;  %v7486_v10 = vld [vmem:[#allocation5 + $0x640] ss:$16 sps:$4 sm:$0xff]   ;;  %v7497_v1 = vld [vmem:[#allocation5 + $0x66c] ss:$16 sps:$4 sm:$0xff]   ;;  %v7495_v19 = vld [vmem:[#allocation5 + $0x668] ss:$16 sps:$4 sm:$0xff]  }
 0x47e   :  { %v4039_v61 = vunpack.c.l.b16 %v9819_v57  ;;  %v4164_v39 = vsel %vm4112_vm5, %v9823_v42, %v4163_v28  ;;  %v4219_v30 = vsel %vm4110_vm4, %v9468_v6, %v4218_v35  ;;  %v3568_v12 = vpack.c.bf16 %v3434_v33, %v3434_v33  ;;  %v7492_v53 = vld [vmem:[#allocation5 + $0x660] ss:$16 sps:$4 sm:$0xff]   ;;  %v7500_v32 = vld [vmem:[#allocation5 + $0x684] ss:$16 sps:$4 sm:$0xff]   ;;  %v7501_v36 = vld [vmem:[#allocation5 + $0x688] ss:$16 sps:$4 sm:$0xff]  }
 0x47f   :  { %v3567_v59 = vpack.c.bf16 %v3427_v49, %v3427_v49  ;;  %v4165_v7 = vsel %vm4114_vm6, %v9824_v24, %v4164_v39  ;;  %v4220_v22 = vsel %vm4112_vm5, %v9496_v47, %v4219_v30  ;;  %v4100_v37 = vunpack.c.l.b16 %v3566_v16  ;;  %v9827_v47 = vld [vmem:[#allocation57_spill] sm:$0xff]  ;;  %v7506_v31 = vld [vmem:[#allocation5 + $0x6a4] ss:$16 sps:$4 sm:$0xff]   ;;  %v7504_v57 = vld [vmem:[#allocation5 + $0x6a0] ss:$16 sps:$4 sm:$0xff]  }
 0x480   :  { %v3569_v2 = vpack.c.bf16 %v3441_v55, %v3441_v55  ;;  %v4166_v8 = vsel %vm4116_vm7, %v4039_v61, %v4165_v7  ;;  %v4221_v29 = vsel %vm4114_vm6, %v4095_v3, %v4220_v22  ;;  %v4102_v23 = vunpack.c.l.b16 %v3568_v12  ;;  %v7509_v38 = vld [vmem:[#allocation5 + $0x6ac] ss:$16 sps:$4 sm:$0xff]   ;;  %v7507_v61 = vld [vmem:[#allocation5 + $0x6a8] ss:$16 sps:$4 sm:$0xff]   ;;  %v7512_v9 = vld [vmem:[#allocation5 + $0x6c4] ss:$16 sps:$4 sm:$0xff]  }
 0x481   :  { %v4101_v46 = vunpack.c.l.b16 %v3567_v59  ;;  %v4157_v6 = vsel %vm4112_vm5, %v9826_v50, %v9825_v27  ;;  %v4213_v5 = vsel %vm4112_vm5, %v9492_v51, %v9472_v56  ;;  %v4201_v17 = vsel %vm4116_vm7, %v4100_v37, %v4200_v58  ;;  %v7477_v56 = vld [vmem:[#allocation5 + $0x608] ss:$16 sps:$4 sm:$0xff]   ;;  %v7498_v58 = vld [vmem:[#allocation5 + $0x680] ss:$16 sps:$4 sm:$0xff]   ;;  %v7515_v54 = vld [vmem:[#allocation5 + $0x6cc] ss:$16 sps:$4 sm:$0xff]  }
 0x482   :  { %v4103_v0 = vunpack.c.l.b16 %v3569_v2  ;;  %v4158_v45 = vsel %vm4114_vm6, %v9827_v47, %v4157_v6  ;;  %v4214_v41 = vsel %vm4114_vm6, %v9514_v25, %v4213_v5  ;;  %v4227_v15 = vpack.c.b16 %v4201_v17, %v4145_v18  ;;  %v7485_v25 = vld [vmem:[#allocation5 + $0x62c] ss:$16 sps:$4 sm:$0xff]   ;;  %v7510_v26 = vld [vmem:[#allocation5 + $0x6c0] ss:$16 sps:$4 sm:$0xff]   ;;  %v7513_v33 = vld [vmem:[#allocation5 + $0x6c8] ss:$16 sps:$4 sm:$0xff]  }
 0x483   :  { %v4208_v3 = vsel %vm4116_vm7, %v4101_v46, %v4207_v44  ;;  %v4159_v40 = vsel %vm4116_vm7, %v9828_v48, %v4158_v45  ;;  %v4215_v20 = vsel %vm4116_vm7, %v4102_v23, %v4214_v41  ;;  %v7480_v44 = vld [vmem:[#allocation5 + $0x620] ss:$16 sps:$4 sm:$0xff]   ;;  %v7503_v18 = vld [vmem:[#allocation5 + $0x68c] ss:$16 sps:$4 sm:$0xff]   ;;  %v7518_v49 = vld [vmem:[#allocation5 + $0x6e4] ss:$16 sps:$4 sm:$0xff]  }
 0x484   :  { %v4228_v21 = vpack.c.b16 %v4208_v3, %v4152_v11  ;;  %v4222_v51 = vsel %vm4116_vm7, %v4103_v0, %v4221_v29  ;;  %v9585_v4 = vpack.c.b16 %v4215_v20, %v4159_v40  ;;  %v7488_v11 = vld [vmem:[#allocation5 + $0x644] ss:$16 sps:$4 sm:$0xff]   ;;  %v7521_v14 = vld [vmem:[#allocation5 + $0x6ec] ss:$16 sps:$4 sm:$0xff]   ;;  %v7516_v28 = vld [vmem:[#allocation5 + $0x6e0] ss:$16 sps:$4 sm:$0xff]  }
 0x485   :  { %v4230_v13 = vpack.c.b16 %v4222_v51, %v4166_v8  ;;  %v7519_v35 = vld [vmem:[#allocation5 + $0x6e8] ss:$16 sps:$4 sm:$0xff]   ;;  %v7524_v16 = vld [vmem:[#allocation5 + $0x704] ss:$16 sps:$4 sm:$0xff]   ;;  %v7527_v55 = vld [vmem:[#allocation5 + $0x70c] ss:$16 sps:$4 sm:$0xff]  }
 0x486   :  { %5637 = vmatprep.mubr.bf16.mxu1 %v4228_v21  ;;  %5809 = vmatprep.mubr.bf16.mxu0 %v4228_v21  ;;  %v7522_v42 = vld [vmem:[#allocation5 + $0x700] ss:$16 sps:$4 sm:$0xff]   ;;  %v7525_v39 = vld [vmem:[#allocation5 + $0x708] ss:$16 sps:$4 sm:$0xff]   ;;  %v7530_v30 = vld [vmem:[#allocation5 + $0x724] ss:$16 sps:$4 sm:$0xff]  }
 0x487   :  { %5638 = vmatmul.mubr.bf16.vlgmr.msra.gmra.mrb[128].mxu1 %v4227_v15  ;;  %5810 = vmatmul.mubr.bf16.vlgmr.msra.gmra.mrb[160].mxu0 %v4227_v15  ;;  %v7533_v12 = vld [vmem:[#allocation5 + $0x72c] ss:$16 sps:$4 sm:$0xff]   ;;  %v7528_v59 = vld [vmem:[#allocation5 + $0x720] ss:$16 sps:$4 sm:$0xff]   ;;  %v7531_v24 = vld [vmem:[#allocation5 + $0x728] ss:$16 sps:$4 sm:$0xff]  }
 0x488   :  { %5649 = vmatpush1.bf16.msra.mxu1 %v7474_v52  ;;  %5821 = vmatpush1.bf16.msra.mxu0 %v7477_v56  ;;  %v7536_v7 = vld [vmem:[#allocation5 + $0x744] ss:$16 sps:$4 sm:$0xff]   ;;  %v7539_v22 = vld [vmem:[#allocation5 + $0x74c] ss:$16 sps:$4 sm:$0xff]   ;;  %v7534_v37 = vld [vmem:[#allocation5 + $0x740] ss:$16 sps:$4 sm:$0xff]  }
 0x489   :  { %5680 = vmatprep.mubr.bf16.mxu1 %v4230_v13  ;;  %5852 = vmatprep.mubr.bf16.mxu0 %v4230_v13  ;;  %v7537_v2 = vld [vmem:[#allocation5 + $0x748] ss:$16 sps:$4 sm:$0xff]   ;;  %v7542_v8 = vld [vmem:[#allocation5 + $0x764] ss:$16 sps:$4 sm:$0xff]   ;;  %v7545_v29 = vld [vmem:[#allocation5 + $0x76c] ss:$16 sps:$4 sm:$0xff]  }
 0x48a   :  { %5650 = vmatprep.subr.bf16.mxu1 %v7482_v60  ;;  %5822 = vmatprep.subr.bf16.mxu0 %v7485_v25  ;;  %v7540_v23 = vld [vmem:[#allocation5 + $0x760] ss:$16 sps:$4 sm:$0xff]   ;;  %v7543_v46 = vld [vmem:[#allocation5 + $0x768] ss:$16 sps:$4 sm:$0xff]   ;;  %v7548_v27 = vld [vmem:[#allocation5 + $0x784] ss:$16 sps:$4 sm:$0xff]  }
 0x48b   :  { %v7551_v50 = vld [vmem:[#allocation5 + $0x78c] ss:$16 sps:$4 sm:$0xff]   ;;  %v7546_v6 = vld [vmem:[#allocation5 + $0x780] ss:$16 sps:$4 sm:$0xff]   ;;  %v7549_v5 = vld [vmem:[#allocation5 + $0x788] ss:$16 sps:$4 sm:$0xff]  }
 0x48c   :  { %5651 = vmatpush1.bf16.msra.mxu1 %v7480_v44  ;;  %5823 = vmatpush1.bf16.msra.mxu0 %v7483_v63  ;;  %v7554_v17 = vld [vmem:[#allocation5 + $0x7a4] ss:$16 sps:$4 sm:$0xff]   ;;  %v7557_v0 = vld [vmem:[#allocation5 + $0x7ac] ss:$16 sps:$4 sm:$0xff]   ;;  %v7552_v47 = vld [vmem:[#allocation5 + $0x7a0] ss:$16 sps:$4 sm:$0xff]  }
 0x48d   :  { %5652 = vmatprep.subr.bf16.mxu1 %v7488_v11  ;;  %5824 = vmatprep.subr.bf16.mxu0 %v7491_v43  ;;  %v7555_v45 = vld [vmem:[#allocation5 + $0x7a8] ss:$16 sps:$4 sm:$0xff]   ;;  %v7560_v41 = vld [vmem:[#allocation5 + $0x7c4] ss:$16 sps:$4 sm:$0xff]   ;;  %v7563_v3 = vld [vmem:[#allocation5 + $0x7cc] ss:$16 sps:$4 sm:$0xff]  }
 0x48e   :  { %v7558_v15 = vld [vmem:[#allocation5 + $0x7c0] ss:$16 sps:$4 sm:$0xff]   ;;  %v7561_v48 = vld [vmem:[#allocation5 + $0x7c8] ss:$16 sps:$4 sm:$0xff]   ;;  %v7566_v40 = vld [vmem:[#allocation5 + $0x7e4] ss:$16 sps:$4 sm:$0xff]  }
 0x48f   :  { %v7569_v20 = vld [vmem:[#allocation5 + $0x7ec] ss:$16 sps:$4 sm:$0xff]   ;;  %v7564_v21 = vld [vmem:[#allocation5 + $0x7e0] ss:$16 sps:$4 sm:$0xff]   ;;  %v7567_v52 = vld [vmem:[#allocation5 + $0x7e8] ss:$16 sps:$4 sm:$0xff]  }
 0x490   :  { %5653 = vmatpush1.bf16.msra.mxu1 %v7486_v10  ;;  %5825 = vmatpush1.bf16.msra.mxu0 %v7489_v34  ;;  %v7572_v56 = vld [vmem:[#allocation7 + $0x4] ss:$8 sps:$4 sm:$0xff]   ;;  %v7570_v51 = vld [vmem:[#allocation7] ss:$8 sps:$4 sm:$0xff]   ;;  %v7575_v13 = vld [vmem:[#allocation7 + $0x14] ss:$8 sps:$4 sm:$0xff]  }
 0x491   :  { %5654 = vmatprep.subr.bf16.mxu1 %v7494_v62  ;;  %5826 = vmatprep.subr.bf16.mxu0 %v7497_v1  ;;  %v7573_v60 = vld [vmem:[#allocation7 + $0x10] ss:$8 sps:$4 sm:$0xff]   ;;  %v7578_v25 = vld [vmem:[#allocation7 + $0x24] ss:$8 sps:$4 sm:$0xff]   ;;  %v7576_v44 = vld [vmem:[#allocation7 + $0x20] ss:$8 sps:$4 sm:$0xff]  }
 0x492   :  { %v7581_v63 = vld [vmem:[#allocation7 + $0x34] ss:$8 sps:$4 sm:$0xff]   ;;  %v7579_v11 = vld [vmem:[#allocation7 + $0x30] ss:$8 sps:$4 sm:$0xff]   ;;  %v7584_v43 = vld [vmem:[#allocation7 + $0x44] ss:$8 sps:$4 sm:$0xff]  }
 0x493   :  { %v7582_v10 = vld [vmem:[#allocation7 + $0x40] ss:$8 sps:$4 sm:$0xff]   ;;  %v7587_v34 = vld [vmem:[#allocation7 + $0x54] ss:$8 sps:$4 sm:$0xff]   ;;  %v7585_v62 = vld [vmem:[#allocation7 + $0x50] ss:$8 sps:$4 sm:$0xff]  }
 0x494   :  { %5655 = vmatpush1.bf16.msra.mxu1 %v7492_v53  ;;  %5827 = vmatpush1.bf16.msra.mxu0 %v7495_v19  ;;  %v7588_v1 = vld [vmem:[#allocation7 + $0x60] ss:$8 sps:$4 sm:$0xff]   ;;  %v7593_v53 = vld [vmem:[#allocation7 + $0x74] ss:$8 sps:$4 sm:$0xff]   ;;  %v7591_v19 = vld [vmem:[#allocation7 + $0x70] ss:$8 sps:$4 sm:$0xff]  }
 0x495   :  { %5656 = vmatprep.subr.bf16.mxu1 %v7500_v32  ;;  %5828 = vmatprep.subr.bf16.mxu0 %v7503_v18  ;;  %v7596_v32 = vld [vmem:[#allocation7 + $0x84] ss:$8 sps:$4 sm:$0xff]   ;;  %v7594_v18 = vld [vmem:[#allocation7 + $0x80] ss:$8 sps:$4 sm:$0xff]  }
 0x498   :  { %5657 = vmatpush1.bf16.msra.mxu1 %v7498_v58  ;;  %5829 = vmatpush1.bf16.msra.mxu0 %v7501_v36  ;;  %v7599_v58 = vld [vmem:[#allocation7 + $0x94] ss:$8 sps:$4 sm:$0xff]   ;;  %v7597_v36 = vld [vmem:[#allocation7 + $0x90] ss:$8 sps:$4 sm:$0xff]  }
 0x499   :  { %5658 = vmatprep.subr.bf16.mxu1 %v7506_v31  ;;  %5830 = vmatprep.subr.bf16.mxu0 %v7509_v38  ;;  %v7602_v31 = vld [vmem:[#allocation7 + $0xa4] ss:$8 sps:$4 sm:$0xff]   ;;  %v7600_v38 = vld [vmem:[#allocation7 + $0xa0] ss:$8 sps:$4 sm:$0xff]  }
 0x49c   :  { %5659 = vmatpush1.bf16.msra.mxu1 %v7504_v57  ;;  %5831 = vmatpush1.bf16.msra.mxu0 %v7507_v61  ;;  %v7605_v57 = vld [vmem:[#allocation7 + $0xb4] ss:$8 sps:$4 sm:$0xff]   ;;  %v7603_v61 = vld [vmem:[#allocation7 + $0xb0] ss:$8 sps:$4 sm:$0xff]  }
 0x49d   :  { %5660 = vmatprep.subr.bf16.mxu1 %v7512_v9  ;;  %5832 = vmatprep.subr.bf16.mxu0 %v7515_v54  ;;  %v7608_v9 = vld [vmem:[#allocation7 + $0xc4] ss:$8 sps:$4 sm:$0xff]   ;;  %v7606_v54 = vld [vmem:[#allocation7 + $0xc0] ss:$8 sps:$4 sm:$0xff]  }
 0x4a0   :  { %5661 = vmatpush1.bf16.msra.mxu1 %v7510_v26  ;;  %5833 = vmatpush1.bf16.msra.mxu0 %v7513_v33  ;;  %v7611_v26 = vld [vmem:[#allocation7 + $0xd4] ss:$8 sps:$4 sm:$0xff]   ;;  %v7609_v33 = vld [vmem:[#allocation7 + $0xd0] ss:$8 sps:$4 sm:$0xff]  }
 0x4a1   :  { %5662 = vmatprep.subr.bf16.mxu1 %v7518_v49  ;;  %5834 = vmatprep.subr.bf16.mxu0 %v7521_v14  ;;  %v7612_v49 = vld [vmem:[#allocation7 + $0xe0] ss:$8 sps:$4 sm:$0xff]   ;;  %v7614_v14 = vld [vmem:[#allocation7 + $0xe4] ss:$8 sps:$4 sm:$0xff]  }
 0x4a4   :  { %5663 = vmatpush1.bf16.msra.mxu1 %v7516_v28  ;;  %5835 = vmatpush1.bf16.msra.mxu0 %v7519_v35  ;;  %v7617_v28 = vld [vmem:[#allocation7 + $0xf4] ss:$8 sps:$4 sm:$0xff]   ;;  %v7615_v35 = vld [vmem:[#allocation7 + $0xf0] ss:$8 sps:$4 sm:$0xff]  }
 0x4a5   :  { %5664 = vmatprep.subr.bf16.mxu1 %v7524_v16  ;;  %5836 = vmatprep.subr.bf16.mxu0 %v7527_v55  ;;  %v7620_v16 = vld [vmem:[#allocation7 + $0x104] ss:$8 sps:$4 sm:$0xff]  }
 0x4a6   :  { %v7666_v55 = vld [vmem:[%s9682_s11 + $0x40] sm:$0xff]  }
 0x4a8   :  { %5665 = vmatpush1.bf16.msra.mxu1 %v7522_v42  ;;  %5837 = vmatpush1.bf16.msra.mxu0 %v7525_v39  ;;  %v7667_v42 = vld [vmem:[%s9682_s11] sm:$0xff]   ;;  %v7668_v39 = vld [vmem:[%s9682_s11 + $0x48] sm:$0xff]  }
 0x4a9   :  { %5666 = vmatprep.subr.bf16.mxu1 %v7530_v30  ;;  %5838 = vmatprep.subr.bf16.mxu0 %v7533_v12  ;;  %v7669_v30 = vld [vmem:[%s9682_s11 + $0x8] sm:$0xff]   ;;  %v7670_v12 = vld [vmem:[%s9682_s11 + $0x50] sm:$0xff]  }
 0x4ac   :  { %5667 = vmatpush1.bf16.msra.mxu1 %v7528_v59  ;;  %5839 = vmatpush1.bf16.msra.mxu0 %v7531_v24  ;;  %v7671_v59 = vld [vmem:[%s9682_s11 + $0x10] sm:$0xff]   ;;  %v7672_v24 = vld [vmem:[%s9682_s11 + $0x58] sm:$0xff]  }
 0x4ad   :  { %5668 = vmatprep.subr.bf16.mxu1 %v7536_v7  ;;  %5840 = vmatprep.subr.bf16.mxu0 %v7539_v22  ;;  %v7673_v7 = vld [vmem:[%s9682_s11 + $0x18] sm:$0xff]   ;;  %v7674_v22 = vld [vmem:[%s9682_s11 + $0x60] sm:$0xff]  }
 0x4b0   :  { %5669 = vmatpush1.bf16.msra.mxu1 %v7534_v37  ;;  %5841 = vmatpush1.bf16.msra.mxu0 %v7537_v2  ;;  %v7675_v37 = vld [vmem:[%s9682_s11 + $0x20] sm:$0xff]   ;;  %v7676_v2 = vld [vmem:[%s9682_s11 + $0x68] sm:$0xff]  }
 0x4b1   :  { %5670 = vmatprep.subr.bf16.mxu1 %v7542_v8  ;;  %5842 = vmatprep.subr.bf16.mxu0 %v7545_v29  ;;  %v3826_v8 = vld [vmem:[%s9679_s8] sm:$0xf]  ;;  %v9829_v29 = vld [vmem:[#allocation15_spill] sm:$0xff] }
 0x4b4   :  { %5671 = vmatpush1.bf16.msra.mxu1 %v7540_v23  ;;  %5843 = vmatpush1.bf16.msra.mxu0 %v7543_v46  ;;  %v3831_v23 = vrot.slane %v3826_v8, %v9829_v29  ;;  %v9830_v46 = vld [vmem:[#allocation14_spill] sm:$0xff] }
 0x4b5   :  { %5672 = vmatprep.subr.bf16.mxu1 %v7548_v27  ;;  %5844 = vmatprep.subr.bf16.mxu0 %v7551_v50  ;;  %v3839_v27 = vrot.slane %v3826_v8, %v9830_v46  ;;  %v9831_v50 = vld [vmem:[#allocation13_spill] sm:$0xff]  ;;  %v7660_v46 = vld [vmem:[#allocation7 + $0x1e0] ss:$8 sps:$4 sm:$0xff]  }
 0x4b8   :  { %5673 = vmatpush1.bf16.msra.mxu1 %v7546_v6  ;;  %5845 = vmatpush1.bf16.msra.mxu0 %v7549_v5  ;;  %v3835_v6 = vrot.slane %v3826_v8, %v9831_v50  ;;  %v9832_v5 = vld [vmem:[#allocation12_spill] sm:$0xff] }
 0x4b9   :  { %5674 = vmatprep.subr.bf16.mxu1 %v7554_v17  ;;  %5846 = vmatprep.subr.bf16.mxu0 %v7557_v0  ;;  %v9833_v17 = vsub.s32 3, %v9832_v5  ;;  %v7677_v5 = vld [vmem:[%s9682_s11 + $0x28] sm:$0xff]  }
 0x4bb   :  { %v3843_v0 = vrot.slane %v3826_v8, %v9833_v17  ;;  %v7657_v8 = vld [vmem:[#allocation7 + $0x1d0] ss:$8 sps:$4 sm:$0xff]  }
 0x4bc   :  { %5675 = vmatpush1.bf16.msra.mxu1 %v7552_v47  ;;  %5847 = vmatpush1.bf16.msra.mxu0 %v7555_v45  ;;  %v7678_v17 = vld [vmem:[%s9682_s11 + $0x70] sm:$0xff]  }
 0x4bd   :  { %5676 = vmatprep.subr.bf16.mxu1 %v7560_v41  ;;  %5848 = vmatprep.subr.bf16.mxu0 %v7563_v3 }
 0x4c0   :  { %5677 = vmatpush1.bf16.msra.mxu1 %v7558_v15  ;;  %5849 = vmatpush1.bf16.msra.mxu0 %v7561_v48 }
 0x4c1   :  { %5678 = vmatprep.subr.bf16.mxu1 %v7566_v40  ;;  %5850 = vmatprep.subr.bf16.mxu0 %v7569_v20 }
 0x4c4   :  { %5679 = vmatpush1.bf16.msra.mxu1 %v7564_v21  ;;  %5851 = vmatpush1.bf16.msra.mxu0 %v7567_v52 }
 0x4c5   :  { %6271 = vmatprep.subr.bf16.mxu1 %v7572_v56  ;;  %7020 = vmatprep.subr.bf16.mxu0 %v7666_v55  ;;  %v7644_v55 = vld [vmem:[#allocation7 + $0x184] ss:$8 sps:$4 sm:$0xff]  }
 0x4c7   :  { %5681 = vmatmul.mubr.bf16.vlgmr.msra.gmra.mrb[128].mxu1 %v9585_v4  ;;  %5853 = vmatmul.mubr.bf16.vlgmr.msra.gmra.mrb[160].mxu0 %v9585_v4  ;;  %v7590_v4 = vld [vmem:[#allocation7 + $0x64] ss:$8 sps:$4 sm:$0xff]  }
 0x4c8   :  { %6272 = vmatpush1.bf16.msra.mxu1 %v7570_v51  ;;  %7021 = vmatpush3.bf16.msra.mxu0 %v7667_v42  ;;  %v7642_v42 = vld [vmem:[#allocation7 + $0x180] ss:$8 sps:$4 sm:$0xff]  }
 0x4c9   :  { %6273 = vmatprep.subr.bf16.mxu1 %v7575_v13  ;;  %7022 = vmatprep.subr.bf16.mxu0 %v7668_v39  ;;  %v7647_v39 = vld [vmem:[#allocation7 + $0x194] ss:$8 sps:$4 sm:$0xff]  }
 0x4cc   :  { %6274 = vmatpush1.bf16.msra.mxu1 %v7573_v60  ;;  %7023 = vmatpush3.bf16.msra.mxu0 %v7669_v30  ;;  %v7645_v30 = vld [vmem:[#allocation7 + $0x190] ss:$8 sps:$4 sm:$0xff]  }
 0x4cd   :  { %6275 = vmatprep.subr.bf16.mxu1 %v7578_v25  ;;  %7024 = vmatprep.subr.bf16.mxu0 %v7670_v12  ;;  %v7650_v12 = vld [vmem:[#allocation7 + $0x1a4] ss:$8 sps:$4 sm:$0xff]  }
 0x4d0   :  { %6276 = vmatpush1.bf16.msra.mxu1 %v7576_v44  ;;  %7025 = vmatpush3.bf16.msra.mxu0 %v7671_v59  ;;  %v7648_v59 = vld [vmem:[#allocation7 + $0x1a0] ss:$8 sps:$4 sm:$0xff]  }
 0x4d1   :  { %6277 = vmatprep.subr.bf16.mxu1 %v7581_v63  ;;  %7026 = vmatprep.subr.bf16.mxu0 %v7672_v24  ;;  %v7653_v24 = vld [vmem:[#allocation7 + $0x1b4] ss:$8 sps:$4 sm:$0xff]  }
 0x4d4   :  { %6278 = vmatpush1.bf16.msra.mxu1 %v7579_v11  ;;  %7027 = vmatpush3.bf16.msra.mxu0 %v7673_v7  ;;  %v7651_v7 = vld [vmem:[#allocation7 + $0x1b0] ss:$8 sps:$4 sm:$0xff]  }
 0x4d5   :  { %6279 = vmatprep.subr.bf16.mxu1 %v7584_v43  ;;  %7028 = vmatprep.subr.bf16.mxu0 %v7674_v22  ;;  %v7656_v22 = vld [vmem:[#allocation7 + $0x1c4] ss:$8 sps:$4 sm:$0xff]  }
 0x4d8   :  { %6280 = vmatpush1.bf16.msra.mxu1 %v7582_v10  ;;  %7029 = vmatpush3.bf16.msra.mxu0 %v7675_v37  ;;  %v7654_v37 = vld [vmem:[#allocation7 + $0x1c0] ss:$8 sps:$4 sm:$0xff]  }
 0x4d9   :  { %6281 = vmatprep.subr.bf16.mxu1 %v7587_v34  ;;  %7030 = vmatprep.subr.bf16.mxu0 %v7676_v2  ;;  %v7659_v2 = vld [vmem:[#allocation7 + $0x1d4] ss:$8 sps:$4 sm:$0xff]  }
 0x4dc   :  { %6282 = vmatpush1.bf16.msra.mxu1 %v7585_v62  ;;  %7031 = vmatpush3.bf16.msra.mxu0 %v7677_v5 }
 0x4dd   :  { %6283 = vmatprep.subr.bf16.mxu1 %v7590_v4  ;;  %7032 = vmatprep.subr.bf16.mxu0 %v7678_v17 }
 0x4e0   :  { %6284 = vmatpush1.bf16.msra.mxu1 %v7588_v1 }
 0x4e1   :  { %6285 = vmatprep.subr.bf16.mxu1 %v7593_v53 }
 0x4e4   :  { %6286 = vmatpush1.bf16.msra.mxu1 %v7591_v19 }
 0x4e5   :  { %6287 = vmatprep.subr.bf16.mxu1 %v7596_v32 }
 0x4e8   :  { %6288 = vmatpush1.bf16.msra.mxu1 %v7594_v18 }
 0x4e9   :  { %6289 = vmatprep.subr.bf16.mxu1 %v7599_v58  ;;  %v7618_v58 = vld [vmem:[#allocation7 + $0x100] ss:$8 sps:$4 sm:$0xff]  }
 0x4ec   :  { %6290 = vmatpush1.bf16.msra.mxu1 %v7597_v36  ;;  %v7623_v36 = vld [vmem:[#allocation7 + $0x114] ss:$8 sps:$4 sm:$0xff]  }
 0x4ed   :  { %6291 = vmatprep.subr.bf16.mxu1 %v7602_v31  ;;  %v7621_v31 = vld [vmem:[#allocation7 + $0x110] ss:$8 sps:$4 sm:$0xff]  }
 0x4f0   :  { %6292 = vmatpush1.bf16.msra.mxu1 %v7600_v38  ;;  %v7626_v38 = vld [vmem:[#allocation7 + $0x124] ss:$8 sps:$4 sm:$0xff]  }
 0x4f1   :  { %6293 = vmatprep.subr.bf16.mxu1 %v7605_v57  ;;  %v7624_v57 = vld [vmem:[#allocation7 + $0x120] ss:$8 sps:$4 sm:$0xff]  }
 0x4f4   :  { %6294 = vmatpush1.bf16.msra.mxu1 %v7603_v61  ;;  %v7629_v61 = vld [vmem:[#allocation7 + $0x134] ss:$8 sps:$4 sm:$0xff]  }
 0x4f5   :  { %6295 = vmatprep.subr.bf16.mxu1 %v7608_v9  ;;  %v7627_v9 = vld [vmem:[#allocation7 + $0x130] ss:$8 sps:$4 sm:$0xff]  }
 0x4f8   :  { %6296 = vmatpush1.bf16.msra.mxu1 %v7606_v54  ;;  %v7632_v54 = vld [vmem:[#allocation7 + $0x144] ss:$8 sps:$4 sm:$0xff]  }
 0x4f9   :  { %6297 = vmatprep.subr.bf16.mxu1 %v7611_v26  ;;  %v7630_v26 = vld [vmem:[#allocation7 + $0x140] ss:$8 sps:$4 sm:$0xff]  }
 0x4fc   :  { %6298 = vmatpush1.bf16.msra.mxu1 %v7609_v33  ;;  %v7635_v33 = vld [vmem:[#allocation7 + $0x154] ss:$8 sps:$4 sm:$0xff]  }
 0x4fd   :  { %6299 = vmatprep.subr.bf16.mxu1 %v7614_v14  ;;  %v7638_v14 = vld [vmem:[#allocation7 + $0x164] ss:$8 sps:$4 sm:$0xff]  }
 0x500   :  { %6300 = vmatpush1.bf16.msra.mxu1 %v7612_v49  ;;  %v7633_v49 = vld [vmem:[#allocation7 + $0x150] ss:$8 sps:$4 sm:$0xff]  }
 0x501   :  { %6301 = vmatprep.subr.bf16.mxu1 %v7617_v28  ;;  %v7636_v28 = vld [vmem:[#allocation7 + $0x160] ss:$8 sps:$4 sm:$0xff]  }
 0x504   :  { %6302 = vmatpush1.bf16.msra.mxu1 %v7615_v35  ;;  %v7641_v35 = vld [vmem:[#allocation7 + $0x174] ss:$8 sps:$4 sm:$0xff]  }
 0x505   :  { %6314 = vmatprep.subr.bf16.mxu1 %v7620_v16  ;;  %v7639_v16 = vld [vmem:[#allocation7 + $0x170] ss:$8 sps:$4 sm:$0xff]  }
 0x59a   :  { %v5682_v47 = vpop.f32.mrb[128].mxu1  ;;  %v5854_v45 = vpop.f32.mrb[160].mxu0 }
 0x59b   :  { %v7082_v41 = vadd.f32 %v5682_v47, %v3831_v23  ;;  %v7086_v3 = vadd.f32 %v5854_v45, %v3839_v27  ;;  %v5684_v15 = vpop.f32.mrb[129].mxu1  ;;  %v5856_v48 = vpop.f32.mrb[161].mxu0  ;;  %v7680_v47 = vld [vmem:[%s9682_s11 + $0x78] sm:$0xff]  }
 0x59c   :  { %v7083_v40 = vadd.f32 %v5684_v15, %v3835_v6  ;;  %v7087_v20 = vadd.f32 %v5856_v48, %v3843_v0  ;;  %v5686_v21 = vpop.f32.mrb[130].mxu1  ;;  %v5858_v52 = vpop.f32.mrb[162].mxu0  ;;  %v7681_v45 = vld [vmem:[%s9682_s11 + $0x38] sm:$0xff]  }
 0x59d   :  { %v7084_v56 = vadd.f32 %v5686_v21, %v3831_v23  ;;  %v7088_v51 = vadd.f32 %v5858_v52, %v3839_v27  ;;  %v5688_v13 = vpop.f32.mrb[131].mxu1  ;;  %v5860_v60 = vpop.f32.mrb[163].mxu0  ;;  %v5863_v63 = vmax.f32 %v7082_v41, 0.0  ;;  %v5865_v11 = vmax.f32 %v7086_v3, 0.0  ;;  %v7662_v23 = vld [vmem:[#allocation7 + $0x1e4] ss:$8 sps:$4 sm:$0xff]  }
 0x59e   :  { %v7085_v25 = vadd.f32 %v5688_v13, %v3835_v6  ;;  %v7089_v44 = vadd.f32 %v5860_v60, %v3843_v0  ;;  %v5864_v34 = vmax.f32 %v7083_v40, 0.0  ;;  %v5866_v62 = vmax.f32 %v7087_v20, 0.0  ;;  %v7665_v27 = vld [vmem:[#allocation7 + $0x1f4] ss:$8 sps:$4 sm:$0xff]   ;;  %v7663_v6 = vld [vmem:[#allocation7 + $0x1f0] ss:$8 sps:$4 sm:$0xff]  }
 0x59f   :  { %v5867_v43 = vmax.f32 %v7084_v56, 0.0  ;;  %v5869_v10 = vmax.f32 %v7088_v51, 0.0  ;;  %v7679_v0 = vld [vmem:[%s9682_s11 + $0x30] sm:$0xff]   ;;  %v5939_v41 = vld [vmem:[%s9681_s10] sm:$0x3] }
 0x5a0   :  { %v5868_v4 = vmax.f32 %v7085_v25, 0.0  ;;  %v5870_v1 = vmax.f32 %v7089_v44, 0.0  ;;  %7033 = vmatpush3.bf16.msra.mxu0 %v7679_v0  ;;  %v5944_v3 = vrot.slane %v5939_v41, %v9829_v29  ;;  %v5948_v15 = vrot.slane %v5939_v41, %v9831_v50  ;;  %v6983_v29 = vld [vmem:[%s9683_s12] ss:$0 sm:$0xff]  ;;  %s7797_s12 = smov [#allocation8]  }
 0x5a1   :  { %v5871_v53 = vpack.c.bf16 %v5867_v43, %v5863_v63  ;;  %v9630_v19 = vpack.c.bf16 %v5869_v10, %v5865_v11  ;;  %7034 = vmatprep.subr.bf16.mxu0 %v7680_v47  ;;  %s6564_s3 = sshll.u32 %s7797_s12, 4  ;;  %s6565_s3 = int_to_ptr.vmem [resolvable:$true] %s6564_s3 }
 0x5a2   :  { %v5872_v32 = vpack.c.bf16 %v5868_v4, %v5864_v34  ;;  %v5874_v18 = vpack.c.bf16 %v5870_v1, %v5866_v62  ;;  %s7757_s25 = scalar_lea.vmem %s6565_s3, 256  ;;  %p7762_p11 = scmp.lt.s32.totalorder %s6565_s3, %s6565_s3 }
 0x5a3   :  { %p7758_p10 = scmp.ne.s32.totalorder %s6565_s3, %s7757_s25  ;;  %p7763_p12 = scmp.lt.s32.totalorder %s7757_s25, %s7757_s25 }
 0x5a4   :  { %6303 = vmatprep.mubr.bf16.mxu1 %v5872_v32  ;;  %7035 = vmatpush3.bf16.msra.mxu0 %v7681_v45 }
 0x5a5   :  { %6304 = vmatmul.mubr.bf16.vlgmr.msra.gmra.mrb[132].mxu1 %v5871_v53  ;;  %p7764_p13 = por %p7763_p12, %p7762_p11 }
 0x5a6   :  { %6315 = vmatpush1.bf16.msra.mxu1 %v7618_v58  ;;  %6346 = vmatprep.mubr.bf16.mxu1 %v5874_v18 }
 0x5a7   :  { %6316 = vmatprep.subr.bf16.mxu1 %v7623_v36  ;;  %p7765_p0 = pnand %p7764_p13, %p7758_p10 }
 0x5aa   :  { %6317 = vmatpush1.bf16.msra.mxu1 %v7621_v31 }
 0x5ab   :  { %6318 = vmatprep.subr.bf16.mxu1 %v7626_v38 }
 0x5ae   :  { %6319 = vmatpush1.bf16.msra.mxu1 %v7624_v57 }
 0x5af   :  { %6320 = vmatprep.subr.bf16.mxu1 %v7629_v61 }
 0x5b2   :  { %6321 = vmatpush1.bf16.msra.mxu1 %v7627_v9 }
 0x5b3   :  { %6322 = vmatprep.subr.bf16.mxu1 %v7632_v54 }
 0x5b6   :  { %6323 = vmatpush1.bf16.msra.mxu1 %v7630_v26 }
 0x5b7   :  { %6324 = vmatprep.subr.bf16.mxu1 %v7635_v33 }
 0x5ba   :  { %6325 = vmatpush1.bf16.msra.mxu1 %v7633_v49 }
 0x5bb   :  { %6326 = vmatprep.subr.bf16.mxu1 %v7638_v14 }
 0x5be   :  { %6327 = vmatpush1.bf16.msra.mxu1 %v7636_v28 }
 0x5bf   :  { %6328 = vmatprep.subr.bf16.mxu1 %v7641_v35 }
 0x5c2   :  { %6329 = vmatpush1.bf16.msra.mxu1 %v7639_v16 }
 0x5c3   :  { %6330 = vmatprep.subr.bf16.mxu1 %v7644_v55 }
 0x5c6   :  { %6331 = vmatpush1.bf16.msra.mxu1 %v7642_v42 }
 0x5c7   :  { %6332 = vmatprep.subr.bf16.mxu1 %v7647_v39 }
 0x5ca   :  { %6333 = vmatpush1.bf16.msra.mxu1 %v7645_v30 }
 0x5cb   :  { %6334 = vmatprep.subr.bf16.mxu1 %v7650_v12 }
 0x5ce   :  { %6335 = vmatpush1.bf16.msra.mxu1 %v7648_v59 }
 0x5cf   :  { %6336 = vmatprep.subr.bf16.mxu1 %v7653_v24 }
 0x5d2   :  { %6337 = vmatpush1.bf16.msra.mxu1 %v7651_v7 }
 0x5d3   :  { %6338 = vmatprep.subr.bf16.mxu1 %v7656_v22 }
 0x5d6   :  { %6339 = vmatpush1.bf16.msra.mxu1 %v7654_v37 }
 0x5d7   :  { %6340 = vmatprep.subr.bf16.mxu1 %v7659_v2 }
 0x5da   :  { %6341 = vmatpush1.bf16.msra.mxu1 %v7657_v8 }
 0x5db   :  { %6342 = vmatprep.subr.bf16.mxu1 %v7662_v23 }
 0x5de   :  { %6343 = vmatpush1.bf16.msra.mxu1 %v7660_v46 }
 0x5df   :  { %6344 = vmatprep.subr.bf16.mxu1 %v7665_v27 }
 0x5e2   :  { %6345 = vmatpush1.bf16.msra.mxu1 %v7663_v6 }
 0x5e5   :  { %6347 = vmatmul.mubr.bf16.vlgmr.msra.gmra.mrb[132].mxu1 %v9630_v19 }
 0x6b8   :  { %v6348_v48 = vpop.f32.mrb[132].mxu1 }
 0x6b9   :  { %v7090_v40 = vadd.f32 %v6348_v48, %v5944_v3  ;;  %v6350_v20 = vpop.f32.mrb[133].mxu1 }
 0x6ba   :  { %v7091_v21 = vadd.f32 %v6350_v20, %v5948_v15  ;;  %v6352_v52 = vpop.f32.mrb[134].mxu1 }
 0x6bb   :  { %v7092_v56 = vadd.f32 %v6352_v52, %v5944_v3  ;;  %v6354_v51 = vpop.f32.mrb[135].mxu1  ;;  %v6357_v60 = vmax.f32 %v7090_v40, 0.0 }
 0x6bc   :  { %v7093_v13 = vadd.f32 %v6354_v51, %v5948_v15  ;;  %v6358_v44 = vmax.f32 %v7091_v21, 0.0 }
 0x6bd   :  { %v6359_v25 = vmax.f32 %v7092_v56, 0.0 }
 0x6be   :  { %v6360_v63 = vmax.f32 %v7093_v13, 0.0 }
 0x6bf   :  { %v6361_v11 = vpack.c.bf16 %v6359_v25, %v6357_v60 }
 0x6c0   :  { %v6362_v43 = vpack.c.bf16 %v6360_v63, %v6358_v44 }
 0x6c2   :  { %6530 = vmatprep.mubr.bf16.mxu0 %v6362_v43 }
 0x6c3   :  { %6531 = vmatmul.mubr.bf16.vlgmr.msra.gmra.mrb[164].mxu0 %v6361_v11 }
 0x796   :  { %v7036_v10 = vpop.f32.mrb[164].mxu0 }
 0x797   :  { %v7037_v50 = vpop.f32.mrb[165].mxu0 }
 0x798   :  { %v7038_v34 = vadd.f32 %v7037_v50, %v7036_v10  ;;  %v7039_v62 = vpop.f32.mrb[166].mxu0 }
 0x799   :  { %v7040_v4 = vpop.f32.mrb[167].mxu0 }
 0x79a   :  { %v6533_v1 = vadd.f32 %v7038_v34, %v6983_v29  ;;  %v7041_v53 = vadd.f32 %v7040_v4, %v7039_v62 }
 0x79c   :  { %6539 = vmax.xlane.f32.xlu1 %v6533_v1  ;;  %v6536_v19 = vadd.f32 %v7041_v53, %v6983_v29 }
 0x79e   :  { %6541 = vmax.xlane.f32.xlu0 %v6536_v19 }
 0x829   :  { %v6540_v32 = vpop.xlane.xlu1 %6539 }
 0x82a   :  { %v6543_v18 = vsub.f32 %v6533_v1, %v6540_v32 }
 0x82b   :  { %v6542_v58 = vpop.xlane.xlu0 %6541 }
 0x82c   :  { %v6545_v36 = vmul.f32 1.442695, %v6543_v18  ;;  %v6544_v31 = vsub.f32 %v6536_v19, %v6542_v58 }
 0x82e   :  { %7682 = vpow2.f32 %v6545_v36  ;;  %v6547_v38 = vmul.f32 1.442695, %v6544_v31 }
 0x830   :  { %7684 = vpow2.f32 %v6547_v38 }
 0x838   :  { %v7683_v57 = vpop.eup %7682 }
 0x839   :  { %6549 = vadd.xlane.f32.xlu0 %v7683_v57 }
 0x83a   :  { %v7685_v61 = vpop.eup %7684 }
 0x83b   :  { %6551 = vadd.xlane.f32.xlu1 %v7685_v61 }
 0x8c6   :  { %v6550_v9 = vpop.xlane.xlu0 %6549 }
 0x8c7   :  { %7686 = vrcp.f32 %v6550_v9 }
 0x8c8   :  { %v6552_v54 = vpop.xlane.xlu1 %6551 }
 0x8c9   :  { %7688 = vrcp.f32 %v6552_v54 }
 0x8d1   :  { %v7687_v26 = vpop.eup %7686 }
 0x8d2   :  { %v6554_v33 = vmul.f32 %v7687_v26, %v7683_v57 }
 0x8d3   :  { %v7689_v49 = vpop.eup %7688 }
 0x8d4   :  { %v6556_v14 = vmul.f32 %v7689_v49, %v7685_v61  ;;  %6557 = vst [vmem:[#allocation8] sm:$0xff] %v6554_v33 }
 0x8d6   :  { %6558 = vst [vmem:[#allocation8 + $0x8] sm:$0xff] %v6556_v14 }
 0x8d7   :  { %7768 = shalt.err (!%p7765_p0)
}
 0x8d8   :  { %s7769_s28 = scalar_lea.hbm %s9684_s13, 256 }
 0x8d9   :  { %p7770_p1 = scmp.ne.s32.totalorder %s9684_s13, %s7769_s28  ;;  %p7773_p2 = scmp.lt.u32.totalorder %s7769_s28, %s9684_s13 }
 0x8db   :  { %p7775_p3 = pnand %p7773_p2, %p7770_p1 }
 0x8dd   :  { %7778 = shalt.err (!%p7775_p3)
}
 0x8de   :  { %6570 = dma.vmem_to_hbm [thread:$0]  %s6565_s3, 256, %s9684_s13, [#allocation4], %s7792_s5, %s7792_s5, %s7793_s23  }
 0x8df   :  { %7783 = dma.done.wait [#allocation4], 256  }
 0x8e0   :  { %7784 = vsyncadd [#allocation4], 4294967040 }
 0x8e1   :  { %6574 = vsyncpa [#allocation3], 1 }
 0x8e2   :  { %6575 = vsyncpa [#allocation6], 1 }
 0x8e3   :  { %6576 = vsyncpa [#allocation4], 1 }

</bundles_post_ra>
